<compile_context>
chip_gen: v6e
topology: v6e:2x2x1
jax: 0.10.0
libtpu: 0.0.40
codegen_flags: <defaults>
</compile_context>

<pallas_src>
from functools import partial

import jax
import jax.numpy as jnp
from jax import lax
from jax.experimental import pallas as pl
from jax.experimental.pallas import tpu as pltpu

EPS = 1e-5
_INV_SQRT2 = 0.70710678118654752


def _layer_norm(x, w, b):
    # One-pass biased mean/variance (sum + sum-of-squares), stats in f32.
    inv_n = jnp.float32(1.0 / x.shape[-1])
    s1 = jnp.sum(x, axis=-1, keepdims=True)
    s2 = jnp.sum(x * x, axis=-1, keepdims=True)
    mu = s1 * inv_n
    var = s2 * inv_n - mu * mu
    return (x - mu) * lax.rsqrt(var + EPS) * w + b


def _gelu_exact(x):
    return 0.5 * x * (1.0 + lax.erf(x * jnp.float32(_INV_SQRT2)))


def attention_block_kernel(seq_len,
                           x_ref,
                           wqkv_ref,          # (E, 3E) pre-T, scale/gamma folded
                           hmask_ref,         # (E, E) 0/1 head pool+broadcast
                           ln_pre_att_w, ln_pre_att_b,
                           ln_post_att_w, ln_post_att_b,
                           ln_pre_fc_w, ln_pre_fc_b,
                           fc1_wT, fc1_b,     # (E, FC), (1, FC)
                           ln_post_fc_w, ln_post_fc_b,
                           fc2_wT, fc2_b,     # (FC, E), (1, E)
                           lam_ref,
                           o_ref):
    rows, E = x_ref.shape
    S = seq_len
    Bt = rows // S
    wdt = wqkv_ref.dtype                      # matmul storage dtype (f32/bf16)

    xb = x_ref[...].astype(jnp.float32)       # (rows, E), stats always in f32

    # ---- pre-attention layernorm ----
    residual = xb
    xn = _layer_norm(xb, ln_pre_att_w[0], ln_pre_att_b[0])

    # ---- fused Q/K/V projection: one MXU matmul -> (rows, 3E) ----
    qkv = jnp.dot(xn.astype(wdt), wqkv_ref[...],
                  preferred_element_type=jnp.float32)
    q = qkv[:, :E].reshape(Bt, S, E)          # leading-dim reshapes only
    k = qkv[:, E:2 * E].reshape(Bt, S, E)
    v = qkv[:, 2 * E:3 * E].reshape(Bt, S, E)

    # ---- all-head attention, no per-head slicing / tiny-K matmuls ----
    # per-channel score contributions q[b,i,e]*k[b,j,e]        (VPU)
    qk = q[:, :, None, :] * k[:, None, :, :]                   # (Bt,S,S,E)
    # sum within each head AND broadcast back to its hd channels (MXU):
    # scores[b,i,j,e] == <q_head(e), k_head(e)> (1/sqrt(hd) already folded)
    scores = jnp.dot(qk.reshape(Bt * S * S, E), hmask_ref[...],
                     preferred_element_type=jnp.float32).reshape(Bt, S, S, E)
    m = jnp.max(scores, axis=2, keepdims=True)
    p = jnp.exp(scores - m)
    denom = jnp.sum(p, axis=2, keepdims=True)
    p = p * pl.reciprocal(denom, approx=True)
    # weighted sum over keys (VPU multiply + sublane-axis reduce); gamma is
    # already folded into the V weight columns.
    att = jnp.sum(p * v[:, None, :, :], axis=2)                 # (Bt,S,E)
    att2 = att.reshape(rows, E)
    # NOTE: out_linear(weighted_sum) is computed but NOT returned by the
    # reference MultiheadAttention.forward -> intentionally omitted.

    # ---- post-attention layernorm, dropout(identity), residual add ----
    y = _layer_norm(att2, ln_post_att_w[0], ln_post_att_b[0]) + residual

    # ---- MLP branch ----
    z = _layer_norm(y, ln_pre_fc_w[0], ln_pre_fc_b[0])
    z = jnp.dot(z.astype(wdt), fc1_wT[...],
                preferred_element_type=jnp.float32) + fc1_b[0]
    z = _gelu_exact(z)
    z = _layer_norm(z, ln_post_fc_w[0], ln_post_fc_b[0])
    z = jnp.dot(z.astype(wdt), fc2_wT[...],
                preferred_element_type=jnp.float32) + fc2_b[0]

    o_ref[...] = (z + lam_ref[0] * y).astype(o_ref.dtype)


def _vmem_limit_bytes():
    # Generation-aware VMEM cap: ~3/4 of physical (96 MiB on v5e/v6e's
    # 128 MiB, 48 MiB on v7x's 64 MiB), never above 100 MiB.
    try:
        cap = int(pltpu.get_tpu_info().vmem_capacity_bytes)
    except Exception:
        cap = 64 * 1024 * 1024
    return int(min(cap * 3 // 4, 100 * 1024 * 1024))


def attention_block(x, params, num_heads, block_b=None,
                    matmul_dtype=jnp.bfloat16):
    B, S, E = x.shape
    hd = E // num_heads

    # Single fat grid step by default: per-step overhead dominates at small
    # shapes and the grid is a serial loop on single-TC chips anyway.
    if block_b is None:
        block_b = B
    assert B % block_b == 0
    num_blocks = B // block_b
    rows_per_block = block_b * S

    # ---- host-side weight plumbing (pre-transpose, fuse, fold constants) ----
    scale = 1.0 / (hd ** 0.5)
    gamma_full = jnp.repeat(params["gamma"], hd)            # (E,), per channel
    wq_s = params["wq"] * scale                              # fold 1/sqrt(hd)
    wv_s = params["wv"] * gamma_full[:, None]                # fold gamma
    wqkv = jnp.concatenate([wq_s.T, params["wk"].T, wv_s.T],
                           axis=1).astype(matmul_dtype)      # (E, 3E)
    fc1_wT = params["fc1_w"].T.astype(matmul_dtype)          # (E, FC)
    fc2_wT = params["fc2_w"].T.astype(matmul_dtype)          # (FC, E)
    # 0/1 head-membership matrix: pools each head's channels and broadcasts
    # the score back to that head's channels in one matmul (kept f32: exact).
    head_id = jnp.arange(E) // hd
    hmask = (head_id[:, None] == head_id[None, :]).astype(jnp.float32)

    x2d = x.reshape(B * S, E).astype(matmul_dtype)           # free relayout

    ordered = [
        wqkv, hmask,
        params["ln_pre_att_w"], params["ln_pre_att_b"],
        params["ln_post_att_w"], params["ln_post_att_b"],
        params["ln_pre_fc_w"], params["ln_pre_fc_b"],
        fc1_wT, params["fc1_b"],
        params["ln_post_fc_w"], params["ln_post_fc_b"],
        fc2_wT, params["fc2_b"],
        params["lam"],
    ]

    def full_spec(arr):
        nd = arr.ndim
        return pl.BlockSpec(arr.shape, lambda b, _nd=nd: (0,) * _nd)

    in_specs = [pl.BlockSpec((rows_per_block, E), lambda b: (b, 0))]
    in_specs += [full_spec(a) for a in ordered]
    out_spec = pl.BlockSpec((rows_per_block, E), lambda b: (b, 0))

    out2d = pl.pallas_call(
        partial(attention_block_kernel, S),
        out_shape=jax.ShapeDtypeStruct((B * S, E), jnp.float32),
        grid_spec=pltpu.PrefetchScalarGridSpec(
            num_scalar_prefetch=0,
            grid=(num_blocks,),
            in_specs=in_specs,
            out_specs=out_spec,
        ),
        compiler_params=pltpu.CompilerParams(
            # "parallel" buys nothing here (measured ~0 delta on v6e) and a
            # cross-TC split of a few-KiB block would be pure overhead.
            dimension_semantics=("arbitrary",),
            vmem_limit_bytes=_vmem_limit_bytes()),
    )(x2d, *ordered)

    return out2d.reshape(B, S, E)


# ----------------------------- pure-JAX reference -----------------------------
def reference(x, params, num_heads):
    B, S, E = x.shape
    hd = E // num_heads

    def ln(v, w, b):
        mu = jnp.mean(v, axis=-1, keepdims=True)
        var = jnp.mean((v - mu) ** 2, axis=-1, keepdims=True)
        return (v - mu) / jnp.sqrt(var + EPS) * w + b

    residual = x
    xn = ln(x, params["ln_pre_att_w"][0], params["ln_pre_att_b"][0])
    q = xn @ params["wq"].T
    k = xn @ params["wk"].T
    v = xn @ params["wv"].T
    q = q.reshape(B, S, num_heads, hd).transpose(0, 2, 1, 3)
    k = k.reshape(B, S, num_heads, hd).transpose(0, 2, 1, 3)
    v = v.reshape(B, S, num_heads, hd).transpose(0, 2, 1, 3)
    scores = jnp.einsum("bhqd,bhkd->bhqk", q, k) / (hd ** 0.5)
    attw = jax.nn.softmax(scores, axis=-1)
    ws = jnp.einsum("bhqk,bhkd->bhqd", attw, v)
    ws = jnp.einsum("bhtd,h->bhtd", ws, params["gamma"])
    ws = ws.transpose(0, 2, 1, 3).reshape(B, S, E)
    y = ln(ws, params["ln_post_att_w"][0], params["ln_post_att_b"][0])
    y = y + residual
    residual2 = y
    z = ln(y, params["ln_pre_fc_w"][0], params["ln_pre_fc_b"][0])
    z = z @ params["fc1_w"].T + params["fc1_b"][0]
    z = jax.nn.gelu(z, approximate=False)
    z = ln(z, params["ln_post_fc_w"][0], params["ln_post_fc_b"][0])
    z = z @ params["fc2_w"].T + params["fc2_b"][0]
    return z + params["lam"][0] * residual2


# ----------------------------------- main -----------------------------------
if __name__ == "__main__":
    B, S, E, H, FC = 4, 8, 32, 4, 64
    hd = E // H

    key = jax.random.PRNGKey(0)
    ks = jax.random.split(key, 12)

    params = {
        "wq": 0.1 * jax.random.normal(ks[0], (E, E), jnp.float32),
        "wk": 0.1 * jax.random.normal(ks[1], (E, E), jnp.float32),
        "wv": 0.1 * jax.random.normal(ks[2], (E, E), jnp.float32),
        "gamma": 1.0 + 0.1 * jax.random.normal(ks[3], (H,), jnp.float32),
        "ln_pre_att_w": jnp.ones((1, E), jnp.float32),
        "ln_pre_att_b": jnp.zeros((1, E), jnp.float32),
        "ln_post_att_w": 1.0 + 0.05 * jax.random.normal(ks[4], (1, E), jnp.float32),
        "ln_post_att_b": 0.05 * jax.random.normal(ks[5], (1, E), jnp.float32),
        "ln_pre_fc_w": jnp.ones((1, E), jnp.float32),
        "ln_pre_fc_b": jnp.zeros((1, E), jnp.float32),
        "fc1_w": 0.1 * jax.random.normal(ks[6], (FC, E), jnp.float32),
        "fc1_b": 0.1 * jax.random.normal(ks[7], (1, FC), jnp.float32),
        "ln_post_fc_w": jnp.ones((1, FC), jnp.float32),
        "ln_post_fc_b": jnp.zeros((1, FC), jnp.float32),
        "fc2_w": 0.1 * jax.random.normal(ks[8], (E, FC), jnp.float32),
        "fc2_b": 0.1 * jax.random.normal(ks[9], (1, E), jnp.float32),
        "lam": 1.0 + 0.1 * jax.random.normal(ks[10], (1, E), jnp.float32),
    }

    x = jax.random.normal(ks[11], (B, S, E), jnp.float32)
    ref = reference(x, params, H)

    # Strict correctness check: full-f32 storage path.
    out_f32 = jax.block_until_ready(
        attention_block(x, params, H, matmul_dtype=jnp.float32))
    assert out_f32.shape == (B, S, E)
    assert jnp.allclose(out_f32, ref, rtol=2e-2, atol=2e-2), "f32 mismatch"

    # Production path: bf16 storage for x / weight slabs, f32 accumulation
    # and f32 LN/softmax stats (looser tolerance for bf16 rounding).
    out_bf16 = jax.block_until_ready(attention_block(x, params, H))
    assert out_bf16.shape == (B, S, E)
    assert jnp.allclose(out_bf16, ref, rtol=1e-1, atol=1e-1), "bf16 mismatch"

    # TODO(synk): the x_clt / atte_mask / key_padding_mask branches and
    # training-mode dropout are not implemented (eval, self-attention path).
    print("KERNEL_OK")
</pallas_src>

<mosaic_0001>
module attributes {stable_mosaic.version = 11 : i64} {
  func.func @attention_block_kernel(%arg0: i32, %arg1: memref<32x32xf32, #tpu.memory_space<vmem>>, %arg2: memref<32x96xf32, #tpu.memory_space<vmem>>, %arg3: memref<32x32xf32, #tpu.memory_space<vmem>>, %arg4: memref<1x32xf32, #tpu.memory_space<vmem>>, %arg5: memref<1x32xf32, #tpu.memory_space<vmem>>, %arg6: memref<1x32xf32, #tpu.memory_space<vmem>>, %arg7: memref<1x32xf32, #tpu.memory_space<vmem>>, %arg8: memref<1x32xf32, #tpu.memory_space<vmem>>, %arg9: memref<1x32xf32, #tpu.memory_space<vmem>>, %arg10: memref<32x64xf32, #tpu.memory_space<vmem>>, %arg11: memref<1x64xf32, #tpu.memory_space<vmem>>, %arg12: memref<1x64xf32, #tpu.memory_space<vmem>>, %arg13: memref<1x64xf32, #tpu.memory_space<vmem>>, %arg14: memref<64x32xf32, #tpu.memory_space<vmem>>, %arg15: memref<1x32xf32, #tpu.memory_space<vmem>>, %arg16: memref<1x32xf32, #tpu.memory_space<vmem>>, %arg17: memref<32x32xf32, #tpu.memory_space<vmem>>) attributes {dimension_semantics = [#tpu.dimension_semantics<arbitrary>], iteration_bounds = array<i64: 1>, scalar_prefetch = 0 : i64, scratch_operands = 0 : i64, tpu.core_type = #tpu.core_type<tc>, window_params = [{transform_indices = @transform_0, window_bounds = array<i64: 32, 32>}, {pipeline_mode = #tpu.pipeline_mode<synchronous>, transform_indices = @transform_1, window_bounds = array<i64: 32, 96>}, {pipeline_mode = #tpu.pipeline_mode<synchronous>, transform_indices = @transform_2, window_bounds = array<i64: 32, 32>}, {pipeline_mode = #tpu.pipeline_mode<synchronous>, transform_indices = @transform_3, window_bounds = array<i64: 1, 32>}, {pipeline_mode = #tpu.pipeline_mode<synchronous>, transform_indices = @transform_4, window_bounds = array<i64: 1, 32>}, {pipeline_mode = #tpu.pipeline_mode<synchronous>, transform_indices = @transform_5, window_bounds = array<i64: 1, 32>}, {pipeline_mode = #tpu.pipeline_mode<synchronous>, transform_indices = @transform_6, window_bounds = array<i64: 1, 32>}, {pipeline_mode = #tpu.pipeline_mode<synchronous>, transform_indices = @transform_7, window_bounds = array<i64: 1, 32>}, {pipeline_mode = #tpu.pipeline_mode<synchronous>, transform_indices = @transform_8, window_bounds = array<i64: 1, 32>}, {pipeline_mode = #tpu.pipeline_mode<synchronous>, transform_indices = @transform_9, window_bounds = array<i64: 32, 64>}, {pipeline_mode = #tpu.pipeline_mode<synchronous>, transform_indices = @transform_10, window_bounds = array<i64: 1, 64>}, {pipeline_mode = #tpu.pipeline_mode<synchronous>, transform_indices = @transform_11, window_bounds = array<i64: 1, 64>}, {pipeline_mode = #tpu.pipeline_mode<synchronous>, transform_indices = @transform_12, window_bounds = array<i64: 1, 64>}, {pipeline_mode = #tpu.pipeline_mode<synchronous>, transform_indices = @transform_13, window_bounds = array<i64: 64, 32>}, {pipeline_mode = #tpu.pipeline_mode<synchronous>, transform_indices = @transform_14, window_bounds = array<i64: 1, 32>}, {pipeline_mode = #tpu.pipeline_mode<synchronous>, transform_indices = @transform_15, window_bounds = array<i64: 1, 32>}, {transform_indices = @transform_16, window_bounds = array<i64: 32, 32>}]} {
    %c0 = arith.constant 0 : index
    %c0_0 = arith.constant 0 : index
    %0 = vector.load %arg1[%c0, %c0_0] : memref<32x32xf32, #tpu.memory_space<vmem>>, vector<32x32xf32>
    %c0_1 = arith.constant 0 : index
    %c0_2 = arith.constant 0 : index
    %1 = vector.load %arg4[%c0_1, %c0_2] : memref<1x32xf32, #tpu.memory_space<vmem>>, vector<1x32xf32>
    %2 = vector.shape_cast %1 : vector<1x32xf32> to vector<32xf32>
    %c0_3 = arith.constant 0 : index
    %c0_4 = arith.constant 0 : index
    %3 = vector.load %arg5[%c0_3, %c0_4] : memref<1x32xf32, #tpu.memory_space<vmem>>, vector<1x32xf32>
    %4 = vector.shape_cast %3 : vector<1x32xf32> to vector<32xf32>
    %cst = arith.constant dense<0.000000e+00> : vector<32xf32>
    %5 = vector.multi_reduction <add>, %0, %cst [1] : vector<32x32xf32> to vector<32xf32>
    %6 = vector.shape_cast %5 : vector<32xf32> to vector<32x1xf32>
    %7 = arith.mulf %0, %0 : vector<32x32xf32>
    %cst_5 = arith.constant dense<0.000000e+00> : vector<32xf32>
    %8 = vector.multi_reduction <add>, %7, %cst_5 [1] : vector<32x32xf32> to vector<32xf32>
    %9 = vector.shape_cast %8 : vector<32xf32> to vector<32x1xf32>
    %cst_6 = arith.constant 3.125000e-02 : f32
    %10 = vector.broadcast %cst_6 : f32 to vector<32x1xf32>
    %11 = arith.mulf %6, %10 : vector<32x1xf32>
    %cst_7 = arith.constant 3.125000e-02 : f32
    %12 = vector.broadcast %cst_7 : f32 to vector<32x1xf32>
    %13 = arith.mulf %9, %12 : vector<32x1xf32>
    %14 = arith.mulf %11, %11 : vector<32x1xf32>
    %15 = arith.subf %13, %14 : vector<32x1xf32>
    %16 = vector.broadcast %11 : vector<32x1xf32> to vector<32x32xf32>
    %17 = arith.subf %0, %16 : vector<32x32xf32>
    %cst_8 = arith.constant 9.99999974E-6 : f32
    %18 = vector.broadcast %cst_8 : f32 to vector<32x1xf32>
    %19 = arith.addf %15, %18 : vector<32x1xf32>
    %20 = math.rsqrt %19 : vector<32x1xf32>
    %21 = vector.broadcast %20 : vector<32x1xf32> to vector<32x32xf32>
    %22 = arith.mulf %17, %21 : vector<32x32xf32>
    %23 = vector.shape_cast %2 : vector<32xf32> to vector<1x32xf32>
    %24 = vector.broadcast %23 : vector<1x32xf32> to vector<32x32xf32>
    %25 = arith.mulf %22, %24 : vector<32x32xf32>
    %26 = vector.shape_cast %4 : vector<32xf32> to vector<1x32xf32>
    %27 = vector.broadcast %26 : vector<1x32xf32> to vector<32x32xf32>
    %28 = arith.addf %25, %27 : vector<32x32xf32>
    %c0_9 = arith.constant 0 : index
    %c0_10 = arith.constant 0 : index
    %29 = vector.load %arg2[%c0_9, %c0_10] : memref<32x96xf32, #tpu.memory_space<vmem>>, vector<32x96xf32>
    %cst_11 = arith.constant dense<0.000000e+00> : vector<32x96xf32>
    %30 = tpu.matmul %28, %29, %cst_11 {dimension_numbers = #tpu.dot_dimension_numbers<[1], [0], [0], [1], [0, 0, 1, 1], [], []>} : vector<32x32xf32>, vector<32x96xf32>, vector<32x96xf32> -> vector<32x96xf32>
    %31 = vector.extract_strided_slice %30 {offsets = [0, 0], sizes = [32, 32], strides = [1, 1]} : vector<32x96xf32> to vector<32x32xf32>
    %32 = vector.shape_cast %31 : vector<32x32xf32> to vector<4x8x32xf32>
    %33 = vector.extract_strided_slice %30 {offsets = [0, 32], sizes = [32, 32], strides = [1, 1]} : vector<32x96xf32> to vector<32x32xf32>
    %34 = vector.shape_cast %33 : vector<32x32xf32> to vector<4x8x32xf32>
    %35 = vector.extract_strided_slice %30 {offsets = [0, 64], sizes = [32, 32], strides = [1, 1]} : vector<32x96xf32> to vector<32x32xf32>
    %36 = vector.shape_cast %35 : vector<32x32xf32> to vector<4x8x32xf32>
    %37 = vector.shape_cast %32 : vector<4x8x32xf32> to vector<4x8x1x32xf32>
    %38 = vector.shape_cast %34 : vector<4x8x32xf32> to vector<4x1x8x32xf32>
    %39 = vector.broadcast %37 : vector<4x8x1x32xf32> to vector<4x8x8x32xf32>
    %40 = vector.broadcast %38 : vector<4x1x8x32xf32> to vector<4x8x8x32xf32>
    %41 = arith.mulf %39, %40 : vector<4x8x8x32xf32>
    %42 = vector.shape_cast %41 : vector<4x8x8x32xf32> to vector<256x32xf32>
    %c0_12 = arith.constant 0 : index
    %c0_13 = arith.constant 0 : index
    %43 = vector.load %arg3[%c0_12, %c0_13] : memref<32x32xf32, #tpu.memory_space<vmem>>, vector<32x32xf32>
    %cst_14 = arith.constant dense<0.000000e+00> : vector<256x32xf32>
    %44 = tpu.matmul %42, %43, %cst_14 {dimension_numbers = #tpu.dot_dimension_numbers<[1], [0], [0], [1], [0, 0, 1, 1], [], []>} : vector<256x32xf32>, vector<32x32xf32>, vector<256x32xf32> -> vector<256x32xf32>
    %45 = vector.shape_cast %44 : vector<256x32xf32> to vector<4x8x8x32xf32>
    %cst_15 = arith.constant dense<0xFF800000> : vector<4x8x32xf32>
    %46 = vector.multi_reduction <maximumf>, %45, %cst_15 [2] : vector<4x8x8x32xf32> to vector<4x8x32xf32>
    %47 = vector.shape_cast %46 : vector<4x8x32xf32> to vector<4x8x1x32xf32>
    %48 = vector.broadcast %47 : vector<4x8x1x32xf32> to vector<4x8x8x32xf32>
    %49 = arith.subf %45, %48 : vector<4x8x8x32xf32>
    %50 = math.exp %49 : vector<4x8x8x32xf32>
    %cst_16 = arith.constant dense<0.000000e+00> : vector<4x8x32xf32>
    %51 = vector.multi_reduction <add>, %50, %cst_16 [2] : vector<4x8x8x32xf32> to vector<4x8x32xf32>
    %52 = vector.shape_cast %51 : vector<4x8x32xf32> to vector<4x8x1x32xf32>
    %53 = tpu.reciprocal %52 {approx = true} : vector<4x8x1x32xf32> -> vector<4x8x1x32xf32>
    %54 = vector.broadcast %53 : vector<4x8x1x32xf32> to vector<4x8x8x32xf32>
    %55 = arith.mulf %50, %54 : vector<4x8x8x32xf32>
    %56 = vector.shape_cast %36 : vector<4x8x32xf32> to vector<4x1x8x32xf32>
    %57 = vector.broadcast %56 : vector<4x1x8x32xf32> to vector<4x8x8x32xf32>
    %58 = arith.mulf %55, %57 : vector<4x8x8x32xf32>
    %cst_17 = arith.constant dense<0.000000e+00> : vector<4x8x32xf32>
    %59 = vector.multi_reduction <add>, %58, %cst_17 [2] : vector<4x8x8x32xf32> to vector<4x8x32xf32>
    %60 = vector.shape_cast %59 : vector<4x8x32xf32> to vector<32x32xf32>
    %c0_18 = arith.constant 0 : index
    %c0_19 = arith.constant 0 : index
    %61 = vector.load %arg6[%c0_18, %c0_19] : memref<1x32xf32, #tpu.memory_space<vmem>>, vector<1x32xf32>
    %62 = vector.shape_cast %61 : vector<1x32xf32> to vector<32xf32>
    %c0_20 = arith.constant 0 : index
    %c0_21 = arith.constant 0 : index
    %63 = vector.load %arg7[%c0_20, %c0_21] : memref<1x32xf32, #tpu.memory_space<vmem>>, vector<1x32xf32>
    %64 = vector.shape_cast %63 : vector<1x32xf32> to vector<32xf32>
    %cst_22 = arith.constant dense<0.000000e+00> : vector<32xf32>
    %65 = vector.multi_reduction <add>, %60, %cst_22 [1] : vector<32x32xf32> to vector<32xf32>
    %66 = vector.shape_cast %65 : vector<32xf32> to vector<32x1xf32>
    %67 = arith.mulf %60, %60 : vector<32x32xf32>
    %cst_23 = arith.constant dense<0.000000e+00> : vector<32xf32>
    %68 = vector.multi_reduction <add>, %67, %cst_23 [1] : vector<32x32xf32> to vector<32xf32>
    %69 = vector.shape_cast %68 : vector<32xf32> to vector<32x1xf32>
    %cst_24 = arith.constant 3.125000e-02 : f32
    %70 = vector.broadcast %cst_24 : f32 to vector<32x1xf32>
    %71 = arith.mulf %66, %70 : vector<32x1xf32>
    %cst_25 = arith.constant 3.125000e-02 : f32
    %72 = vector.broadcast %cst_25 : f32 to vector<32x1xf32>
    %73 = arith.mulf %69, %72 : vector<32x1xf32>
    %74 = arith.mulf %71, %71 : vector<32x1xf32>
    %75 = arith.subf %73, %74 : vector<32x1xf32>
    %76 = vector.broadcast %71 : vector<32x1xf32> to vector<32x32xf32>
    %77 = arith.subf %60, %76 : vector<32x32xf32>
    %cst_26 = arith.constant 9.99999974E-6 : f32
    %78 = vector.broadcast %cst_26 : f32 to vector<32x1xf32>
    %79 = arith.addf %75, %78 : vector<32x1xf32>
    %80 = math.rsqrt %79 : vector<32x1xf32>
    %81 = vector.broadcast %80 : vector<32x1xf32> to vector<32x32xf32>
    %82 = arith.mulf %77, %81 : vector<32x32xf32>
    %83 = vector.shape_cast %62 : vector<32xf32> to vector<1x32xf32>
    %84 = vector.broadcast %83 : vector<1x32xf32> to vector<32x32xf32>
    %85 = arith.mulf %82, %84 : vector<32x32xf32>
    %86 = vector.shape_cast %64 : vector<32xf32> to vector<1x32xf32>
    %87 = vector.broadcast %86 : vector<1x32xf32> to vector<32x32xf32>
    %88 = arith.addf %85, %87 : vector<32x32xf32>
    %89 = arith.addf %88, %0 : vector<32x32xf32>
    %c0_27 = arith.constant 0 : index
    %c0_28 = arith.constant 0 : index
    %90 = vector.load %arg8[%c0_27, %c0_28] : memref<1x32xf32, #tpu.memory_space<vmem>>, vector<1x32xf32>
    %91 = vector.shape_cast %90 : vector<1x32xf32> to vector<32xf32>
    %c0_29 = arith.constant 0 : index
    %c0_30 = arith.constant 0 : index
    %92 = vector.load %arg9[%c0_29, %c0_30] : memref<1x32xf32, #tpu.memory_space<vmem>>, vector<1x32xf32>
    %93 = vector.shape_cast %92 : vector<1x32xf32> to vector<32xf32>
    %cst_31 = arith.constant dense<0.000000e+00> : vector<32xf32>
    %94 = vector.multi_reduction <add>, %89, %cst_31 [1] : vector<32x32xf32> to vector<32xf32>
    %95 = vector.shape_cast %94 : vector<32xf32> to vector<32x1xf32>
    %96 = arith.mulf %89, %89 : vector<32x32xf32>
    %cst_32 = arith.constant dense<0.000000e+00> : vector<32xf32>
    %97 = vector.multi_reduction <add>, %96, %cst_32 [1] : vector<32x32xf32> to vector<32xf32>
    %98 = vector.shape_cast %97 : vector<32xf32> to vector<32x1xf32>
    %cst_33 = arith.constant 3.125000e-02 : f32
    %99 = vector.broadcast %cst_33 : f32 to vector<32x1xf32>
    %100 = arith.mulf %95, %99 : vector<32x1xf32>
    %cst_34 = arith.constant 3.125000e-02 : f32
    %101 = vector.broadcast %cst_34 : f32 to vector<32x1xf32>
    %102 = arith.mulf %98, %101 : vector<32x1xf32>
    %103 = arith.mulf %100, %100 : vector<32x1xf32>
    %104 = arith.subf %102, %103 : vector<32x1xf32>
    %105 = vector.broadcast %100 : vector<32x1xf32> to vector<32x32xf32>
    %106 = arith.subf %89, %105 : vector<32x32xf32>
    %cst_35 = arith.constant 9.99999974E-6 : f32
    %107 = vector.broadcast %cst_35 : f32 to vector<32x1xf32>
    %108 = arith.addf %104, %107 : vector<32x1xf32>
    %109 = math.rsqrt %108 : vector<32x1xf32>
    %110 = vector.broadcast %109 : vector<32x1xf32> to vector<32x32xf32>
    %111 = arith.mulf %106, %110 : vector<32x32xf32>
    %112 = vector.shape_cast %91 : vector<32xf32> to vector<1x32xf32>
    %113 = vector.broadcast %112 : vector<1x32xf32> to vector<32x32xf32>
    %114 = arith.mulf %111, %113 : vector<32x32xf32>
    %115 = vector.shape_cast %93 : vector<32xf32> to vector<1x32xf32>
    %116 = vector.broadcast %115 : vector<1x32xf32> to vector<32x32xf32>
    %117 = arith.addf %114, %116 : vector<32x32xf32>
    %c0_36 = arith.constant 0 : index
    %c0_37 = arith.constant 0 : index
    %118 = vector.load %arg10[%c0_36, %c0_37] : memref<32x64xf32, #tpu.memory_space<vmem>>, vector<32x64xf32>
    %cst_38 = arith.constant dense<0.000000e+00> : vector<32x64xf32>
    %119 = tpu.matmul %117, %118, %cst_38 {dimension_numbers = #tpu.dot_dimension_numbers<[1], [0], [0], [1], [0, 0, 1, 1], [], []>} : vector<32x32xf32>, vector<32x64xf32>, vector<32x64xf32> -> vector<32x64xf32>
    %c0_39 = arith.constant 0 : index
    %c0_40 = arith.constant 0 : index
    %120 = vector.load %arg11[%c0_39, %c0_40] : memref<1x64xf32, #tpu.memory_space<vmem>>, vector<1x64xf32>
    %121 = vector.shape_cast %120 : vector<1x64xf32> to vector<64xf32>
    %122 = vector.shape_cast %121 : vector<64xf32> to vector<1x64xf32>
    %123 = vector.broadcast %122 : vector<1x64xf32> to vector<32x64xf32>
    %124 = arith.addf %119, %123 : vector<32x64xf32>
    %cst_41 = arith.constant 5.000000e-01 : f32
    %125 = vector.broadcast %cst_41 : f32 to vector<32x64xf32>
    %126 = arith.mulf %125, %124 : vector<32x64xf32>
    %cst_42 = arith.constant 0.707106769 : f32
    %127 = vector.broadcast %cst_42 : f32 to vector<32x64xf32>
    %128 = arith.mulf %124, %127 : vector<32x64xf32>
    %129 = math.erf %128 : vector<32x64xf32>
    %cst_43 = arith.constant 1.000000e+00 : f32
    %130 = vector.broadcast %cst_43 : f32 to vector<32x64xf32>
    %131 = arith.addf %130, %129 : vector<32x64xf32>
    %132 = arith.mulf %126, %131 : vector<32x64xf32>
    %c0_44 = arith.constant 0 : index
    %c0_45 = arith.constant 0 : index
    %133 = vector.load %arg12[%c0_44, %c0_45] : memref<1x64xf32, #tpu.memory_space<vmem>>, vector<1x64xf32>
    %134 = vector.shape_cast %133 : vector<1x64xf32> to vector<64xf32>
    %c0_46 = arith.constant 0 : index
    %c0_47 = arith.constant 0 : index
    %135 = vector.load %arg13[%c0_46, %c0_47] : memref<1x64xf32, #tpu.memory_space<vmem>>, vector<1x64xf32>
    %136 = vector.shape_cast %135 : vector<1x64xf32> to vector<64xf32>
    %cst_48 = arith.constant dense<0.000000e+00> : vector<32xf32>
    %137 = vector.multi_reduction <add>, %132, %cst_48 [1] : vector<32x64xf32> to vector<32xf32>
    %138 = vector.shape_cast %137 : vector<32xf32> to vector<32x1xf32>
    %139 = arith.mulf %132, %132 : vector<32x64xf32>
    %cst_49 = arith.constant dense<0.000000e+00> : vector<32xf32>
    %140 = vector.multi_reduction <add>, %139, %cst_49 [1] : vector<32x64xf32> to vector<32xf32>
    %141 = vector.shape_cast %140 : vector<32xf32> to vector<32x1xf32>
    %cst_50 = arith.constant 1.562500e-02 : f32
    %142 = vector.broadcast %cst_50 : f32 to vector<32x1xf32>
    %143 = arith.mulf %138, %142 : vector<32x1xf32>
    %cst_51 = arith.constant 1.562500e-02 : f32
    %144 = vector.broadcast %cst_51 : f32 to vector<32x1xf32>
    %145 = arith.mulf %141, %144 : vector<32x1xf32>
    %146 = arith.mulf %143, %143 : vector<32x1xf32>
    %147 = arith.subf %145, %146 : vector<32x1xf32>
    %148 = vector.broadcast %143 : vector<32x1xf32> to vector<32x64xf32>
    %149 = arith.subf %132, %148 : vector<32x64xf32>
    %cst_52 = arith.constant 9.99999974E-6 : f32
    %150 = vector.broadcast %cst_52 : f32 to vector<32x1xf32>
    %151 = arith.addf %147, %150 : vector<32x1xf32>
    %152 = math.rsqrt %151 : vector<32x1xf32>
    %153 = vector.broadcast %152 : vector<32x1xf32> to vector<32x64xf32>
    %154 = arith.mulf %149, %153 : vector<32x64xf32>
    %155 = vector.shape_cast %134 : vector<64xf32> to vector<1x64xf32>
    %156 = vector.broadcast %155 : vector<1x64xf32> to vector<32x64xf32>
    %157 = arith.mulf %154, %156 : vector<32x64xf32>
    %158 = vector.shape_cast %136 : vector<64xf32> to vector<1x64xf32>
    %159 = vector.broadcast %158 : vector<1x64xf32> to vector<32x64xf32>
    %160 = arith.addf %157, %159 : vector<32x64xf32>
    %c0_53 = arith.constant 0 : index
    %c0_54 = arith.constant 0 : index
    %161 = vector.load %arg14[%c0_53, %c0_54] : memref<64x32xf32, #tpu.memory_space<vmem>>, vector<64x32xf32>
    %cst_55 = arith.constant dense<0.000000e+00> : vector<32x32xf32>
    %162 = tpu.matmul %160, %161, %cst_55 {dimension_numbers = #tpu.dot_dimension_numbers<[1], [0], [0], [1], [0, 0, 1, 1], [], []>} : vector<32x64xf32>, vector<64x32xf32>, vector<32x32xf32> -> vector<32x32xf32>
    %c0_56 = arith.constant 0 : index
    %c0_57 = arith.constant 0 : index
    %163 = vector.load %arg15[%c0_56, %c0_57] : memref<1x32xf32, #tpu.memory_space<vmem>>, vector<1x32xf32>
    %164 = vector.shape_cast %163 : vector<1x32xf32> to vector<32xf32>
    %165 = vector.shape_cast %164 : vector<32xf32> to vector<1x32xf32>
    %166 = vector.broadcast %165 : vector<1x32xf32> to vector<32x32xf32>
    %167 = arith.addf %162, %166 : vector<32x32xf32>
    %c0_58 = arith.constant 0 : index
    %c0_59 = arith.constant 0 : index
    %168 = vector.load %arg16[%c0_58, %c0_59] : memref<1x32xf32, #tpu.memory_space<vmem>>, vector<1x32xf32>
    %169 = vector.shape_cast %168 : vector<1x32xf32> to vector<32xf32>
    %170 = vector.shape_cast %169 : vector<32xf32> to vector<1x32xf32>
    %171 = vector.broadcast %170 : vector<1x32xf32> to vector<32x32xf32>
    %172 = arith.mulf %171, %89 : vector<32x32xf32>
    %173 = arith.addf %167, %172 : vector<32x32xf32>
    %c0_60 = arith.constant 0 : index
    %c0_61 = arith.constant 0 : index
    %174 = vector.load %arg17[%c0_60, %c0_61] : memref<32x32xf32, #tpu.memory_space<vmem>>, vector<32x32xf32>
    tpu.vector_store %arg17[%c0_60, %c0_61], %173 {strides = array<i32>} : memref<32x32xf32, #tpu.memory_space<vmem>>, vector<32x32xf32>,
    return
  }
  func.func @transform_0(%arg0: i32) -> (i32, i32) {
    %c0_i32 = arith.constant 0 : i32
    %c0_i32_0 = arith.constant 0 : i32
    return %arg0, %c0_i32 : i32, i32
  }
  func.func @transform_1(%arg0: i32) -> (i32, i32) {
    %c0_i32 = arith.constant 0 : i32
    %c0_i32_0 = arith.constant 0 : i32
    %c0_i32_1 = arith.constant 0 : i32
    return %c0_i32, %c0_i32_0 : i32, i32
  }
  func.func @transform_2(%arg0: i32) -> (i32, i32) {
    %c0_i32 = arith.constant 0 : i32
    %c0_i32_0 = arith.constant 0 : i32
    %c0_i32_1 = arith.constant 0 : i32
    return %c0_i32, %c0_i32_0 : i32, i32
  }
  func.func @transform_3(%arg0: i32) -> (i32, i32) {
    %c0_i32 = arith.constant 0 : i32
    %c0_i32_0 = arith.constant 0 : i32
    %c0_i32_1 = arith.constant 0 : i32
    return %c0_i32, %c0_i32_0 : i32, i32
  }
  func.func @transform_4(%arg0: i32) -> (i32, i32) {
    %c0_i32 = arith.constant 0 : i32
    %c0_i32_0 = arith.constant 0 : i32
    %c0_i32_1 = arith.constant 0 : i32
    return %c0_i32, %c0_i32_0 : i32, i32
  }
  func.func @transform_5(%arg0: i32) -> (i32, i32) {
    %c0_i32 = arith.constant 0 : i32
    %c0_i32_0 = arith.constant 0 : i32
    %c0_i32_1 = arith.constant 0 : i32
    return %c0_i32, %c0_i32_0 : i32, i32
  }
  func.func @transform_6(%arg0: i32) -> (i32, i32) {
    %c0_i32 = arith.constant 0 : i32
    %c0_i32_0 = arith.constant 0 : i32
    %c0_i32_1 = arith.constant 0 : i32
    return %c0_i32, %c0_i32_0 : i32, i32
  }
  func.func @transform_7(%arg0: i32) -> (i32, i32) {
    %c0_i32 = arith.constant 0 : i32
    %c0_i32_0 = arith.constant 0 : i32
    %c0_i32_1 = arith.constant 0 : i32
    return %c0_i32, %c0_i32_0 : i32, i32
  }
  func.func @transform_8(%arg0: i32) -> (i32, i32) {
    %c0_i32 = arith.constant 0 : i32
    %c0_i32_0 = arith.constant 0 : i32
    %c0_i32_1 = arith.constant 0 : i32
    return %c0_i32, %c0_i32_0 : i32, i32
  }
  func.func @transform_9(%arg0: i32) -> (i32, i32) {
    %c0_i32 = arith.constant 0 : i32
    %c0_i32_0 = arith.constant 0 : i32
    %c0_i32_1 = arith.constant 0 : i32
    return %c0_i32, %c0_i32_0 : i32, i32
  }
  func.func @transform_10(%arg0: i32) -> (i32, i32) {
    %c0_i32 = arith.constant 0 : i32
    %c0_i32_0 = arith.constant 0 : i32
    %c0_i32_1 = arith.constant 0 : i32
    return %c0_i32, %c0_i32_0 : i32, i32
  }
  func.func @transform_11(%arg0: i32) -> (i32, i32) {
    %c0_i32 = arith.constant 0 : i32
    %c0_i32_0 = arith.constant 0 : i32
    %c0_i32_1 = arith.constant 0 : i32
    return %c0_i32, %c0_i32_0 : i32, i32
  }
  func.func @transform_12(%arg0: i32) -> (i32, i32) {
    %c0_i32 = arith.constant 0 : i32
    %c0_i32_0 = arith.constant 0 : i32
    %c0_i32_1 = arith.constant 0 : i32
    return %c0_i32, %c0_i32_0 : i32, i32
  }
  func.func @transform_13(%arg0: i32) -> (i32, i32) {
    %c0_i32 = arith.constant 0 : i32
    %c0_i32_0 = arith.constant 0 : i32
    %c0_i32_1 = arith.constant 0 : i32
    return %c0_i32, %c0_i32_0 : i32, i32
  }
  func.func @transform_14(%arg0: i32) -> (i32, i32) {
    %c0_i32 = arith.constant 0 : i32
    %c0_i32_0 = arith.constant 0 : i32
    %c0_i32_1 = arith.constant 0 : i32
    return %c0_i32, %c0_i32_0 : i32, i32
  }
  func.func @transform_15(%arg0: i32) -> (i32, i32) {
    %c0_i32 = arith.constant 0 : i32
    %c0_i32_0 = arith.constant 0 : i32
    %c0_i32_1 = arith.constant 0 : i32
    return %c0_i32, %c0_i32_0 : i32, i32
  }
  func.func @transform_16(%arg0: i32) -> (i32, i32) {
    %c0_i32 = arith.constant 0 : i32
    %c0_i32_0 = arith.constant 0 : i32
    return %arg0, %c0_i32 : i32, i32
  }
}

</mosaic_0001>

<bundles_post_ra>
// kernel: tpu_custom_call.1
= control target key start
LH: loop header
LB: loop body
LE: loop exit
PB: predicated region body
PF: predicated region fallthrough
CT: control target
= control target key end

     0   :  { %s5697_s0 = inlined_call_operand.vmem [shape: f32[32,32], index: 0, kind: input, shape index: {}]   ;;  %s5698_s1 = inlined_call_operand.vmem [shape: f32[32,96], index: 1, kind: input, shape index: {}]   ;;  %s5699_s2 = inlined_call_operand.vmem [shape: f32[32,32], index: 2, kind: input, shape index: {}]   ;;  %s5700_s3 = inlined_call_operand.vmem [shape: f32[1,32], index: 3, kind: input, shape index: {}]   ;;  %s5701_s4 = inlined_call_operand.vmem [shape: f32[1,32], index: 4, kind: input, shape index: {}]   ;;  %s5702_s5 = inlined_call_operand.vmem [shape: f32[1,32], index: 5, kind: input, shape index: {}]   ;;  %s5703_s6 = inlined_call_operand.vmem [shape: f32[1,32], index: 6, kind: input, shape index: {}]   ;;  %s5704_s7 = inlined_call_operand.vmem [shape: f32[1,32], index: 7, kind: input, shape index: {}]   ;;  %s5705_s8 = inlined_call_operand.vmem [shape: f32[1,32], index: 8, kind: input, shape index: {}]   ;;  %s5706_s9 = inlined_call_operand.hbm [shape: f32[32,64], index: 9, kind: input, shape index: {}]   ;;  %s5707_s10 = inlined_call_operand.vmem [shape: f32[1,64], index: 10, kind: input, shape index: {}]   ;;  %s5708_s11 = inlined_call_operand.vmem [shape: f32[1,64], index: 11, kind: input, shape index: {}]   ;;  %s5709_s12 = inlined_call_operand.vmem [shape: f32[1,64], index: 12, kind: input, shape index: {}]   ;;  %s5710_s13 = inlined_call_operand.vmem [shape: f32[64,32], index: 13, kind: input, shape index: {}]   ;;  %s5711_s14 = inlined_call_operand.vmem [shape: f32[1,32], index: 14, kind: input, shape index: {}]   ;;  %s5712_s15 = inlined_call_operand.vmem [shape: f32[1,32], index: 15, kind: input, shape index: {}]   ;;  %s5713_s16 = inlined_call_operand.hbm [shape: f32[32,32], index: 16, kind: output, shape index: {}]  }
   0x1   :  { %5718 = sst [smem:[#allocation11_spill]] %s5697_s0 }
   0x2   :  { %21 = vsyncpa [#allocation3], 0 }
   0x3   :  { %22 = vsyncpa [#allocation4], 0  ;;  %s3875_s21 = smov [#allocation2]  }
   0x4   :  { %s46_s22 = sshll.u32 %s3875_s21, 4  ;;  %s47_s22 = int_to_ptr.vmem [resolvable:$true] %s46_s22 }
   0x5   :  { %s3839_s23 = scalar_lea.vmem %s47_s22, 512  ;;  %p3844_p1 = scmp.lt.s32.totalorder %s47_s22, %s47_s22 }
   0x6   :  { %p3840_p0 = scmp.ne.s32.totalorder %s47_s22, %s3839_s23  ;;  %p3845_p2 = scmp.lt.s32.totalorder %s3839_s23, %s3839_s23 }
   0x8   :  { %p3846_p3 = por %p3845_p2, %p3844_p1 }
   0xa   :  { %p3847_p4 = pnand %p3846_p3, %p3840_p0 }
   0xc   :  { %3850 = shalt.err (!%p3847_p4)
}
   0xd   :  { %s3876_s24 = smov 128   ;;  %s3877_s25 = smov 8  }
   0xe   :  { %52 = dma.hbm_to_vmem [thread:$0]  %s5706_s9, 512, %s47_s22, [#allocation3], %s3876_s24, %s3876_s24, %s3877_s25  }
   0xf   :  { %3871 = dma.done.wait [#allocation3], 512  }
  0x10   :  { %3872 = vsyncadd [#allocation3], 4294966784  ;;  %vm74_vm0 = vcmask 261120   ;;  %s5719_s30 = sld [smem:[#allocation11_spill]]  ;;  %v158_v16 = vld [vmem:[%s5698_s1 + $0x18] sm:$0xff]  ;;  %v157_v17 = vld [vmem:[%s5698_s1 + $0x10] sm:$0xff] }
  0x11   :  { %3538 = vmatprep.subr.mxu0 %v158_v16  ;;  %v156_v18 = vld [vmem:[%s5698_s1 + $0x8] sm:$0xff]  ;;  %v155_v19 = vld [vmem:[%s5698_s1] sm:$0xff]  ;;  %s3878_s27 = smov 96   ;;  %s3879_s28 = smov 64   ;;  %vm1895_vm1 = vcmask 1041409   ;;  %vm1897_vm2 = vcmask 1042434  }
  0x12   :  { %3539 = vmatpush3.msra.mxu0 %v158_v16  ;;  %v3419_v50 = vld [vmem:[%s5700_s3] ss:$0 sm:$0xff]  ;;  %v264_v16 = vlaneseq  ;;  %vm1899_vm3 = vcmask 1043459   ;;  %vm1901_vm4 = vcmask 1044484   ;;  %vm1903_vm5 = vcmask 1045509  }
  0x13   :  { %3540 = vmatprep.subr.mxu0 %v157_v17  ;;  %v3420_v52 = vld [vmem:[%s5701_s4] ss:$0 sm:$0xff]  ;;  %vm1905_vm6 = vcmask 1046534   ;;  %vm1907_vm7 = vcmask 1047559   ;;  %vm3190_vm8 = vcmask 523264  }
  0x14   :  { %3541 = vmatpush3.msra.mxu0 %v157_v17 }
  0x15   :  { %3542 = vmatprep.subr.mxu0 %v156_v18 }
  0x16   :  { %v3976_v0 = vld [vmem:[%s5719_s30] sm:$0xff]  ;;  %v3981_v1 = vld [vmem:[%s5719_s30 + $0x8] sm:$0xff]  ;;  %v3995_v7 = vld [vmem:[%s5719_s30 + $0x10] sm:$0xff]  ;;  %3543 = vmatpush3.msra.mxu0 %v156_v18  ;;  %v265_v18 = vshrl.u32 %v264_v16, 7 }
  0x17   :  { %v75_v2 = vsel %vm74_vm0, %v3976_v0, 0.0  ;;  %v87_v3 = vmul.f32 %v3976_v0, %v3976_v0  ;;  %v88_v4 = vmul.f32 %v3981_v1, %v3981_v1  ;;  %v78_v6 = vsel %vm74_vm0, %v3981_v1, 0.0  ;;  %v4001_v9 = vld [vmem:[%s5719_s30 + $0x18] sm:$0xff]  ;;  %3544 = vmatprep.subr.mxu0 %v155_v19 }
  0x18   :  { %76 = vadd.xlane.f32.xlu0 %v75_v2  ;;  %v81_v10 = vsel %vm74_vm0, %v3995_v7, 0.0  ;;  %v89_v11 = vmul.f32 %v3995_v7, %v3995_v7  ;;  %v84_v12 = vsel %vm74_vm0, %v4001_v9, 0.0  ;;  %v90_v13 = vmul.f32 %v4001_v9, %v4001_v9  ;;  %3545 = vmatpush3.msra.mxu0 %v155_v19 }
  0x19   :  { %v91_v5 = vsel %vm74_vm0, %v87_v3, 0.0  ;;  %v94_v8 = vsel %vm74_vm0, %v88_v4, 0.0 }
  0x1a   :  { %92 = vadd.xlane.f32.xlu1 %v91_v5  ;;  %v97_v14 = vsel %vm74_vm0, %v89_v11, 0.0  ;;  %v100_v15 = vsel %vm74_vm0, %v90_v13, 0.0 }
  0x1c   :  { %79 = vadd.xlane.f32.xlu0 %v78_v6  ;;  %v663_v6 = vld [vmem:[%s5699_s2 + $0x18] sm:$0xff] }
  0x1d   :  { %3644 = vmatprep.subr.mxu1 %v663_v6  ;;  %3552 = vmatprep.subr.mxu0 %v663_v6 }
  0x1e   :  { %95 = vadd.xlane.f32.xlu1 %v94_v8  ;;  %3648 = vmatpush3.msra.mxu1 %v663_v6  ;;  %v661_v8 = vld [vmem:[%s5699_s2 + $0x8] sm:$0xff] }
  0x20   :  { %82 = vadd.xlane.f32.xlu0 %v81_v10 }
  0x22   :  { %85 = vadd.xlane.f32.xlu1 %v84_v12 }
  0x24   :  { %98 = vadd.xlane.f32.xlu0 %v97_v14  ;;  %v3880_v14 = vmov 1966171168  }
  0x26   :  { %101 = vadd.xlane.f32.xlu1 %v100_v15  ;;  %v262_v15 = vunpack.c.l.s4 %v3880_v14 }
  0x28   :  { %v263_v17 = vunpack.c.0.s8 %v262_v15 }
  0x2a   :  { %v4055_v19 = vsub.s32 %v263_v17, %v265_v18 }
  0xa1   :  { %v77_v20 = vpop.xlane.xlu0 %76 }
  0xa2   :  { %v103_v21 = vmul.f32 0.03125, %v77_v20 }
  0xa3   :  { %v93_v22 = vpop.xlane.xlu1 %92 }
  0xa4   :  { %v111_v23 = vmul.f32 %v103_v21, %v103_v21  ;;  %v107_v24 = vmul.f32 0.03125, %v93_v22  ;;  %v119_v48 = vsub.f32 %v3976_v0, %v103_v21 }
  0xa5   :  { %v80_v25 = vpop.xlane.xlu0 %79 }
  0xa6   :  { %v115_v26 = vsub.f32 %v107_v24, %v111_v23  ;;  %v104_v27 = vmul.f32 0.03125, %v80_v25  ;;  %v4060_v25 = vsub.s32 0, %v265_v18 }
  0xa7   :  { %v96_v28 = vpop.xlane.xlu1 %95 }
  0xa8   :  { %v123_v29 = vadd.f32 1e-05, %v115_v26  ;;  %v112_v30 = vmul.f32 %v104_v27, %v104_v27  ;;  %v108_v31 = vmul.f32 0.03125, %v96_v28  ;;  %v120_v53 = vsub.f32 %v3981_v1, %v104_v27 }
  0xa9   :  { %v83_v32 = vpop.xlane.xlu0 %82 }
  0xaa   :  { %3659 = vrsqrt.f32 %v123_v29  ;;  %v116_v33 = vsub.f32 %v108_v31, %v112_v30  ;;  %v105_v34 = vmul.f32 0.03125, %v83_v32 }
  0xab   :  { %v86_v35 = vpop.xlane.xlu1 %85 }
  0xac   :  { %v124_v36 = vadd.f32 1e-05, %v116_v33  ;;  %v113_v37 = vmul.f32 %v105_v34, %v105_v34  ;;  %v106_v38 = vmul.f32 0.03125, %v86_v35  ;;  %v121_v59 = vsub.f32 %v3995_v7, %v105_v34  ;;  %v662_v7 = vld [vmem:[%s5699_s2 + $0x10] sm:$0xff] }
  0xad   :  { %v99_v39 = vpop.xlane.xlu0 %98  ;;  %3645 = vmatprep.subr.mxu1 %v662_v7 }
  0xae   :  { %3661 = vrsqrt.f32 %v124_v36  ;;  %v114_v40 = vmul.f32 %v106_v38, %v106_v38  ;;  %v109_v41 = vmul.f32 0.03125, %v99_v39  ;;  %v122_v62 = vsub.f32 %v4001_v9, %v106_v38  ;;  %3649 = vmatpush3.msra.mxu1 %v662_v7  ;;  %v660_v9 = vld [vmem:[%s5699_s2] sm:$0xff] }
  0xaf   :  { %v102_v42 = vpop.xlane.xlu1 %101  ;;  %3646 = vmatprep.subr.mxu1 %v661_v8 }
  0xb0   :  { %v117_v43 = vsub.f32 %v109_v41, %v113_v37  ;;  %v110_v44 = vmul.f32 0.03125, %v102_v42  ;;  %3650 = vmatpush3.msra.mxu1 %v661_v8 }
  0xb1   :  { %3647 = vmatprep.subr.mxu1 %v660_v9 }
  0xb2   :  { %v125_v45 = vadd.f32 1e-05, %v117_v43  ;;  %v118_v46 = vsub.f32 %v110_v44, %v114_v40  ;;  %3651 = vmatpush3.msra.mxu1 %v660_v9 }
  0xb4   :  { %3663 = vrsqrt.f32 %v125_v45  ;;  %v126_v47 = vadd.f32 1e-05, %v118_v46 }
  0xb6   :  { %3665 = vrsqrt.f32 %v126_v47 }
  0xb7   :  { %v3660_v49 = vpop.eup %3659 }
  0xb8   :  { %v131_v51 = vmul.f32 %v3660_v49, %v119_v48 }
  0xba   :  { %v141_v54 = vmul.f32 %v3419_v50, %v131_v51 }
  0xbb   :  { %v3662_v55 = vpop.eup %3661 }
  0xbc   :  { %v151_v56 = vadd.f32 %v3420_v52, %v141_v54  ;;  %v132_v57 = vmul.f32 %v3662_v55, %v120_v53 }
  0xbe   :  { %3546 = vmatprep.mubr.msk.f32.mxu0 %vm74_vm0, %v151_v56  ;;  %v142_v58 = vmul.f32 %v3419_v50, %v132_v57 }
  0xc0   :  { %v152_v60 = vadd.f32 %v3420_v52, %v142_v58 }
  0xc1   :  { %v3664_v61 = vpop.eup %3663 }
  0xc2   :  { %3547 = vmatmul.mubr.msk.f32.vlgmr.msra.gmra.mxu0 %vm74_vm0, %v152_v60  ;;  %v133_v63 = vmul.f32 %v3664_v61, %v121_v59 }
  0xc3   :  { %v3666_v0 = vpop.eup %3665  ;;  %3553 = vmatpush3.msra.mxu0 %v663_v6 }
  0xc4   :  { %v143_v2 = vmul.f32 %v3419_v50, %v133_v63  ;;  %v134_v3 = vmul.f32 %v3666_v0, %v122_v62  ;;  %3554 = vmatprep.subr.mxu0 %v662_v7 }
  0xc5   :  { %3555 = vmatpush3.msra.mxu0 %v662_v7 }
  0xc6   :  { %v153_v1 = vadd.f32 %v3420_v52, %v143_v2  ;;  %v144_v4 = vmul.f32 %v3419_v50, %v134_v3  ;;  %3556 = vmatprep.subr.mxu0 %v661_v8 }
  0xc7   :  { %3557 = vmatpush3.msra.mxu0 %v661_v8 }
  0xc8   :  { %3549 = vmatprep.mubr.msk.f32.mxu0 %vm74_vm0, %v153_v1  ;;  %v154_v5 = vadd.f32 %v3420_v52, %v144_v4  ;;  %3558 = vmatprep.subr.mxu0 %v660_v9 }
  0xc9   :  { %3559 = vmatpush3.msra.mxu0 %v660_v9 }
  0xca   :  { %3550 = vmatmul.mubr.msk.f32.gmra.mxu0 %vm74_vm0, %v154_v5 }
 0x182   :  { %v3548_v10 = vpop.f32.mrf.mxu0 }
 0x183   :  { %618 = vrot.lane.b32.xlu0 %v3548_v10, %s3878_s27  ;;  %v316_v20 = vrot.slane %v3548_v10, %v4055_v19  ;;  %v309_v22 = vcombine.high %v3548_v10, %v3548_v10 }
 0x184   :  { %v237_v11 = vpop.f32.mrf.mxu0 }
 0x185   :  { %v324_v21 = vcombine.high %v316_v20, %v316_v20  ;;  %v332_v23 = vrot.slane %v316_v20, %v4055_v19  ;;  %v323_v26 = vrot.slane %v309_v22, %v4055_v19  ;;  %v267_v37 = vrot.slane %v237_v11, %v4055_v19 }
 0x186   :  { %v260_v42 = vcombine.high %v237_v11, %v237_v11 }
 0x187   :  { %1593 = vrot.lane.b32.xlu0 %v237_v11, %s3879_s28  ;;  %v346_v24 = vrot.slane %v324_v21, %v4055_v19  ;;  %v354_v27 = vcombine.high %v332_v23, %v332_v23  ;;  %v491_v28 = vrot.slane %v332_v23, %v4060_v25  ;;  %v325_v30 = vcombine.high %v323_v26, %v323_v26 }
 0x188   :  { %v339_v33 = vrot.slane %v323_v26, %v4055_v19  ;;  %v275_v45 = vcombine.high %v267_v37, %v267_v37  ;;  %v283_v47 = vrot.slane %v267_v37, %v4055_v19  ;;  %v274_v53 = vrot.slane %v260_v42, %v4055_v19 }
 0x189   :  { %v495_v29 = vrot.slane %v346_v24, %v4060_v25  ;;  %v356_v32 = vcombine.high %v346_v24, %v346_v24  ;;  %v499_v36 = vrot.slane %v354_v27, %v4060_v25  ;;  %v353_v41 = vrot.slane %v325_v30, %v4055_v19 }
 0x18a   :  { %v4051_v12 = vpop.f32.mrf.mxu0  ;;  %v507_v43 = vrot.slane %v339_v33, %v4060_v25  ;;  %v355_v44 = vcombine.high %v339_v33, %v339_v33  ;;  %v297_v56 = vrot.slane %v275_v45, %v4055_v19  ;;  %v305_v58 = vcombine.high %v283_v47, %v283_v47 }
 0x18b   :  { %v503_v40 = vrot.slane %v356_v32, %v4060_v25  ;;  %v511_v51 = vrot.slane %v353_v41, %v4060_v25  ;;  %v357_v52 = vcombine.high %v353_v41, %v353_v41  ;;  %v276_v0 = vcombine.high %v274_v53, %v274_v53 }
 0x18c   :  { %v247_v13 = vpop.f32.mrf.mxu0  ;;  %v515_v55 = vrot.slane %v355_v44, %v4060_v25  ;;  %v290_v1 = vrot.slane %v274_v53, %v4055_v19  ;;  %v463_v4 = vrot.slane %v297_v56, %v4060_v25  ;;  %v459_v6 = vrot.slane %v283_v47, %v4060_v25 }
 0x18d   :  { %1597 = vrot.lane.b32.xlu0 %v247_v13, %s3879_s28  ;;  %620 = vrot.lane.b32.xlu1 %v247_v13, %s3878_s27  ;;  %v365_v39 = vrot.slane %v247_v13, %v4055_v19  ;;  %v358_v48 = vcombine.high %v247_v13, %v247_v13  ;;  %v519_v63 = vrot.slane %v357_v52, %v4060_v25 }
 0x18e   :  { %v414_v20 = vrot.slane %v4051_v12, %v4055_v19  ;;  %v475_v26 = vrot.slane %v290_v1, %v4060_v25  ;;  %v304_v27 = vrot.slane %v276_v0, %v4055_v19 }
 0x18f   :  { %v373_v50 = vcombine.high %v365_v39, %v365_v39  ;;  %v381_v54 = vrot.slane %v365_v39, %v4055_v19  ;;  %v372_v59 = vrot.slane %v358_v48, %v4055_v19 }
 0x190   :  { %v422_v37 = vcombine.high %v414_v20, %v414_v20  ;;  %v479_v39 = vrot.slane %v304_v27, %v4060_v25 }
 0x191   :  { %616 = vrot.lane.b32.xlu1 %v237_v11, %s3878_s27  ;;  %v395_v62 = vrot.slane %v373_v50, %v4055_v19  ;;  %v403_v2 = vcombine.high %v381_v54, %v381_v54  ;;  %v523_v3 = vrot.slane %v381_v54, %v4060_v25  ;;  %v374_v7 = vcombine.high %v372_v59, %v372_v59 }
 0x192   :  { %v307_v11 = vcombine.high %v297_v56, %v297_v56  ;;  %v388_v17 = vrot.slane %v372_v59, %v4055_v19 }
 0x193   :  { %v527_v15 = vrot.slane %v395_v62, %v4060_v25  ;;  %v405_v16 = vcombine.high %v395_v62, %v395_v62  ;;  %v531_v18 = vrot.slane %v403_v2, %v4060_v25  ;;  %v402_v30 = vrot.slane %v374_v7, %v4055_v19 }
 0x194   :  { %v471_v24 = vrot.slane %v307_v11, %v4060_v25  ;;  %v539_v32 = vrot.slane %v388_v17, %v4060_v25  ;;  %v404_v33 = vcombine.high %v388_v17, %v388_v17 }
 0x195   :  { %622 = vrot.lane.b32.xlu1 %v4051_v12, %s3878_s27  ;;  %v543_v42 = vrot.slane %v402_v30, %v4060_v25 }
 0x196   :  { %v547_v45 = vrot.slane %v404_v33, %v4060_v25 }
 0x199   :  { %1595 = vrot.lane.b32.xlu1 %v3548_v10, %s3879_s28  ;;  %v467_v10 = vrot.slane %v305_v58, %v4060_v25 }
 0x19d   :  { %1599 = vrot.lane.b32.xlu1 %v4051_v12, %s3879_s28 }
 0x1f5   :  { %v619_v31 = vpop.permute.xlu0 %618 }
 0x1f6   :  { %v636_v34 = vmul.f32 %v619_v31, %v491_v28  ;;  %v637_v35 = vmul.f32 %v619_v31, %v495_v29  ;;  %v638_v38 = vmul.f32 %v619_v31, %v499_v36  ;;  %v639_v46 = vmul.f32 %v619_v31, %v503_v40 }
 0x1f7   :  { %v640_v49 = vmul.f32 %v619_v31, %v507_v43  ;;  %v641_v57 = vmul.f32 %v619_v31, %v511_v51  ;;  %v642_v61 = vmul.f32 %v619_v31, %v515_v55  ;;  %v643_v5 = vmul.f32 %v619_v31, %v519_v63 }
 0x1f8   :  { %3572 = vmatprep.mubr.msk.f32.mxu1 %vm74_vm0, %v636_v34  ;;  %v535_v28 = vrot.slane %v405_v16, %v4060_v25  ;;  %v306_v29 = vcombine.high %v290_v1, %v290_v1  ;;  %v407_v34 = vcombine.high %v4051_v12, %v4051_v12  ;;  %v308_v40 = vcombine.high %v304_v27, %v304_v27 }
 0x1f9   :  { %3573 = vmatmul.mubr.msk.f32.vlgmr.msra.gmra.mxu1 %vm74_vm0, %v637_v35  ;;  %v406_v12 = vcombine.high %v402_v30, %v402_v30  ;;  %v430_v43 = vrot.slane %v414_v20, %v4055_v19  ;;  %v444_v51 = vrot.slane %v422_v37, %v4055_v19 }
 0x1fa   :  { %3575 = vmatprep.mubr.msk.f32.mxu1 %vm74_vm0, %v638_v38  ;;  %v483_v41 = vrot.slane %v306_v29, %v4060_v25  ;;  %v421_v50 = vrot.slane %v407_v34, %v4055_v19 }
 0x1fb   :  { %v551_v53 = vrot.slane %v406_v12, %v4060_v25  ;;  %v452_v54 = vcombine.high %v430_v43, %v430_v43  ;;  %v555_v56 = vrot.slane %v430_v43, %v4060_v25  ;;  %v454_v62 = vcombine.high %v444_v51, %v444_v51 }
 0x1fc   :  { %v423_v59 = vcombine.high %v421_v50, %v421_v50  ;;  %v437_v63 = vrot.slane %v421_v50, %v4055_v19 }
 0x1fd   :  { %3576 = vmatmul.mubr.msk.f32.gmra.mxu1 %vm74_vm0, %v639_v46  ;;  %v563_v0 = vrot.slane %v452_v54, %v4060_v25 }
 0x1fe   :  { %3578 = vmatprep.mubr.msk.f32.mxu1 %vm74_vm0, %v640_v49  ;;  %v487_v49 = vrot.slane %v308_v40, %v4060_v25  ;;  %v451_v1 = vrot.slane %v423_v59, %v4055_v19 }
 0x1ff   :  { %v4084_v60 = vpop.permute.xlu1 %620 }
 0x200   :  { %v644_v9 = vmul.f32 %v4084_v60, %v523_v3  ;;  %v645_v22 = vmul.f32 %v4084_v60, %v527_v15  ;;  %v646_v23 = vmul.f32 %v4084_v60, %v531_v18  ;;  %v647_v36 = vmul.f32 %v4084_v60, %v535_v28 }
 0x201   :  { %3579 = vmatmul.mubr.msk.f32.gmra.mxu1 %vm74_vm0, %v641_v57  ;;  %v648_v38 = vmul.f32 %v4084_v60, %v539_v32  ;;  %v649_v47 = vmul.f32 %v4084_v60, %v543_v42  ;;  %v650_v48 = vmul.f32 %v4084_v60, %v547_v45  ;;  %v651_v57 = vmul.f32 %v4084_v60, %v551_v53 }
 0x202   :  { %3581 = vmatprep.mubr.msk.f32.mxu1 %vm74_vm0, %v642_v61  ;;  %v559_v61 = vrot.slane %v444_v51, %v4060_v25  ;;  %v567_v60 = vrot.slane %v454_v62, %v4060_v25 }
 0x203   :  { %v617_v8 = vpop.permute.xlu1 %616 }
 0x204   :  { %v628_v13 = vmul.f32 %v617_v8, %v459_v6  ;;  %v629_v14 = vmul.f32 %v617_v8, %v463_v4  ;;  %v630_v21 = vmul.f32 %v617_v8, %v467_v10  ;;  %v631_v31 = vmul.f32 %v617_v8, %v471_v24 }
 0x205   :  { %3582 = vmatmul.mubr.msk.f32.gmra.mxu1 %vm74_vm0, %v643_v5  ;;  %v632_v35 = vmul.f32 %v617_v8, %v475_v26  ;;  %v633_v44 = vmul.f32 %v617_v8, %v479_v39  ;;  %v634_v46 = vmul.f32 %v617_v8, %v483_v41  ;;  %v635_v55 = vmul.f32 %v617_v8, %v487_v49 }
 0x206   :  { %3584 = vmatprep.mubr.msk.f32.mxu1 %vm74_vm0, %v644_v9  ;;  %3560 = vmatprep.mubr.msk.f32.mxu0 %vm74_vm0, %v628_v13  ;;  %v571_v4 = vrot.slane %v437_v63, %v4060_v25  ;;  %v453_v5 = vcombine.high %v437_v63, %v437_v63  ;;  %v575_v8 = vrot.slane %v451_v1, %v4060_v25 }
 0x207   :  { %3561 = vmatmul.mubr.msk.f32.vlgmr.msra.gmra.mxu0 %vm74_vm0, %v629_v14  ;;  %v623_v52 = vpop.permute.xlu1 %622  ;;  %v455_v9 = vcombine.high %v451_v1, %v451_v1 }
 0x208   :  { %3563 = vmatprep.mubr.msk.f32.mxu0 %vm74_vm0, %v630_v21  ;;  %v652_v58 = vmul.f32 %v623_v52, %v555_v56  ;;  %v653_v2 = vmul.f32 %v623_v52, %v559_v61  ;;  %v654_v3 = vmul.f32 %v623_v52, %v563_v0  ;;  %v655_v6 = vmul.f32 %v623_v52, %v567_v60 }
 0x209   :  { %3585 = vmatmul.mubr.msk.f32.gmra.mxu1 %vm74_vm0, %v645_v22  ;;  %v656_v7 = vmul.f32 %v623_v52, %v571_v4  ;;  %v579_v10 = vrot.slane %v453_v5, %v4060_v25  ;;  %v657_v11 = vmul.f32 %v623_v52, %v575_v8  ;;  %v583_v19 = vrot.slane %v455_v9, %v4060_v25 }
 0x20a   :  { %3587 = vmatprep.mubr.msk.f32.mxu1 %vm74_vm0, %v646_v23 }
 0x20b   :  { %3564 = vmatmul.mubr.msk.f32.gmra.mxu0 %vm74_vm0, %v631_v31  ;;  %v658_v13 = vmul.f32 %v623_v52, %v579_v10  ;;  %v659_v14 = vmul.f32 %v623_v52, %v583_v19 }
 0x20c   :  { %3566 = vmatprep.mubr.msk.f32.mxu0 %vm74_vm0, %v632_v35 }
 0x20d   :  { %3588 = vmatmul.mubr.msk.f32.gmra.mxu1 %vm74_vm0, %v647_v36 }
 0x20e   :  { %3590 = vmatprep.mubr.msk.f32.mxu1 %vm74_vm0, %v648_v38 }
 0x20f   :  { %3567 = vmatmul.mubr.msk.f32.gmra.mxu0 %vm74_vm0, %v633_v44 }
 0x210   :  { %3569 = vmatprep.mubr.msk.f32.mxu0 %vm74_vm0, %v634_v46 }
 0x211   :  { %3591 = vmatmul.mubr.msk.f32.gmra.mxu1 %vm74_vm0, %v649_v47 }
 0x212   :  { %3593 = vmatprep.mubr.msk.f32.mxu1 %vm74_vm0, %v650_v48 }
 0x213   :  { %3570 = vmatmul.mubr.msk.f32.gmra.mxu0 %vm74_vm0, %v635_v55 }
 0x215   :  { %3594 = vmatmul.mubr.msk.f32.gmra.mxu1 %vm74_vm0, %v651_v57 }
 0x216   :  { %3596 = vmatprep.mubr.msk.f32.mxu1 %vm74_vm0, %v652_v58 }
 0x219   :  { %3597 = vmatmul.mubr.msk.f32.gmra.mxu1 %vm74_vm0, %v653_v2 }
 0x21a   :  { %3599 = vmatprep.mubr.msk.f32.mxu1 %vm74_vm0, %v654_v3 }
 0x21d   :  { %3600 = vmatmul.mubr.msk.f32.gmra.mxu1 %vm74_vm0, %v655_v6 }
 0x21e   :  { %3602 = vmatprep.mubr.msk.f32.mxu1 %vm74_vm0, %v656_v7 }
 0x221   :  { %3603 = vmatmul.mubr.msk.f32.gmra.mxu1 %vm74_vm0, %v657_v11 }
 0x222   :  { %3605 = vmatprep.mubr.msk.f32.mxu1 %vm74_vm0, %v658_v13 }
 0x225   :  { %3606 = vmatmul.mubr.msk.f32.gmra.mxu1 %vm74_vm0, %v659_v14 }
 0x2b9   :  { %v3574_v15 = vpop.f32.mrf.mxu1 }
 0x2ba   :  { %v1048_v16 = vsel %vm74_vm0, %v3574_v15, -inf }
 0x2bb   :  { %v1049_v17 = vrot.slane %v1048_v16, 4  ;;  %v866_v18 = vpop.f32.mrf.mxu1 }
 0x2bc   :  { %v1041_v20 = vsel %vm74_vm0, %v866_v18, -inf }
 0x2bd   :  { %v1050_v21 = vmax.f32 %v1048_v16, %v1049_v17  ;;  %v1042_v22 = vrot.slane %v1041_v20, 4  ;;  %v3577_v23 = vpop.f32.mrf.mxu1 }
 0x2be   :  { %v1062_v24 = vsel %vm74_vm0, %v3577_v23, -inf }
 0x2bf   :  { %v1051_v26 = vrot.slane %v1050_v21, 2  ;;  %v1043_v27 = vmax.f32 %v1041_v20, %v1042_v22  ;;  %v1063_v25 = vrot.slane %v1062_v24, 4  ;;  %v876_v28 = vpop.f32.mrf.mxu1 }
 0x2c0   :  { %v1055_v29 = vsel %vm74_vm0, %v876_v28, -inf }
 0x2c1   :  { %v1052_v30 = vmax.f32 %v1050_v21, %v1051_v26  ;;  %v1044_v31 = vrot.slane %v1043_v27, 2  ;;  %v1064_v32 = vmax.f32 %v1062_v24, %v1063_v25  ;;  %v1056_v33 = vrot.slane %v1055_v29, 4  ;;  %v4164_v34 = vpop.f32.mrf.mxu1 }
 0x2c2   :  { %v1076_v35 = vsel %vm74_vm0, %v4164_v34, -inf }
 0x2c3   :  { %v1053_v36 = vrot.slane %v1052_v30, 1  ;;  %v1045_v37 = vmax.f32 %v1043_v27, %v1044_v31  ;;  %v1065_v38 = vrot.slane %v1064_v32, 2  ;;  %v1057_v39 = vmax.f32 %v1055_v29, %v1056_v33  ;;  %v4168_v40 = vpop.f32.mrf.mxu1 }
 0x2c4   :  { %v1077_v41 = vrot.slane %v1076_v35, 4  ;;  %v1069_v42 = vsel %vm74_vm0, %v4168_v40, -inf }
 0x2c5   :  { %v1054_v12 = vmax.f32 %v1052_v30, %v1053_v36  ;;  %v1046_v43 = vrot.slane %v1045_v37, 1  ;;  %v1066_v44 = vmax.f32 %v1064_v32, %v1065_v38  ;;  %v1058_v45 = vrot.slane %v1057_v39, 2  ;;  %v4172_v46 = vpop.f32.mrf.mxu1 }
 0x2c6   :  { %v1078_v47 = vmax.f32 %v1076_v35, %v1077_v41  ;;  %v1070_v48 = vrot.slane %v1069_v42, 4  ;;  %v1090_v49 = vsel %vm74_vm0, %v4172_v46, -inf }
 0x2c7   :  { %v1218_v50 = vsub.f32 %v3574_v15, %v1054_v12  ;;  %v1047_v51 = vmax.f32 %v1045_v37, %v1046_v43  ;;  %v1067_v52 = vrot.slane %v1066_v44, 1  ;;  %v1059_v53 = vmax.f32 %v1057_v39, %v1058_v45  ;;  %v4176_v54 = vpop.f32.mrf.mxu1  ;;  %v4178_v58 = vpop.f32.mrf.mxu0 }
 0x2c8   :  { %v1079_v55 = vrot.slane %v1078_v47, 2  ;;  %v1071_v56 = vmax.f32 %v1069_v42, %v1070_v48  ;;  %v1091_v57 = vrot.slane %v1090_v49, 4  ;;  %v1083_v59 = vsel %vm74_vm0, %v4176_v54, -inf }
 0x2c9   :  { %v1259_v61 = vmul.f32 1.442695, %v1218_v50  ;;  %v1217_v62 = vsub.f32 %v866_v18, %v1047_v51  ;;  %v1068_v63 = vmax.f32 %v1066_v44, %v1067_v52  ;;  %v1060_v0 = vrot.slane %v1059_v53, 1  ;;  %v4184_v11 = vpop.f32.mrf.mxu0  ;;  %v4186_v20 = vpop.f32.mrf.mxu1 }
 0x2ca   :  { %v1080_v2 = vmax.f32 %v1078_v47, %v1079_v55  ;;  %v1072_v3 = vrot.slane %v1071_v56, 2  ;;  %v1092_v60 = vmax.f32 %v1090_v49, %v1091_v57  ;;  %v992_v1 = vsel %vm74_vm0, %v4178_v58, -inf }
 0x2cb   :  { %3667 = vpow2.f32 %v1259_v61  ;;  %v1257_v4 = vmul.f32 1.442695, %v1217_v62  ;;  %v1220_v5 = vsub.f32 %v3577_v23, %v1068_v63  ;;  %v1061_v6 = vmax.f32 %v1059_v53, %v1060_v0  ;;  %v4191_v29 = vpop.f32.mrf.mxu0  ;;  %v4198_v41 = vpop.f32.mrf.mxu1 }
 0x2cc   :  { %v1081_v7 = vrot.slane %v1080_v2, 1  ;;  %v1073_v8 = vmax.f32 %v1071_v56, %v1072_v3  ;;  %v1093_v9 = vrot.slane %v1092_v60, 2  ;;  %v993_v10 = vrot.slane %v992_v1, 4 }
 0x2cd   :  { %3669 = vpow2.f32 %v1257_v4  ;;  %v1263_v13 = vmul.f32 1.442695, %v1220_v5  ;;  %v1219_v19 = vsub.f32 %v876_v28, %v1061_v6  ;;  %v1084_v14 = vrot.slane %v1083_v59, 4 }
 0x2ce   :  { %v1082_v15 = vmax.f32 %v1080_v2, %v1081_v7  ;;  %v1074_v16 = vrot.slane %v1073_v8, 1  ;;  %v1094_v17 = vmax.f32 %v1092_v60, %v1093_v9  ;;  %v994_v18 = vmax.f32 %v992_v1, %v993_v10 }
 0x2cf   :  { %3671 = vpow2.f32 %v1263_v13  ;;  %v1261_v21 = vmul.f32 1.442695, %v1219_v19  ;;  %v1085_v22 = vmax.f32 %v1083_v59, %v1084_v14  ;;  %v985_v23 = vsel %vm74_vm0, %v4184_v11, -inf }
 0x2d0   :  { %v1222_v24 = vsub.f32 %v4164_v34, %v1082_v15  ;;  %v1075_v26 = vmax.f32 %v1073_v8, %v1074_v16  ;;  %v1095_v27 = vrot.slane %v1094_v17, 1  ;;  %v995_v25 = vrot.slane %v994_v18, 2 }
 0x2d1   :  { %3673 = vpow2.f32 %v1261_v21  ;;  %v1086_v28 = vrot.slane %v1085_v22, 2  ;;  %v986_v30 = vrot.slane %v985_v23, 4  ;;  %v1104_v31 = vsel %vm74_vm0, %v4186_v20, -inf }
 0x2d2   :  { %v1267_v32 = vmul.f32 1.442695, %v1222_v24  ;;  %v1221_v33 = vsub.f32 %v4168_v40, %v1075_v26  ;;  %v1096_v35 = vmax.f32 %v1094_v17, %v1095_v27  ;;  %v996_v36 = vmax.f32 %v994_v18, %v995_v25  ;;  %v4201_v40 = vpop.f32.mrf.mxu0 }
 0x2d3   :  { %v1087_v37 = vmax.f32 %v1085_v22, %v1086_v28  ;;  %v987_v38 = vmax.f32 %v985_v23, %v986_v30  ;;  %v1105_v39 = vrot.slane %v1104_v31, 4  ;;  %v1006_v34 = vsel %vm74_vm0, %v4191_v29, -inf }
 0x2d4   :  { %3675 = vpow2.f32 %v1267_v32  ;;  %v1265_v42 = vmul.f32 1.442695, %v1221_v33  ;;  %v1224_v12 = vsub.f32 %v4172_v46, %v1096_v35  ;;  %v997_v43 = vrot.slane %v996_v36, 1 }
 0x2d5   :  { %v1088_v44 = vrot.slane %v1087_v37, 1  ;;  %v988_v45 = vrot.slane %v987_v38, 2  ;;  %v1106_v47 = vmax.f32 %v1104_v31, %v1105_v39  ;;  %v1007_v48 = vrot.slane %v1006_v34, 4 }
 0x2d6   :  { %3677 = vpow2.f32 %v1265_v42  ;;  %v1271_v49 = vmul.f32 1.442695, %v1224_v12  ;;  %v998_v50 = vmax.f32 %v996_v36, %v997_v43  ;;  %v1097_v51 = vsel %vm74_vm0, %v4198_v41, -inf }
 0x2d7   :  { %v1089_v52 = vmax.f32 %v1087_v37, %v1088_v44  ;;  %v989_v53 = vmax.f32 %v987_v38, %v988_v45  ;;  %v1107_v55 = vrot.slane %v1106_v47, 2  ;;  %v1008_v56 = vmax.f32 %v1006_v34, %v1007_v48 }
 0x2d8   :  { %v4205_v57 = vpop.eup %3667  ;;  %3679 = vpow2.f32 %v1271_v49  ;;  %v1210_v46 = vsub.f32 %v4178_v58, %v998_v50  ;;  %v1098_v59 = vrot.slane %v1097_v51, 4  ;;  %v4210_v61 = vsel %vm74_vm0, %v4201_v40, -inf }
 0x2d9   :  { %v1368_v62 = vsel %vm74_vm0, %v4205_v57, 0.0  ;;  %v1223_v63 = vsub.f32 %v4176_v54, %v1089_v52  ;;  %v990_v0 = vrot.slane %v989_v53, 1  ;;  %v1108_v2 = vmax.f32 %v1106_v47, %v1107_v55 }
 0x2da   :  { %v4215_v3 = vpop.eup %3669  ;;  %v1369_v60 = vrot.slane %v1368_v62, 4  ;;  %v1243_v1 = vmul.f32 1.442695, %v1210_v46  ;;  %v1009_v4 = vrot.slane %v1008_v56, 2  ;;  %v1099_v5 = vmax.f32 %v1097_v51, %v1098_v59 }
 0x2db   :  { %v1361_v58 = vsel %vm74_vm0, %v4215_v3, 0.0  ;;  %v1269_v6 = vmul.f32 1.442695, %v1223_v63  ;;  %v991_v7 = vmax.f32 %v989_v53, %v990_v0  ;;  %v1109_v8 = vrot.slane %v1108_v2, 1 }
 0x2dc   :  { %v4219_v9 = vpop.eup %3671  ;;  %v1370_v10 = vadd.f32 %v1369_v60, %v1368_v62  ;;  %v1362_v13 = vrot.slane %v1361_v58, 4  ;;  %3681 = vpow2.f32 %v1243_v1  ;;  %v1010_v54 = vmax.f32 %v1008_v56, %v1009_v4 }
 0x2dd   :  { %v1382_v19 = vsel %vm74_vm0, %v4219_v9, 0.0  ;;  %3683 = vpow2.f32 %v1269_v6  ;;  %v1209_v14 = vsub.f32 %v4184_v11, %v991_v7  ;;  %v1110_v15 = vmax.f32 %v1108_v2, %v1109_v8 }
 0x2de   :  { %v4224_v16 = vpop.eup %3673  ;;  %v1371_v17 = vrot.slane %v1370_v10, 2  ;;  %v1363_v18 = vadd.f32 %v1362_v13, %v1361_v58  ;;  %v1383_v21 = vrot.slane %v1382_v19, 4  ;;  %v1011_v22 = vrot.slane %v1010_v54, 1 }
 0x2df   :  { %v1375_v23 = vsel %vm74_vm0, %v4224_v16, 0.0  ;;  %v1241_v24 = vmul.f32 1.442695, %v1209_v14  ;;  %v1226_v26 = vsub.f32 %v4186_v20, %v1110_v15  ;;  %v1100_v27 = vrot.slane %v1099_v5, 2  ;;  %v4252_v14 = vpop.f32.mrf.mxu1 }
 0x2e0   :  { %v1372_v25 = vadd.f32 %v1371_v17, %v1370_v10  ;;  %v1364_v28 = vrot.slane %v1363_v18, 2  ;;  %v1384_v30 = vadd.f32 %v1383_v21, %v1382_v19  ;;  %v1376_v31 = vrot.slane %v1375_v23, 4 }
 0x2e1   :  { %v4229_v32 = vpop.eup %3675  ;;  %3685 = vpow2.f32 %v1241_v24  ;;  %v1275_v11 = vmul.f32 1.442695, %v1226_v26  ;;  %v1012_v33 = vmax.f32 %v1010_v54, %v1011_v22  ;;  %v1101_v35 = vmax.f32 %v1099_v5, %v1100_v27 }
 0x2e2   :  { %v1373_v36 = vrot.slane %v1372_v25, 1  ;;  %v1365_v37 = vadd.f32 %v1364_v28, %v1363_v18  ;;  %v1385_v38 = vrot.slane %v1384_v30, 2  ;;  %v1377_v39 = vadd.f32 %v1376_v31, %v1375_v23 }
 0x2e3   :  { %v4231_v34 = vpop.eup %3677  ;;  %v1396_v20 = vsel %vm74_vm0, %v4229_v32, 0.0  ;;  %3687 = vpow2.f32 %v1275_v11  ;;  %v1212_v42 = vsub.f32 %v4191_v29, %v1012_v33  ;;  %v1102_v12 = vrot.slane %v1101_v35, 1 }
 0x2e4   :  { %v1374_v43 = vadd.f32 %v1373_v36, %v1372_v25  ;;  %v1366_v44 = vrot.slane %v1365_v37, 1  ;;  %v1386_v45 = vadd.f32 %v1385_v38, %v1384_v30  ;;  %v1378_v47 = vrot.slane %v1377_v39, 2 }
 0x2e5   :  { %v4236_v48 = vpop.eup %3679  ;;  %v1397_v49 = vrot.slane %v1396_v20, 4  ;;  %v1389_v50 = vsel %vm74_vm0, %v4231_v34, 0.0  ;;  %v1247_v51 = vmul.f32 1.442695, %v1212_v42  ;;  %v1103_v52 = vmax.f32 %v1101_v35, %v1102_v12 }
 0x2e6   :  { %3689 = vrcp.f32 %v1374_v43  ;;  %v1367_v53 = vadd.f32 %v1366_v44, %v1365_v37  ;;  %v1387_v55 = vrot.slane %v1386_v45, 1  ;;  %v1379_v56 = vadd.f32 %v1378_v47, %v1377_v39 }
 0x2e7   :  { %v1398_v46 = vadd.f32 %v1397_v49, %v1396_v20  ;;  %v1390_v59 = vrot.slane %v1389_v50, 4  ;;  %v1410_v29 = vsel %vm74_vm0, %v4236_v48, 0.0  ;;  %3691 = vpow2.f32 %v1247_v51 }
 0x2e8   :  { %3693 = vrcp.f32 %v1367_v53  ;;  %v1388_v62 = vadd.f32 %v1387_v55, %v1386_v45  ;;  %v1380_v63 = vrot.slane %v1379_v56, 1  ;;  %v1411_v0 = vrot.slane %v1410_v29, 4 }
 0x2e9   :  { %v4242_v2 = vpop.eup %3681  ;;  %v1399_v60 = vrot.slane %v1398_v46, 2  ;;  %v1391_v1 = vadd.f32 %v1390_v59, %v1389_v50  ;;  %v1225_v4 = vsub.f32 %v4198_v41, %v1103_v52  ;;  %v1000_v5 = vrot.slane %v4210_v61, 4 }
 0x2ea   :  { %v4246_v58 = vpop.eup %3683  ;;  %3695 = vrcp.f32 %v1388_v62  ;;  %v1381_v6 = vadd.f32 %v1380_v63, %v1379_v56  ;;  %v1412_v7 = vadd.f32 %v1411_v0, %v1410_v29  ;;  %v1312_v8 = vsel %vm74_vm0, %v4242_v2, 0.0 }
 0x2eb   :  { %v1400_v10 = vadd.f32 %v1399_v60, %v1398_v46  ;;  %v1392_v13 = vrot.slane %v1391_v1, 2  ;;  %v1313_v54 = vrot.slane %v1312_v8, 4  ;;  %v1403_v19 = vsel %vm74_vm0, %v4246_v58, 0.0  ;;  %v4271_v46 = vpop.permute.xlu1 %1595 }
 0x2ec   :  { %3697 = vrcp.f32 %v1381_v6  ;;  %v1413_v41 = vrot.slane %v1412_v7, 2  ;;  %v1404_v15 = vrot.slane %v1403_v19, 4  ;;  %v1273_v17 = vmul.f32 1.442695, %v1225_v4 }
 0x2ed   :  { %v1401_v18 = vrot.slane %v1400_v10, 1  ;;  %v1393_v21 = vadd.f32 %v1392_v13, %v1391_v1  ;;  %v1314_v22 = vadd.f32 %v1313_v54, %v1312_v8  ;;  %v1001_v23 = vmax.f32 %v4210_v61, %v1000_v5 }
 0x2ee   :  { %v4255_v24 = vpop.eup %3685  ;;  %v1414_v26 = vadd.f32 %v1413_v41, %v1412_v7  ;;  %v1405_v27 = vadd.f32 %v1404_v15, %v1403_v19  ;;  %3699 = vpow2.f32 %v1273_v17  ;;  %v4259_v25 = vsel %vm74_vm0, %v4252_v14, -inf }
 0x2ef   :  { %v1402_v28 = vadd.f32 %v1401_v18, %v1400_v10  ;;  %v1394_v30 = vrot.slane %v1393_v21, 1  ;;  %v1315_v31 = vrot.slane %v1314_v22, 2  ;;  %v1305_v11 = vsel %vm74_vm0, %v4255_v24, 0.0 }
 0x2f0   :  { %v4263_v33 = vpop.eup %3687  ;;  %v1415_v35 = vrot.slane %v1414_v26, 1  ;;  %v1406_v36 = vrot.slane %v1405_v27, 2  ;;  %v1306_v61 = vrot.slane %v1305_v11, 4  ;;  %v1002_v37 = vrot.slane %v1001_v23, 2 }
 0x2f1   :  { %3701 = vrcp.f32 %v1402_v28  ;;  %v1395_v38 = vadd.f32 %v1394_v30, %v1393_v21  ;;  %v1316_v39 = vadd.f32 %v1315_v31, %v1314_v22  ;;  %v1424_v20 = vsel %vm74_vm0, %v4263_v33, 0.0  ;;  %v4290_v30 = vpop.f32.mrf.mxu0  ;;  %v4292_v31 = vpop.f32.mrf.mxu1 }
 0x2f2   :  { %v1416_v42 = vadd.f32 %v1415_v35, %v1414_v26  ;;  %v1407_v12 = vadd.f32 %v1406_v36, %v1405_v27  ;;  %v1307_v43 = vadd.f32 %v1306_v61, %v1305_v11  ;;  %v1425_v44 = vrot.slane %v1424_v20, 4 }
 0x2f3   :  { %v3690_v45 = vpop.eup %3689  ;;  %3703 = vrcp.f32 %v1395_v38  ;;  %v1317_v47 = vrot.slane %v1316_v39, 1  ;;  %v1003_v49 = vmax.f32 %v1001_v23, %v1002_v37  ;;  %v1119_v50 = vrot.slane %v4259_v25, 4 }
 0x2f4   :  { %v4268_v51 = vpop.eup %3691  ;;  %v1570_v52 = vmul.f32 %v3690_v45, %v4205_v57  ;;  %3705 = vrcp.f32 %v1416_v42  ;;  %v1408_v53 = vrot.slane %v1407_v12, 1  ;;  %v1308_v55 = vrot.slane %v1307_v43, 2  ;;  %v4307_v45 = vpop.f32.mrf.mxu0 }
 0x2f5   :  { %v3694_v56 = vpop.eup %3693  ;;  %v1318_v59 = vadd.f32 %v1317_v47, %v1316_v39  ;;  %v1426_v29 = vadd.f32 %v1425_v44, %v1424_v20  ;;  %v1326_v62 = vsel %vm74_vm0, %v4268_v51, 0.0  ;;  %v1004_v63 = vrot.slane %v1003_v49, 1  ;;  %v4309_v47 = vpop.f32.mrf.mxu1 }
 0x2f6   :  { %v1614_v0 = vmul.f32 %v4271_v46, %v1570_v52  ;;  %v1569_v60 = vmul.f32 %v3694_v56, %v4215_v3  ;;  %v1409_v1 = vadd.f32 %v1408_v53, %v1407_v12  ;;  %v1309_v4 = vadd.f32 %v1308_v55, %v1307_v43 }
 0x2f7   :  { %v3696_v5 = vpop.eup %3695  ;;  %3707 = vrcp.f32 %v1318_v59  ;;  %v1427_v57 = vrot.slane %v1426_v29, 2  ;;  %v1327_v6 = vrot.slane %v1326_v62, 4  ;;  %v1005_v7 = vmax.f32 %v1003_v49, %v1004_v63 }
 0x2f8   :  { %v1700_v8 = vsel %vm74_vm0, %v1614_v0, 0.0  ;;  %v1613_v10 = vmul.f32 %v4271_v46, %v1569_v60  ;;  %v1572_v13 = vmul.f32 %v3696_v5, %v4219_v9  ;;  %3709 = vrcp.f32 %v1409_v1 }
 0x2f9   :  { %v3698_v54 = vpop.eup %3697  ;;  %v1701_v19 = vrot.slane %v1700_v8, 4  ;;  %v1310_v41 = vrot.slane %v1309_v4, 1  ;;  %v1428_v15 = vadd.f32 %v1427_v57, %v1426_v29  ;;  %v1328_v17 = vadd.f32 %v1327_v6, %v1326_v62 }
 0x2fa   :  { %v1693_v3 = vsel %vm74_vm0, %v1613_v10, 0.0  ;;  %v4282_v18 = vmul.f32 %v4271_v46, %v1572_v13  ;;  %v1571_v21 = vmul.f32 %v3698_v54, %v4224_v16  ;;  %v1211_v22 = vsub.f32 %v4201_v40, %v1005_v7 }
 0x2fb   :  { %v4286_v23 = vpop.eup %3699  ;;  %v4288_v26 = vadd.f32 %v1701_v19, %v1700_v8  ;;  %v1694_v9 = vrot.slane %v1693_v3, 4  ;;  %v1311_v27 = vadd.f32 %v1310_v41, %v1309_v4  ;;  %v1429_v28 = vrot.slane %v1428_v15, 1 }
 0x2fc   :  { %v1615_v11 = vmul.f32 %v4271_v46, %v1571_v21  ;;  %v1329_v35 = vrot.slane %v1328_v17, 2  ;;  %v1417_v36 = vsel %vm74_vm0, %v4286_v23, 0.0  ;;  %v1245_v16 = vmul.f32 1.442695, %v1211_v22 }
 0x2fd   :  { %v4297_v61 = vadd.f32 %v1694_v9, %v1693_v3  ;;  %3711 = vrcp.f32 %v1311_v27  ;;  %v1430_v40 = vadd.f32 %v1429_v28, %v1428_v15  ;;  %v1418_v37 = vrot.slane %v1417_v36, 4  ;;  %v4326_v15 = vpop.f32.mrf.mxu0 }
 0x2fe   :  { %v3702_v38 = vpop.eup %3701  ;;  %v4300_v39 = vsel %vm74_vm0, %v1615_v11, 0.0  ;;  %v1330_v20 = vadd.f32 %v1329_v35, %v1328_v17  ;;  %3713 = vpow2.f32 %v1245_v16  ;;  %v1120_v42 = vmax.f32 %v4259_v25, %v1119_v50  ;;  %v4328_v17 = vpop.permute.xlu0 %1593 }
 0x2ff   :  { %v1708_v12 = vrot.slane %v4300_v39, 4  ;;  %v4305_v43 = vmul.f32 %v3702_v38, %v4229_v32  ;;  %3715 = vrcp.f32 %v1430_v40  ;;  %v1419_v44 = vadd.f32 %v1418_v37, %v1417_v36 }
 0x300   :  { %v3704_v49 = vpop.eup %3703  ;;  %v1331_v52 = vrot.slane %v1330_v20, 1  ;;  %v1121_v53 = vrot.slane %v1120_v42, 2  ;;  %v1020_v55 = vsel %vm74_vm0, %v4290_v30, -inf  ;;  %v1111_v25 = vsel %vm74_vm0, %v4292_v31, -inf }
 0x301   :  { %v4315_v50 = vpop.eup %3705  ;;  %v1573_v32 = vmul.f32 %v3704_v49, %v4231_v34  ;;  %v1420_v56 = vrot.slane %v1419_v44, 2  ;;  %v1021_v59 = vrot.slane %v1020_v55, 4  ;;  %v1112_v29 = vrot.slane %v1111_v25, 4 }
 0x302   :  { %v1332_v62 = vadd.f32 %v1331_v52, %v1330_v20  ;;  %v1122_v63 = vmax.f32 %v1120_v42, %v1121_v53  ;;  %v1013_v0 = vsel %vm74_vm0, %v4307_v45, -inf  ;;  %v1132_v60 = vsel %vm74_vm0, %v4309_v47, -inf  ;;  %v4338_v53 = vpop.f32.mrf.mxu1 }
 0x303   :  { %v4323_v1 = vmul.f32 %v4271_v46, %v1573_v32  ;;  %v1421_v4 = vadd.f32 %v1420_v56, %v1419_v44  ;;  %v1022_v5 = vmax.f32 %v1020_v55, %v1021_v59  ;;  %v1113_v57 = vmax.f32 %v1111_v25, %v1112_v29 }
 0x304   :  { %v3708_v6 = vpop.eup %3707  ;;  %3717 = vrcp.f32 %v1332_v62  ;;  %v1123_v34 = vrot.slane %v1122_v63, 1  ;;  %v1014_v7 = vrot.slane %v1013_v0, 4  ;;  %v1133_v8 = vrot.slane %v1132_v60, 4 }
 0x305   :  { %v3710_v10 = vpop.eup %3709  ;;  %v1562_v13 = vmul.f32 %v3708_v6, %v4242_v2  ;;  %v1422_v54 = vrot.slane %v1421_v4, 1  ;;  %v1023_v19 = vrot.slane %v1022_v5, 2  ;;  %v1114_v41 = vrot.slane %v1113_v57, 2 }
 0x306   :  { %v4331_v3 = vmul.f32 %v3710_v10, %v4246_v58  ;;  %v1124_v21 = vmax.f32 %v1122_v63, %v1123_v34  ;;  %v1015_v22 = vmax.f32 %v1013_v0, %v1014_v7  ;;  %v1134_v9 = vmax.f32 %v1132_v60, %v1133_v8  ;;  %v4353_v8 = vpop.f32.mrf.mxu1 }
 0x307   :  { %v1606_v27 = vmul.f32 %v4328_v17, %v1562_v13  ;;  %v1423_v28 = vadd.f32 %v1422_v54, %v1421_v4  ;;  %v1024_v11 = vmax.f32 %v1022_v5, %v1023_v19  ;;  %v1115_v35 = vmax.f32 %v1113_v57, %v1114_v41  ;;  %v4350_v57 = vpop.permute.xlu0 %1597 }
 0x308   :  { %v1228_v2 = vsub.f32 %v4252_v14, %v1124_v21  ;;  %v1016_v36 = vrot.slane %v1015_v22, 2  ;;  %v1135_v16 = vrot.slane %v1134_v9, 2  ;;  %v1034_v40 = vsel %vm74_vm0, %v4326_v15, -inf }
 0x309   :  { %v1644_v37 = vsel %vm74_vm0, %v1606_v27, 0.0  ;;  %3719 = vrcp.f32 %v1423_v28  ;;  %v1025_v58 = vrot.slane %v1024_v11, 1  ;;  %v1116_v38 = vrot.slane %v1115_v35, 1  ;;  %v4359_v28 = vpop.f32.mrf.mxu0 }
 0x30a   :  { %v3712_v20 = vpop.eup %3711  ;;  %v1645_v42 = vrot.slane %v1644_v37, 4  ;;  %v1279_v44 = vmul.f32 1.442695, %v1228_v2  ;;  %v1017_v49 = vmax.f32 %v1015_v22, %v1016_v36  ;;  %v1136_v52 = vmax.f32 %v1134_v9, %v1135_v16  ;;  %v4364_v36 = vpop.f32.mrf.mxu1 }
 0x30b   :  { %v4340_v55 = vpop.eup %3713  ;;  %v1561_v14 = vmul.f32 %v3712_v20, %v4255_v24  ;;  %v1026_v25 = vmax.f32 %v1024_v11, %v1025_v58  ;;  %v1117_v32 = vmax.f32 %v1115_v35, %v1116_v38  ;;  %v1035_v56 = vrot.slane %v1034_v40, 4 }
 0x30c   :  { %v3716_v59 = vpop.eup %3715  ;;  %v4343_v29 = vadd.f32 %v1645_v42, %v1644_v37  ;;  %v1319_v62 = vsel %vm74_vm0, %v4340_v55, 0.0  ;;  %3721 = vpow2.f32 %v1279_v44  ;;  %v1018_v63 = vrot.slane %v1017_v49, 1 }
 0x30d   :  { %v1605_v0 = vmul.f32 %v4328_v17, %v1561_v14  ;;  %v1578_v60 = vmul.f32 %v3716_v59, %v4263_v33  ;;  %v1320_v4 = vrot.slane %v1319_v62, 4  ;;  %v1214_v5 = vsub.f32 %v4290_v30, %v1026_v25 }
 0x30e   :  { %v1227_v24 = vsub.f32 %v4292_v31, %v1117_v32  ;;  %v1019_v6 = vmax.f32 %v1017_v49, %v1018_v63  ;;  %v1137_v34 = vrot.slane %v1136_v52, 1  ;;  %v1036_v7 = vmax.f32 %v1034_v40, %v1035_v56  ;;  %v4380_v56 = vpop.f32.mrf.mxu1 }
 0x30f   :  { %v1637_v10 = vsel %vm74_vm0, %v1605_v0, 0.0  ;;  %v1622_v13 = vmul.f32 %v4350_v57, %v1578_v60  ;;  %v1321_v54 = vadd.f32 %v1320_v4, %v1319_v62  ;;  %v1251_v19 = vmul.f32 1.442695, %v1214_v5 }
 0x310   :  { %v1638_v41 = vrot.slane %v1637_v10, 4  ;;  %v1277_v33 = vmul.f32 1.442695, %v1227_v24  ;;  %v1213_v21 = vsub.f32 %v4307_v45, %v1019_v6  ;;  %v1138_v30 = vmax.f32 %v1136_v52, %v1137_v34 }
 0x311   :  { %v3718_v22 = vpop.eup %3717  ;;  %v1756_v9 = vsel %vm74_vm0, %v1622_v13, 0.0  ;;  %v1322_v31 = vrot.slane %v1321_v54, 2  ;;  %3723 = vpow2.f32 %v1251_v19  ;;  %v1037_v27 = vrot.slane %v1036_v7, 2 }
 0x312   :  { %v4361_v11 = vadd.f32 %v1638_v41, %v1637_v10  ;;  %v1757_v35 = vrot.slane %v1756_v9, 4  ;;  %v1564_v2 = vmul.f32 %v3718_v22, %v4268_v51  ;;  %3725 = vpow2.f32 %v1277_v33 }
 0x313   :  { %v1323_v16 = vadd.f32 %v1322_v31, %v1321_v54  ;;  %v1249_v40 = vmul.f32 1.442695, %v1213_v21  ;;  %v1230_v45 = vsub.f32 %v4309_v47, %v1138_v30  ;;  %v1038_v37 = vmax.f32 %v1036_v7, %v1037_v27 }
 0x314   :  { %v4367_v58 = vadd.f32 %v1757_v35, %v1756_v9  ;;  %v4370_v38 = vmul.f32 %v4328_v17, %v1564_v2  ;;  %v1125_v20 = vsel %vm74_vm0, %v4338_v53, -inf  ;;  %v1027_v42 = vsel %vm74_vm0, %v4359_v28, -inf }
 0x315   :  { %v1324_v51 = vrot.slane %v1323_v16, 1  ;;  %3727 = vpow2.f32 %v1249_v40  ;;  %v1283_v44 = vmul.f32 1.442695, %v1230_v45  ;;  %v1039_v49 = vrot.slane %v1038_v37, 1 }
 0x316   :  { %v3720_v52 = vpop.eup %3719  ;;  %v1126_v14 = vrot.slane %v1125_v20, 4  ;;  %v1028_v25 = vrot.slane %v1027_v42, 4  ;;  %v1146_v47 = vsel %vm74_vm0, %v4353_v8, -inf  ;;  %v1139_v32 = vsel %vm74_vm0, %v4364_v36, -inf }
 0x317   :  { %v1577_v59 = vmul.f32 %v3720_v52, %v4286_v23  ;;  %v1325_v62 = vadd.f32 %v1324_v51, %v1323_v16  ;;  %3729 = vpow2.f32 %v1283_v44  ;;  %v1040_v63 = vmax.f32 %v1038_v37, %v1039_v49  ;;  %v4400_v52 = vpop.f32.mrf.mxu1 }
 0x318   :  { %v1127_v0 = vmax.f32 %v1125_v20, %v1126_v14  ;;  %v1029_v60 = vmax.f32 %v1027_v42, %v1028_v25  ;;  %v1147_v4 = vrot.slane %v1146_v47, 4  ;;  %v1140_v5 = vrot.slane %v1139_v32, 4 }
 0x319   :  { %v4383_v24 = vpop.eup %3721  ;;  %v1621_v6 = vmul.f32 %v4350_v57, %v1577_v59  ;;  %3731 = vrcp.f32 %v1325_v62  ;;  %v1216_v34 = vsub.f32 %v4326_v15, %v1040_v63  ;;  %v1160_v7 = vsel %vm74_vm0, %v4380_v56, -inf }
 0x31a   :  { %v1438_v23 = vsel %vm74_vm0, %v4383_v24, 0.0  ;;  %v1128_v10 = vrot.slane %v1127_v0, 2  ;;  %v1030_v13 = vrot.slane %v1029_v60, 2  ;;  %v1148_v54 = vmax.f32 %v1146_v47, %v1147_v4 }
 0x31b   :  { %v1749_v19 = vsel %vm74_vm0, %v1621_v6, 0.0  ;;  %v1439_v41 = vrot.slane %v1438_v23, 4  ;;  %v1255_v33 = vmul.f32 1.442695, %v1216_v34  ;;  %v1141_v21 = vmax.f32 %v1139_v32, %v1140_v5 }
 0x31c   :  { %v1750_v30 = vrot.slane %v1749_v19, 4  ;;  %v1129_v22 = vmax.f32 %v1127_v0, %v1128_v10  ;;  %v1031_v9 = vmax.f32 %v1029_v60, %v1030_v13  ;;  %v1149_v31 = vrot.slane %v1148_v54, 2 }
 0x31d   :  { %v1440_v27 = vadd.f32 %v1439_v41, %v1438_v23  ;;  %3733 = vpow2.f32 %v1255_v33  ;;  %v1142_v15 = vrot.slane %v1141_v21, 2  ;;  %v1161_v35 = vrot.slane %v1160_v7, 4 }
 0x31e   :  { %v4392_v2 = vpop.eup %3723  ;;  %v4394_v16 = vadd.f32 %v1750_v30, %v1749_v19  ;;  %v1130_v40 = vrot.slane %v1129_v22, 1  ;;  %v1032_v45 = vrot.slane %v1031_v9, 1  ;;  %v1150_v37 = vmax.f32 %v1148_v54, %v1149_v31  ;;  %v4410_v54 = vpop.f32.mrf.mxu1 }
 0x31f   :  { %v4396_v20 = vpop.eup %3725  ;;  %v1441_v42 = vrot.slane %v1440_v27, 2  ;;  %v1340_v51 = vsel %vm74_vm0, %v4392_v2, 0.0  ;;  %v1143_v44 = vmax.f32 %v1141_v21, %v1142_v15  ;;  %v1162_v49 = vmax.f32 %v1160_v7, %v1161_v35 }
 0x320   :  { %v1341_v14 = vrot.slane %v1340_v51, 4  ;;  %v1431_v25 = vsel %vm74_vm0, %v4396_v20, 0.0  ;;  %v1131_v47 = vmax.f32 %v1129_v22, %v1130_v40  ;;  %v1033_v32 = vmax.f32 %v1031_v9, %v1032_v45 }
 0x321   :  { %v1442_v59 = vadd.f32 %v1441_v42, %v1440_v27  ;;  %v1432_v62 = vrot.slane %v1431_v25, 4  ;;  %v1151_v63 = vrot.slane %v1150_v37, 1  ;;  %v1144_v0 = vrot.slane %v1143_v44, 1  ;;  %v4418_v42 = vpop.f32.mrf.mxu1 }
 0x322   :  { %v4404_v60 = vpop.eup %3727  ;;  %v1342_v4 = vadd.f32 %v1341_v14, %v1340_v51  ;;  %v1229_v5 = vsub.f32 %v4338_v53, %v1131_v47  ;;  %v1215_v6 = vsub.f32 %v4359_v28, %v1033_v32  ;;  %v1163_v34 = vrot.slane %v1162_v49, 2 }
 0x323   :  { %v1443_v7 = vrot.slane %v1442_v59, 1  ;;  %v1433_v23 = vadd.f32 %v1432_v62, %v1431_v25  ;;  %v1333_v10 = vsel %vm74_vm0, %v4404_v60, 0.0  ;;  %v1152_v13 = vmax.f32 %v1150_v37, %v1151_v63 }
 0x324   :  { %v4412_v19 = vpop.eup %3729  ;;  %v1343_v41 = vrot.slane %v1342_v4, 2  ;;  %v1334_v33 = vrot.slane %v1333_v10, 4  ;;  %v1281_v21 = vmul.f32 1.442695, %v1229_v5  ;;  %v1253_v30 = vmul.f32 1.442695, %v1215_v6 }
 0x325   :  { %v1444_v22 = vadd.f32 %v1443_v7, %v1442_v59  ;;  %v1434_v9 = vrot.slane %v1433_v23, 2  ;;  %v1452_v53 = vsel %vm74_vm0, %v4412_v19, 0.0  ;;  %v1232_v28 = vsub.f32 %v4353_v8, %v1152_v13 }
 0x326   :  { %v3732_v31 = vpop.eup %3731  ;;  %v1344_v27 = vadd.f32 %v1343_v41, %v1342_v4  ;;  %v1335_v15 = vadd.f32 %v1334_v33, %v1333_v10  ;;  %v1453_v35 = vrot.slane %v1452_v53, 4  ;;  %3735 = vpow2.f32 %v1281_v21  ;;  %v4429_v10 = vpop.f32.mrf.mxu1 }
 0x327   :  { %v1563_v40 = vmul.f32 %v3732_v31, %v4340_v55  ;;  %3737 = vrcp.f32 %v1444_v22  ;;  %v1435_v45 = vadd.f32 %v1434_v9, %v1433_v23  ;;  %v1287_v37 = vmul.f32 1.442695, %v1232_v28 }
 0x328   :  { %v1345_v51 = vrot.slane %v1344_v27, 1  ;;  %v1336_v14 = vrot.slane %v1335_v15, 2  ;;  %v1454_v25 = vadd.f32 %v1453_v35, %v1452_v53  ;;  %3739 = vpow2.f32 %v1253_v30  ;;  %v4436_v28 = vpop.f32.mrf.mxu1 }
 0x329   :  { %v1607_v47 = vmul.f32 %v4328_v17, %v1563_v40  ;;  %v1436_v32 = vrot.slane %v1435_v45, 1  ;;  %3741 = vpow2.f32 %v1287_v37  ;;  %v1145_v8 = vmax.f32 %v1143_v44, %v1144_v0 }
 0x32a   :  { %v4421_v59 = vpop.eup %3733  ;;  %v1346_v62 = vadd.f32 %v1345_v51, %v1344_v27  ;;  %v1337_v63 = vadd.f32 %v1336_v14, %v1335_v15  ;;  %v1455_v4 = vrot.slane %v1454_v25, 2  ;;  %v1164_v55 = vmax.f32 %v1162_v49, %v1163_v34 }
 0x32b   :  { %v4424_v5 = vsel %vm74_vm0, %v1607_v47, 0.0  ;;  %v1437_v6 = vadd.f32 %v1436_v32, %v1435_v45  ;;  %v1354_v7 = vsel %vm74_vm0, %v4421_v59, 0.0  ;;  %v1231_v23 = vsub.f32 %v4364_v36, %v1145_v8 }
 0x32c   :  { %v1652_v13 = vrot.slane %v4424_v5, 4  ;;  %3743 = vrcp.f32 %v1346_v62  ;;  %v1338_v44 = vrot.slane %v1337_v63, 1  ;;  %v1456_v0 = vadd.f32 %v1455_v4, %v1454_v25 }
 0x32d   :  { %3745 = vrcp.f32 %v1437_v6  ;;  %v1355_v41 = vrot.slane %v1354_v7, 4  ;;  %v1285_v33 = vmul.f32 1.442695, %v1231_v23  ;;  %v1165_v49 = vrot.slane %v1164_v55, 1 }
 0x32e   :  { %v1339_v34 = vadd.f32 %v1338_v44, %v1337_v63  ;;  %v1457_v21 = vrot.slane %v1456_v0, 1  ;;  %v1153_v30 = vsel %vm74_vm0, %v4400_v52, -inf  ;;  %v1174_v22 = vsel %vm74_vm0, %v4410_v54, -inf }
 0x32f   :  { %v1356_v36 = vadd.f32 %v1355_v41, %v1354_v7  ;;  %3747 = vpow2.f32 %v1285_v33  ;;  %v1166_v9 = vmax.f32 %v1164_v55, %v1165_v49  ;;  %v1154_v53 = vrot.slane %v1153_v30, 4 }
 0x330   :  { %3749 = vrcp.f32 %v1339_v34  ;;  %v1458_v31 = vadd.f32 %v1457_v21, %v1456_v0  ;;  %v1175_v27 = vrot.slane %v1174_v22, 4  ;;  %v1167_v15 = vsel %vm74_vm0, %v4418_v42, -inf }
 0x331   :  { %v1357_v35 = vrot.slane %v1356_v36, 2  ;;  %v1234_v40 = vsub.f32 %v4380_v56, %v1166_v9  ;;  %v1155_v45 = vmax.f32 %v1153_v30, %v1154_v53  ;;  %v1168_v37 = vrot.slane %v1167_v15, 4 }
 0x332   :  { %3751 = vrcp.f32 %v1458_v31  ;;  %v1176_v51 = vmax.f32 %v1174_v22, %v1175_v27  ;;  %v1188_v14 = vsel %vm74_vm0, %v4429_v10, -inf  ;;  %v4445_v25 = vsel %vm74_vm0, %v4436_v28, -inf }
 0x333   :  { %v4447_v47 = vpop.eup %3735  ;;  %v1358_v32 = vadd.f32 %v1357_v35, %v1356_v36  ;;  %v1291_v8 = vmul.f32 1.442695, %v1234_v40  ;;  %v1156_v62 = vrot.slane %v1155_v45, 2  ;;  %v1169_v63 = vmax.f32 %v1167_v15, %v1168_v37 }
 0x334   :  { %v3738_v4 = vpop.eup %3737  ;;  %v1445_v56 = vsel %vm74_vm0, %v4447_v47, 0.0  ;;  %v1177_v55 = vrot.slane %v1176_v51, 2  ;;  %v1189_v6 = vrot.slane %v1188_v14, 4  ;;  %v1182_v7 = vrot.slane %v4445_v25, 4 }
 0x335   :  { %v4452_v23 = vpop.eup %3739  ;;  %v1580_v44 = vmul.f32 %v3738_v4, %v4383_v24  ;;  %v1359_v0 = vrot.slane %v1358_v32, 1  ;;  %v1446_v41 = vrot.slane %v1445_v56, 4  ;;  %3753 = vpow2.f32 %v1291_v8 }
 0x336   :  { %v4455_v33 = vpop.eup %3741  ;;  %v1347_v49 = vsel %vm74_vm0, %v4452_v23, 0.0  ;;  %v1157_v34 = vmax.f32 %v1155_v45, %v1156_v62  ;;  %v1178_v21 = vmax.f32 %v1176_v51, %v1177_v55  ;;  %v1170_v30 = vrot.slane %v1169_v63, 2 }
 0x337   :  { %v4460_v22 = vmul.f32 %v4350_v57, %v1580_v44  ;;  %v1360_v36 = vadd.f32 %v1359_v0, %v1358_v32  ;;  %v1447_v9 = vadd.f32 %v1446_v41, %v1445_v56  ;;  %v1348_v53 = vrot.slane %v1347_v49, 4 }
 0x338   :  { %v1466_v24 = vsel %vm74_vm0, %v4455_v33, 0.0  ;;  %v1158_v31 = vrot.slane %v1157_v34, 1  ;;  %v1179_v27 = vrot.slane %v1178_v21, 1  ;;  %v1171_v15 = vmax.f32 %v1169_v63, %v1170_v30 }
 0x339   :  { %v3744_v35 = vpop.eup %3743  ;;  %3755 = vrcp.f32 %v1360_v36  ;;  %v1448_v40 = vrot.slane %v1447_v9, 2  ;;  %v1349_v37 = vadd.f32 %v1348_v53, %v1347_v49  ;;  %v1467_v8 = vrot.slane %v1466_v24, 4 }
 0x33a   :  { %v3746_v45 = vpop.eup %3745  ;;  %v4465_v51 = vmul.f32 %v3744_v35, %v4392_v2  ;;  %v1159_v62 = vmax.f32 %v1157_v34, %v1158_v31  ;;  %v1180_v4 = vmax.f32 %v1178_v21, %v1179_v27  ;;  %v1172_v32 = vrot.slane %v1171_v15, 1  ;;  %v4476_v27 = vpop.f32.mrf.mxu1 }
 0x33b   :  { %v1579_v56 = vmul.f32 %v3746_v45, %v4396_v20  ;;  %v1449_v55 = vadd.f32 %v1448_v40, %v1447_v9  ;;  %v1350_v44 = vrot.slane %v1349_v37, 2  ;;  %v1468_v0 = vadd.f32 %v1467_v8, %v1466_v24 }
 0x33c   :  { %v4468_v41 = vpop.eup %3747  ;;  %v1233_v63 = vsub.f32 %v4400_v52, %v1159_v62  ;;  %v1236_v30 = vsub.f32 %v4410_v54, %v1180_v4  ;;  %v1173_v49 = vmax.f32 %v1171_v15, %v1172_v32  ;;  %v1190_v36 = vmax.f32 %v1188_v14, %v1189_v6 }
 0x33d   :  { %v3750_v53 = vpop.eup %3749  ;;  %v1623_v2 = vmul.f32 %v4350_v57, %v1579_v56  ;;  %v1450_v35 = vrot.slane %v1449_v55, 1  ;;  %v1351_v34 = vadd.f32 %v1350_v44, %v1349_v37  ;;  %v1469_v21 = vrot.slane %v1468_v0, 2 }
 0x33e   :  { %v1565_v31 = vmul.f32 %v3750_v53, %v4404_v60  ;;  %v1459_v20 = vsel %vm74_vm0, %v4468_v41, 0.0  ;;  %v1289_v9 = vmul.f32 1.442695, %v1233_v63  ;;  %v1295_v24 = vmul.f32 1.442695, %v1236_v30 }
 0x33f   :  { %v3752_v52 = vpop.eup %3751  ;;  %v4479_v54 = vsel %vm74_vm0, %v1623_v2, 0.0  ;;  %v1451_v14 = vadd.f32 %v1450_v35, %v1449_v55  ;;  %v1352_v6 = vrot.slane %v1351_v34, 1  ;;  %v1470_v15 = vadd.f32 %v1469_v21, %v1468_v0  ;;  %v4494_v0 = vpop.f32.mrf.mxu1 }
 0x340   :  { %v1764_v40 = vrot.slane %v4479_v54, 4  ;;  %v4483_v37 = vmul.f32 %v4328_v17, %v1565_v31  ;;  %v4486_v60 = vmul.f32 %v3752_v52, %v4412_v19  ;;  %v1460_v8 = vrot.slane %v1459_v20, 4 }
 0x341   :  { %3757 = vrcp.f32 %v1451_v14  ;;  %v1353_v45 = vadd.f32 %v1352_v6, %v1351_v34  ;;  %v1471_v62 = vrot.slane %v1470_v15, 1  ;;  %v1235_v4 = vsub.f32 %v4418_v42, %v1173_v49 }
 0x342   :  { %v4489_v32 = vpop.eup %3753  ;;  %v1461_v56 = vadd.f32 %v1460_v8, %v1459_v20  ;;  %3759 = vpow2.f32 %v1289_v9  ;;  %v1191_v55 = vrot.slane %v1190_v36, 2  ;;  %v1183_v44 = vmax.f32 %v4445_v25, %v1182_v7 }
 0x343   :  { %3761 = vrcp.f32 %v1353_v45  ;;  %v1472_v19 = vadd.f32 %v1471_v62, %v1470_v15  ;;  %v1480_v63 = vsel %vm74_vm0, %v4489_v32, 0.0  ;;  %v1293_v30 = vmul.f32 1.442695, %v1235_v4 }
 0x344   :  { %v1462_v53 = vrot.slane %v1461_v56, 2  ;;  %v1481_v2 = vrot.slane %v1480_v63, 4  ;;  %3763 = vpow2.f32 %v1295_v24  ;;  %v1192_v42 = vmax.f32 %v1190_v36, %v1191_v55 }
 0x345   :  { %3765 = vrcp.f32 %v1472_v19  ;;  %v1184_v49 = vrot.slane %v1183_v44, 2  ;;  %v1202_v35 = vsel %vm74_vm0, %v4476_v27, -inf  ;;  %v1195_v25 = vsel %vm74_vm0, %v4494_v0, -inf }
 0x346   :  { %v4502_v7 = vpop.eup %3755  ;;  %v1463_v34 = vadd.f32 %v1462_v53, %v1461_v56  ;;  %v1482_v21 = vadd.f32 %v1481_v2, %v1480_v63  ;;  %3767 = vpow2.f32 %v1293_v30  ;;  %v1193_v31 = vrot.slane %v1192_v42, 1 }
 0x347   :  { %v1185_v20 = vmax.f32 %v1183_v44, %v1184_v49  ;;  %v1203_v9 = vrot.slane %v1202_v35, 4  ;;  %v1196_v52 = vrot.slane %v1195_v25, 4  ;;  %v1576_v36 = vmul.f32 %v4315_v50, %v4236_v48 }
 0x348   :  { %v1464_v24 = vrot.slane %v1463_v34, 1  ;;  %v1483_v14 = vrot.slane %v1482_v21, 2  ;;  %v1194_v6 = vmax.f32 %v1192_v42, %v1193_v31  ;;  %v4508_v15 = vmul.f32 %v4271_v46, %v4305_v43 }
 0x349   :  { %v1186_v8 = vrot.slane %v1185_v20, 1  ;;  %v1204_v45 = vmax.f32 %v1202_v35, %v1203_v9  ;;  %v1197_v62 = vmax.f32 %v1195_v25, %v1196_v52  ;;  %v4512_v4 = vmul.f32 %v4271_v46, %v4331_v3 }
 0x34a   :  { %v1465_v56 = vadd.f32 %v1464_v24, %v1463_v34  ;;  %v1484_v55 = vadd.f32 %v1483_v14, %v1482_v21  ;;  %v1238_v44 = vsub.f32 %v4429_v10, %v1194_v6  ;;  %v4516_v48 = vmul.f32 %v4271_v46, %v1576_v36 }
 0x34b   :  { %v1187_v50 = vmax.f32 %v1185_v20, %v1186_v8  ;;  %v1205_v19 = vrot.slane %v1204_v45, 2  ;;  %v1198_v63 = vrot.slane %v1197_v62, 2  ;;  %v1696_v43 = vrot.slane %v4297_v61, 2 }
 0x34c   :  { %3769 = vrcp.f32 %v1465_v56  ;;  %v1485_v30 = vrot.slane %v1484_v55, 1  ;;  %v1299_v53 = vmul.f32 1.442695, %v1238_v44  ;;  %v1703_v2 = vrot.slane %v4288_v26, 2 }
 0x34d   :  { %v1237_v3 = vsub.f32 %v4436_v28, %v1187_v50  ;;  %v1206_v42 = vmax.f32 %v1204_v45, %v1205_v19  ;;  %v1199_v49 = vmax.f32 %v1197_v62, %v1198_v63  ;;  %v1697_v35 = vadd.f32 %v1696_v43, %v4297_v61 }
 0x34e   :  { %v3758_v10 = vpop.eup %3757  ;;  %v1486_v25 = vadd.f32 %v1485_v30, %v1484_v55  ;;  %3771 = vpow2.f32 %v1299_v53  ;;  %v1704_v46 = vadd.f32 %v1703_v2, %v4288_v26  ;;  %v1709_v34 = vadd.f32 %v1708_v12, %v4300_v39 }
 0x34f   :  { %v4526_v21 = vpop.eup %3759  ;;  %v1581_v31 = vmul.f32 %v3758_v10, %v4447_v47  ;;  %v1297_v20 = vmul.f32 1.442695, %v1237_v3  ;;  %v1207_v9 = vrot.slane %v1206_v42, 1  ;;  %v1200_v28 = vrot.slane %v1199_v49, 1 }
 0x350   :  { %v3762_v52 = vpop.eup %3761  ;;  %3773 = vrcp.f32 %v1486_v25  ;;  %v1473_v61 = vsel %vm74_vm0, %v4526_v21, 0.0  ;;  %v1698_v36 = vrot.slane %v1697_v35, 1  ;;  %v1705_v24 = vrot.slane %v1704_v46, 1 }
 0x351   :  { %v4531_v14 = vpop.eup %3763  ;;  %v4534_v26 = vmul.f32 %v4350_v57, %v1581_v31  ;;  %v4537_v39 = vmul.f32 %v3762_v52, %v4452_v23  ;;  %v1474_v12 = vrot.slane %v1473_v61, 4  ;;  %3775 = vpow2.f32 %v1297_v20 }
 0x352   :  { %v4539_v47 = vpop.eup %3765  ;;  %v1494_v6 = vsel %vm74_vm0, %v4531_v14, 0.0  ;;  %v1208_v8 = vmax.f32 %v1206_v42, %v1207_v9  ;;  %v1201_v45 = vmax.f32 %v1199_v49, %v1200_v28  ;;  %v4543_v62 = vadd.f32 %v1698_v36, %v1697_v35 }
 0x353   :  { %v4545_v56 = vpop.eup %3767  ;;  %v1475_v55 = vadd.f32 %v1474_v12, %v1473_v61  ;;  %v1495_v44 = vrot.slane %v1494_v6, 4  ;;  %v4547_v50 = vadd.f32 %v1705_v24, %v1704_v46  ;;  %v1710_v19 = vrot.slane %v1709_v34, 2 }
 0x354   :  { %v1487_v23 = vsel %vm74_vm0, %v4545_v56, 0.0  ;;  %v1240_v63 = vsub.f32 %v4476_v27, %v1208_v8  ;;  %v1239_v43 = vsub.f32 %v4494_v0, %v1201_v45  ;;  %v1714_v30 = vsel %vm74_vm0, %v4282_v18, 0.0 }
 0x355   :  { %v1476_v53 = vrot.slane %v1475_v55, 2  ;;  %v1496_v2 = vadd.f32 %v1495_v44, %v1494_v6  ;;  %v1488_v3 = vrot.slane %v1487_v23, 4  ;;  %v1711_v42 = vadd.f32 %v1710_v19, %v1709_v34 }
 0x356   :  { %v1303_v49 = vmul.f32 1.442695, %v1240_v63  ;;  %v1301_v35 = vmul.f32 1.442695, %v1239_v43  ;;  %v1715_v10 = vrot.slane %v1714_v30, 4  ;;  %v1721_v25 = vsel %vm74_vm0, %v4323_v1, 0.0 }
 0x357   :  { %v1477_v46 = vadd.f32 %v1476_v53, %v1475_v55  ;;  %v1497_v31 = vrot.slane %v1496_v2, 2  ;;  %v1489_v20 = vadd.f32 %v1488_v3, %v1487_v23  ;;  %v1712_v9 = vrot.slane %v1711_v42, 1 }
 0x358   :  { %3777 = vpow2.f32 %v1303_v49  ;;  %v1716_v27 = vadd.f32 %v1715_v10, %v1714_v30  ;;  %v1722_v0 = vrot.slane %v1721_v25, 4  ;;  %v1728_v18 = vsel %vm74_vm0, %v4508_v15, 0.0  ;;  %v4573_v10 = vpop.permute.xlu1 %1599 }
 0x359   :  { %v3770_v28 = vpop.eup %3769  ;;  %v1478_v52 = vrot.slane %v1477_v46, 1  ;;  %v1498_v61 = vadd.f32 %v1497_v31, %v1496_v2  ;;  %v1490_v34 = vrot.slane %v1489_v20, 2  ;;  %3779 = vpow2.f32 %v1301_v35 }
 0x35a   :  { %v4560_v36 = vmul.f32 %v3770_v28, %v4468_v41  ;;  %v4562_v24 = vadd.f32 %v1712_v9, %v1711_v42  ;;  %v1717_v1 = vrot.slane %v1716_v27, 2  ;;  %v1723_v12 = vadd.f32 %v1722_v0, %v1721_v25 }
 0x35b   :  { %v4564_v6 = vpop.eup %3771  ;;  %v1479_v8 = vadd.f32 %v1478_v52, %v1477_v46  ;;  %v1499_v45 = vrot.slane %v1498_v61, 1  ;;  %v1491_v55 = vadd.f32 %v1490_v34, %v1489_v20  ;;  %v1729_v44 = vrot.slane %v1728_v18, 4 }
 0x35c   :  { %v1508_v15 = vsel %vm74_vm0, %v4564_v6, 0.0  ;;  %v1718_v19 = vadd.f32 %v1717_v1, %v1716_v27  ;;  %v1724_v23 = vrot.slane %v1723_v12, 2  ;;  %v1735_v63 = vsel %vm74_vm0, %v4512_v4, 0.0 }
 0x35d   :  { %v3774_v41 = vpop.eup %3773  ;;  %3781 = vrcp.f32 %v1479_v8  ;;  %v1500_v43 = vadd.f32 %v1499_v45, %v1498_v61  ;;  %v1492_v30 = vrot.slane %v1491_v55, 1  ;;  %v1509_v53 = vrot.slane %v1508_v15, 4 }
 0x35e   :  { %v4570_v2 = vpop.eup %3775  ;;  %v1586_v3 = vmul.f32 %v3774_v41, %v4489_v32  ;;  %v1719_v42 = vrot.slane %v1718_v19, 1  ;;  %v1725_v49 = vadd.f32 %v1724_v23, %v1723_v12  ;;  %v1730_v35 = vadd.f32 %v1729_v44, %v1728_v18 }
 0x35f   :  { %3783 = vrcp.f32 %v1500_v43  ;;  %v1493_v25 = vadd.f32 %v1492_v30, %v1491_v55  ;;  %v1510_v46 = vadd.f32 %v1509_v53, %v1508_v15  ;;  %v1501_v4 = vsel %vm74_vm0, %v4570_v2, 0.0 }
 0x360   :  { %v1630_v31 = vmul.f32 %v4573_v10, %v1586_v3  ;;  %v1502_v20 = vrot.slane %v1501_v4, 4  ;;  %v4578_v9 = vadd.f32 %v1719_v42, %v1718_v19  ;;  %v1726_v27 = vrot.slane %v1725_v49, 1 }
 0x361   :  { %3785 = vrcp.f32 %v1493_v25  ;;  %v1511_v0 = vrot.slane %v1510_v46, 2  ;;  %v1731_v32 = vrot.slane %v1730_v35, 2  ;;  %v1736_v28 = vrot.slane %v1735_v63, 4 }
 0x362   :  { %v1812_v18 = vsel %vm74_vm0, %v1630_v31, 0.0  ;;  %v1503_v52 = vadd.f32 %v1502_v20, %v1501_v4  ;;  %v4581_v61 = vadd.f32 %v1726_v27, %v1725_v49  ;;  %v1742_v34 = vsel %vm74_vm0, %v4516_v48, 0.0 }
 0x363   :  { %v1813_v1 = vrot.slane %v1812_v18, 4  ;;  %v1512_v12 = vadd.f32 %v1511_v0, %v1510_v46  ;;  %v1732_v8 = vadd.f32 %v1731_v32, %v1730_v35  ;;  %v1737_v45 = vadd.f32 %v1736_v28, %v1735_v63 }
 0x364   :  { %v1504_v55 = vrot.slane %v1503_v52, 2  ;;  %v1743_v44 = vrot.slane %v1742_v34, 4 }
 0x365   :  { %v4585_v15 = vpop.eup %3777  ;;  %v4587_v19 = vadd.f32 %v1813_v1, %v1812_v18  ;;  %v1513_v23 = vrot.slane %v1512_v12, 1  ;;  %v1733_v41 = vrot.slane %v1732_v8, 1  ;;  %v1738_v43 = vrot.slane %v1737_v45, 2 }
 0x366   :  { %v4589_v30 = vpop.eup %3779  ;;  %v1505_v53 = vadd.f32 %v1504_v55, %v1503_v52  ;;  %v1522_v48 = vsel %vm74_vm0, %v4585_v15, 0.0  ;;  %v1744_v3 = vadd.f32 %v1743_v44, %v1742_v34 }
 0x367   :  { %v1514_v63 = vadd.f32 %v1513_v23, %v1512_v12  ;;  %v1523_v42 = vrot.slane %v1522_v48, 4  ;;  %v1515_v49 = vsel %vm74_vm0, %v4589_v30, 0.0  ;;  %v4595_v35 = vadd.f32 %v1733_v41, %v1732_v8 }
 0x368   :  { %v1506_v25 = vrot.slane %v1505_v53, 1  ;;  %v1516_v46 = vrot.slane %v1515_v49, 4  ;;  %v1739_v4 = vadd.f32 %v1738_v43, %v1737_v45  ;;  %v1745_v31 = vrot.slane %v1744_v3, 2 }
 0x369   :  { %3787 = vrcp.f32 %v1514_v63  ;;  %v1524_v20 = vadd.f32 %v1523_v42, %v1522_v48  ;;  %v1909_v41 = vsel %vm1895_vm1, %v4547_v50, %v4543_v62 }
 0x36a   :  { %v3782_v27 = vpop.eup %3781  ;;  %v1507_v0 = vadd.f32 %v1506_v25, %v1505_v53  ;;  %v1517_v32 = vadd.f32 %v1516_v46, %v1515_v49  ;;  %v1740_v28 = vrot.slane %v1739_v4, 1  ;;  %v1746_v18 = vadd.f32 %v1745_v31, %v1744_v3 }
 0x36b   :  { %v1585_v52 = vmul.f32 %v3782_v27, %v4526_v21  ;;  %v1525_v34 = vrot.slane %v1524_v20, 2  ;;  %v1910_v48 = vsel %vm1897_vm2, %v4562_v24, %v1909_v41  ;;  %v1568_v3 = vmul.f32 %v4502_v7, %v4421_v59 }
 0x36c   :  { %v3784_v1 = vpop.eup %3783  ;;  %3789 = vrcp.f32 %v1507_v0  ;;  %v1518_v12 = vrot.slane %v1517_v32, 2  ;;  %v4598_v8 = vadd.f32 %v1740_v28, %v1739_v4  ;;  %v1747_v45 = vrot.slane %v1746_v18, 1 }
 0x36d   :  { %v1629_v55 = vmul.f32 %v4573_v10, %v1585_v52  ;;  %v1588_v44 = vmul.f32 %v3784_v1, %v4531_v14  ;;  %v1526_v23 = vadd.f32 %v1525_v34, %v1524_v20  ;;  %v1911_v4 = vsel %vm1899_vm3, %v4578_v9, %v1910_v48 }
 0x36e   :  { %v3786_v43 = vpop.eup %3785  ;;  %v1519_v21 = vadd.f32 %v1518_v12, %v1517_v32  ;;  %v4605_v53 = vadd.f32 %v1747_v45, %v1746_v18  ;;  %v1610_v31 = vmul.f32 %v4328_v17, %v4465_v51  ;;  %v1912_v59 = vsel %vm1901_vm4, %v4581_v61, %v1911_v4 }
 0x36f   :  { %v1805_v63 = vsel %vm74_vm0, %v1629_v55, 0.0  ;;  %v4613_v42 = vmul.f32 %v4573_v10, %v1588_v44  ;;  %v1587_v14 = vmul.f32 %v3786_v43, %v4545_v56  ;;  %v1527_v49 = vrot.slane %v1526_v23, 1 }
 0x370   :  { %v1806_v25 = vrot.slane %v1805_v63, 4  ;;  %v1520_v46 = vrot.slane %v1519_v21, 1  ;;  %v1611_v7 = vmul.f32 %v4328_v17, %v4537_v39  ;;  %v1913_v32 = vsel %vm1903_vm5, %v4595_v35, %v1912_v59 }
 0x371   :  { %v1631_v20 = vmul.f32 %v4573_v10, %v1587_v14  ;;  %v1528_v27 = vadd.f32 %v1527_v49, %v1526_v23  ;;  %v1612_v28 = vmul.f32 %v4328_v17, %v1568_v3  ;;  %v1914_v51 = vsel %vm1905_vm6, %v4598_v8, %v1913_v32 }
 0x372   :  { %v4625_v0 = vadd.f32 %v1806_v25, %v1805_v63  ;;  %v1521_v56 = vadd.f32 %v1520_v46, %v1519_v21  ;;  %v1640_v52 = vrot.slane %v4361_v11, 2  ;;  %v1915_v39 = vsel %vm1907_vm7, %v4605_v53, %v1914_v51 }
 0x373   :  { %v4631_v18 = vsel %vm74_vm0, %v1631_v20, 0.0  ;;  %3791 = vrcp.f32 %v1528_v27  ;;  %v1647_v1 = vrot.slane %v4343_v29, 2  ;;  %v1937_v12 = vsel %vm74_vm0, %v1915_v39, 0.0 }
 0x374   :  { %v1820_v34 = vrot.slane %v4631_v18, 4  ;;  %3793 = vrcp.f32 %v1521_v56  ;;  %v1641_v17 = vadd.f32 %v1640_v52, %v4361_v11  ;;  %v1653_v45 = vadd.f32 %v1652_v13, %v4424_v5  ;;  %1938 = vadd.xlane.f32.xlu1 %v1937_v12 }
 0x375   :  { %v1658_v55 = vsel %vm74_vm0, %v4370_v38, 0.0  ;;  %v1648_v23 = vadd.f32 %v1647_v1, %v4343_v29  ;;  %v1665_v43 = vsel %vm74_vm0, %v4483_v37, 0.0  ;;  %v1672_v21 = vsel %vm74_vm0, %v1610_v31, 0.0 }
 0x376   :  { %v3788_v44 = vpop.eup %3787  ;;  %v1659_v41 = vrot.slane %v1658_v55, 4  ;;  %v1642_v11 = vrot.slane %v1641_v17, 1  ;;  %v1654_v3 = vrot.slane %v1653_v45, 2  ;;  %v1666_v63 = vrot.slane %v1665_v43, 4 }
 0x377   :  { %v4652_v48 = vmul.f32 %v3788_v44, %v4564_v6  ;;  %v1649_v5 = vrot.slane %v1648_v23, 1  ;;  %v1673_v14 = vrot.slane %v1672_v21, 4  ;;  %v1679_v38 = vsel %vm74_vm0, %v1611_v7, 0.0 }
 0x378   :  { %v1660_v13 = vadd.f32 %v1659_v41, %v1658_v55  ;;  %v4655_v25 = vadd.f32 %v1642_v11, %v1641_v17  ;;  %v1655_v29 = vadd.f32 %v1654_v3, %v1653_v45  ;;  %v1667_v46 = vadd.f32 %v1666_v63, %v1665_v43 }
 0x379   :  { %v3790_v49 = vpop.eup %3789  ;;  %v1680_v4 = vrot.slane %v1679_v38, 4  ;;  %v4658_v31 = vadd.f32 %v1649_v5, %v1648_v23  ;;  %v1674_v20 = vadd.f32 %v1673_v14, %v1672_v21  ;;  %v1686_v32 = vsel %vm74_vm0, %v1612_v28, 0.0 }
 0x37a   :  { %v1589_v37 = vmul.f32 %v3790_v49, %v4570_v2  ;;  %v1661_v6 = vrot.slane %v1660_v13, 2  ;;  %v1656_v27 = vrot.slane %v1655_v29, 1  ;;  %v1668_v59 = vrot.slane %v1667_v46, 2 }
 0x37b   :  { %v1681_v56 = vadd.f32 %v1680_v4, %v1679_v38  ;;  %v1675_v52 = vrot.slane %v1674_v20, 2  ;;  %v1687_v39 = vrot.slane %v1686_v32, 4  ;;  %v1896_v2 = vsel %vm1895_vm1, %v4658_v31, %v4655_v25 }
 0x37c   :  { %v4662_v51 = vmul.f32 %v4573_v10, %v1589_v37  ;;  %v1662_v7 = vadd.f32 %v1661_v6, %v1660_v13  ;;  %v4664_v1 = vadd.f32 %v1656_v27, %v1655_v29  ;;  %v1669_v12 = vadd.f32 %v1668_v59, %v1667_v46 }
 0x37d   :  { %v1682_v17 = vrot.slane %v1681_v56, 2  ;;  %v1676_v55 = vadd.f32 %v1675_v52, %v1674_v20  ;;  %v1688_v44 = vadd.f32 %v1687_v39, %v1686_v32  ;;  %v1954_v28 = vmul.f32 %v4543_v62, %v4543_v62 }
 0x37e   :  { %v1663_v45 = vrot.slane %v1662_v7, 1  ;;  %v1670_v23 = vrot.slane %v1669_v12, 1  ;;  %v1898_v43 = vsel %vm1897_vm2, %v4664_v1, %v1896_v2  ;;  %v1955_v21 = vmul.f32 %v4547_v50, %v4547_v50 }
 0x37f   :  { %v1683_v41 = vadd.f32 %v1682_v17, %v1681_v56  ;;  %v1677_v63 = vrot.slane %v1676_v55, 1  ;;  %v1689_v5 = vrot.slane %v1688_v44, 2  ;;  %v1956_v13 = vmul.f32 %v4562_v24, %v4562_v24 }
 0x380   :  { %v4675_v11 = vpop.eup %3791  ;;  %v4677_v3 = vadd.f32 %v1663_v45, %v1662_v7  ;;  %v4681_v38 = vadd.f32 %v1670_v23, %v1669_v12  ;;  %v1957_v29 = vmul.f32 %v4578_v9, %v4578_v9  ;;  %v1958_v46 = vmul.f32 %v4581_v61, %v4581_v61 }
 0x381   :  { %v3794_v14 = vpop.eup %3793  ;;  %v1684_v49 = vrot.slane %v1683_v41, 1  ;;  %v4690_v37 = vadd.f32 %v1677_v63, %v1676_v55  ;;  %v1690_v6 = vadd.f32 %v1689_v5, %v1688_v44  ;;  %v1959_v56 = vmul.f32 %v4595_v35, %v4595_v35 }
 0x382   :  { %v4688_v4 = vmul.f32 %v3794_v14, %v4589_v30  ;;  %v1900_v20 = vsel %vm1899_vm3, %v4677_v3, %v1898_v43  ;;  %v1960_v32 = vmul.f32 %v4598_v8, %v4598_v8  ;;  %v1961_v52 = vmul.f32 %v4605_v53, %v4605_v53 }
 0x383   :  { %v4694_v27 = vadd.f32 %v1684_v49, %v1683_v41  ;;  %v1902_v59 = vsel %vm1901_vm4, %v4681_v38, %v1900_v20  ;;  %v1691_v7 = vrot.slane %v1690_v6, 1  ;;  %v2017_v39 = vsel %vm1895_vm1, %v1955_v21, %v1954_v28 }
 0x384   :  { %v1904_v30 = vsel %vm1903_vm5, %v4690_v37, %v1902_v59  ;;  %v2018_v17 = vsel %vm1897_vm2, %v1956_v13, %v2017_v39  ;;  %v1946_v2 = vmul.f32 %v4655_v25, %v4655_v25  ;;  %v1947_v45 = vmul.f32 %v4658_v31, %v4658_v31 }
 0x385   :  { %v1906_v12 = vsel %vm1905_vm6, %v4694_v27, %v1904_v30  ;;  %v4714_v55 = vadd.f32 %v1691_v7, %v1690_v6  ;;  %v2019_v44 = vsel %vm1899_vm3, %v1957_v29, %v2018_v17  ;;  %v1948_v23 = vmul.f32 %v4664_v1, %v4664_v1 }
 0x386   :  { %v1949_v28 = vmul.f32 %v4677_v3, %v4677_v3  ;;  %v2020_v41 = vsel %vm1901_vm4, %v1958_v46, %v2019_v44  ;;  %v1950_v43 = vmul.f32 %v4681_v38, %v4681_v38  ;;  %v1951_v21 = vmul.f32 %v4690_v37, %v4690_v37 }
 0x387   :  { %v1952_v63 = vmul.f32 %v4694_v27, %v4694_v27  ;;  %v1908_v5 = vsel %vm1907_vm7, %v4714_v55, %v1906_v12  ;;  %v2021_v13 = vsel %vm1903_vm5, %v1959_v56, %v2020_v41  ;;  %v1953_v14 = vmul.f32 %v4714_v55, %v4714_v55 }
 0x388   :  { %v2010_v49 = vsel %vm1895_vm1, %v1947_v45, %v1946_v2  ;;  %v1934_v29 = vsel %vm74_vm0, %v1908_v5, 0.0  ;;  %v2022_v46 = vsel %vm1905_vm6, %v1960_v32, %v2021_v13  ;;  %v1584_v20 = vmul.f32 %v4539_v47, %v4455_v33 }
 0x389   :  { %v2011_v6 = vsel %vm1897_vm2, %v1948_v23, %v2010_v49  ;;  %1935 = vadd.xlane.f32.xlu0 %v1934_v29  ;;  %v2023_v59 = vsel %vm1907_vm7, %v1961_v52, %v2022_v46  ;;  %v1626_v56 = vmul.f32 %v4350_v57, %v4486_v60  ;;  %v1627_v30 = vmul.f32 %v4350_v57, %v4560_v36 }
 0x38a   :  { %v2012_v7 = vsel %vm1899_vm3, %v1949_v28, %v2011_v6  ;;  %v2045_v39 = vsel %vm74_vm0, %v2023_v59, 0.0  ;;  %v1628_v12 = vmul.f32 %v4350_v57, %v1584_v20  ;;  %v1752_v17 = vrot.slane %v4394_v16, 2 }
 0x38b   :  { %v2013_v32 = vsel %vm1901_vm4, %v1950_v43, %v2012_v7  ;;  %v1759_v47 = vrot.slane %v4367_v58, 2  ;;  %v1765_v52 = vadd.f32 %v1764_v40, %v4479_v54  ;;  %v1770_v60 = vsel %vm74_vm0, %v4460_v22, 0.0 }
 0x38c   :  { %v2014_v33 = vsel %vm1903_vm5, %v1951_v21, %v2013_v32  ;;  %v1753_v2 = vadd.f32 %v1752_v17, %v4394_v16  ;;  %v1771_v45 = vrot.slane %v1770_v60, 4  ;;  %v1777_v57 = vsel %vm74_vm0, %v4534_v26, 0.0 }
 0x38d   :  { %v2015_v36 = vsel %vm1905_vm6, %v1952_v63, %v2014_v33  ;;  %2046 = vadd.xlane.f32.xlu0 %v2045_v39  ;;  %v1760_v23 = vadd.f32 %v1759_v47, %v4367_v58  ;;  %v1766_v28 = vrot.slane %v1765_v52, 2  ;;  %v1778_v41 = vrot.slane %v1777_v57, 4 }
 0x38e   :  { %v2016_v44 = vsel %vm1907_vm7, %v1953_v14, %v2015_v36  ;;  %v1754_v40 = vrot.slane %v1753_v2, 1  ;;  %v1772_v43 = vadd.f32 %v1771_v45, %v1770_v60  ;;  %v1784_v22 = vsel %vm74_vm0, %v1626_v56, 0.0 }
 0x38f   :  { %v2042_v54 = vsel %vm74_vm0, %v2016_v44, 0.0  ;;  %v1761_v21 = vrot.slane %v1760_v23, 1  ;;  %v1767_v63 = vadd.f32 %v1766_v28, %v1765_v52  ;;  %v1779_v16 = vadd.f32 %v1778_v41, %v1777_v57 }
 0x390   :  { %v1785_v5 = vrot.slane %v1784_v22, 4  ;;  %v4764_v13 = vadd.f32 %v1754_v40, %v1753_v2  ;;  %v1773_v26 = vrot.slane %v1772_v43, 2  ;;  %v1791_v49 = vsel %vm74_vm0, %v1627_v30, 0.0 }
 0x391   :  { %v1798_v14 = vsel %vm74_vm0, %v1628_v12, 0.0  ;;  %2043 = vadd.xlane.f32.xlu0 %v2042_v54  ;;  %v4768_v58 = vadd.f32 %v1761_v21, %v1760_v23  ;;  %v1768_v29 = vrot.slane %v1767_v63, 1  ;;  %v1780_v46 = vrot.slane %v1779_v16, 2 }
 0x392   :  { %v1786_v6 = vadd.f32 %v1785_v5, %v1784_v22  ;;  %v1774_v20 = vadd.f32 %v1773_v26, %v1772_v43  ;;  %v1792_v59 = vrot.slane %v1791_v49, 4  ;;  %v1799_v7 = vrot.slane %v1798_v14, 4 }
 0x393   :  { %v1962_v56 = vmul.f32 %v4764_v13, %v4764_v13  ;;  %v4772_v39 = vadd.f32 %v1768_v29, %v1767_v63  ;;  %v1781_v32 = vadd.f32 %v1780_v46, %v1779_v16  ;;  %v1916_v30 = vsel %vm1895_vm1, %v4768_v58, %v4764_v13 }
 0x394   :  { %v1787_v17 = vrot.slane %v1786_v6, 2  ;;  %v1775_v12 = vrot.slane %v1774_v20, 1  ;;  %v1793_v33 = vadd.f32 %v1792_v59, %v1791_v49  ;;  %v1800_v47 = vadd.f32 %v1799_v7, %v1798_v14 }
 0x395   :  { %v1963_v52 = vmul.f32 %v4768_v58, %v4768_v58  ;;  %v1782_v60 = vrot.slane %v1781_v32, 1  ;;  %v1917_v2 = vsel %vm1897_vm2, %v4772_v39, %v1916_v30  ;;  %v1964_v45 = vmul.f32 %v4772_v39, %v4772_v39 }
 0x396   :  { %v1788_v36 = vadd.f32 %v1787_v17, %v1786_v6  ;;  %v4783_v57 = vadd.f32 %v1775_v12, %v1774_v20  ;;  %v1794_v44 = vrot.slane %v1793_v33, 2  ;;  %v1801_v23 = vrot.slane %v1800_v47, 2 }
 0x397   :  { %v2024_v28 = vsel %vm1895_vm1, %v1963_v52, %v1962_v56  ;;  %v4786_v41 = vadd.f32 %v1782_v60, %v1781_v32  ;;  %v1592_v43 = vmul.f32 %v4675_v11, %v4585_v15  ;;  %v1634_v14 = vmul.f32 %v4573_v10, %v4652_v48 }
 0x398   :  { %v1789_v54 = vrot.slane %v1788_v36, 1  ;;  %v2025_v40 = vsel %vm1897_vm2, %v1964_v45, %v2024_v28  ;;  %v1795_v22 = vadd.f32 %v1794_v44, %v1793_v33  ;;  %v1802_v21 = vadd.f32 %v1801_v23, %v1800_v47 }
 0x399   :  { %v1918_v63 = vsel %vm1899_vm3, %v4783_v57, %v1917_v2  ;;  %v1965_v16 = vmul.f32 %v4783_v57, %v4783_v57  ;;  %v1966_v49 = vmul.f32 %v4786_v41, %v4786_v41  ;;  %v1635_v46 = vmul.f32 %v4573_v10, %v4688_v4 }
 0x39a   :  { %v4795_v5 = vadd.f32 %v1789_v54, %v1788_v36  ;;  %v1919_v26 = vsel %vm1901_vm4, %v4786_v41, %v1918_v63  ;;  %v1796_v15 = vrot.slane %v1795_v22, 1  ;;  %v1803_v11 = vrot.slane %v1802_v21, 1 }
 0x39b   :  { %v2026_v29 = vsel %vm1899_vm3, %v1965_v16, %v2025_v40  ;;  %v1636_v7 = vmul.f32 %v4573_v10, %v1592_v43  ;;  %v1808_v32 = vrot.slane %v4625_v0, 2  ;;  %v1815_v17 = vrot.slane %v4587_v19, 2 }
 0x39c   :  { %v1920_v6 = vsel %vm1903_vm5, %v4795_v5, %v1919_v26  ;;  %v1967_v20 = vmul.f32 %v4795_v5, %v4795_v5  ;;  %v2027_v59 = vsel %vm1901_vm4, %v1966_v49, %v2026_v29  ;;  %v4812_v56 = vadd.f32 %v1796_v15, %v1795_v22 }
 0x39d   :  { %v4814_v48 = vadd.f32 %v1803_v11, %v1802_v21  ;;  %v1821_v30 = vadd.f32 %v1820_v34, %v4631_v18  ;;  %v1826_v12 = vsel %vm74_vm0, %v4613_v42, 0.0  ;;  %v1833_v10 = vsel %vm74_vm0, %v4662_v51, 0.0 }
 0x39e   :  { %v2028_v4 = vsel %vm1903_vm5, %v1967_v20, %v2027_v59  ;;  %v1921_v33 = vsel %vm1905_vm6, %v4812_v56, %v1920_v6  ;;  %v1968_v47 = vmul.f32 %v4812_v56, %v4812_v56  ;;  %v1809_v60 = vadd.f32 %v1808_v32, %v4625_v0 }
 0x39f   :  { %v1969_v52 = vmul.f32 %v4814_v48, %v4814_v48  ;;  %v1922_v18 = vsel %vm1907_vm7, %v4814_v48, %v1921_v33  ;;  %v1816_v34 = vadd.f32 %v1815_v17, %v4587_v19  ;;  %v1822_v42 = vrot.slane %v1821_v30, 2 }
 0x3a0   :  { %v1827_v36 = vrot.slane %v1826_v12, 4  ;;  %v1940_v51 = vsel %vm74_vm0, %v1922_v18, 0.0  ;;  %v2029_v2 = vsel %vm1905_vm6, %v1968_v47, %v2028_v4  ;;  %v1810_v45 = vrot.slane %v1809_v60, 1 }
 0x3a1   :  { %v1834_v44 = vrot.slane %v1833_v10, 4  ;;  %1941 = vadd.xlane.f32.xlu0 %v1940_v51  ;;  %v2030_v23 = vsel %vm1907_vm7, %v1969_v52, %v2029_v2  ;;  %v1817_v28 = vrot.slane %v1816_v34, 1  ;;  %v1823_v54 = vadd.f32 %v1822_v42, %v1821_v30 }
 0x3a2   :  { %v1828_v40 = vadd.f32 %v1827_v36, %v1826_v12  ;;  %v4839_v0 = vadd.f32 %v1810_v45, %v1809_v60  ;;  %v1840_v22 = vsel %vm74_vm0, %v1634_v14, 0.0  ;;  %v2048_v19 = vsel %vm74_vm0, %v2030_v23, 0.0 }
 0x3a3   :  { %v1835_v43 = vadd.f32 %v1834_v44, %v1833_v10  ;;  %v1824_v21 = vrot.slane %v1823_v54, 1  ;;  %v1841_v16 = vrot.slane %v1840_v22, 4  ;;  %v4843_v26 = vadd.f32 %v1817_v28, %v1816_v34 }
 0x3a4   :  { %v1829_v63 = vrot.slane %v1828_v40, 2  ;;  %v1847_v15 = vsel %vm74_vm0, %v1635_v46, 0.0  ;;  %v1854_v11 = vsel %vm74_vm0, %v1636_v7, 0.0  ;;  %v1970_v17 = vmul.f32 %v4839_v0, %v4839_v0 }
 0x3a5   :  { %v1836_v49 = vrot.slane %v1835_v43, 2  ;;  %2049 = vadd.xlane.f32.xlu0 %v2048_v19  ;;  %v4847_v29 = vadd.f32 %v1824_v21, %v1823_v54  ;;  %v1842_v20 = vadd.f32 %v1841_v16, %v1840_v22  ;;  %v1848_v59 = vrot.slane %v1847_v15, 4 }
 0x3a6   :  { %v1830_v6 = vadd.f32 %v1829_v63, %v1828_v40  ;;  %v1855_v14 = vrot.slane %v1854_v11, 4  ;;  %v1923_v46 = vsel %vm1895_vm1, %v4843_v26, %v4839_v0  ;;  %v1971_v33 = vmul.f32 %v4843_v26, %v4843_v26 }
 0x3a7   :  { %v1837_v32 = vadd.f32 %v1836_v49, %v1835_v43  ;;  %v1843_v30 = vrot.slane %v1842_v20, 2  ;;  %v1849_v12 = vadd.f32 %v1848_v59, %v1847_v15  ;;  %v1972_v47 = vmul.f32 %v4847_v29, %v4847_v29 }
 0x3a8   :  { %v1831_v4 = vrot.slane %v1830_v6, 1  ;;  %v1856_v7 = vadd.f32 %v1855_v14, %v1854_v11  ;;  %v1924_v34 = vsel %vm1897_vm2, %v4847_v29, %v1923_v46  ;;  %v2031_v51 = vsel %vm1895_vm1, %v1971_v33, %v1970_v17 }
 0x3a9   :  { %v1838_v10 = vrot.slane %v1837_v32, 1  ;;  %v1844_v60 = vadd.f32 %v1843_v30, %v1842_v20  ;;  %v1850_v18 = vrot.slane %v1849_v12, 2  ;;  %v2032_v44 = vsel %vm1897_vm2, %v1972_v47, %v2031_v51 }
 0x3aa   :  { %v4858_v52 = vadd.f32 %v1831_v4, %v1830_v6  ;;  %v1857_v36 = vrot.slane %v1856_v7, 2 }
 0x3ab   :  { %v4862_v42 = vadd.f32 %v1838_v10, %v1837_v32  ;;  %v1845_v2 = vrot.slane %v1844_v60, 1  ;;  %v1851_v45 = vadd.f32 %v1850_v18, %v1849_v12 }
 0x3ac   :  { %v1858_v23 = vadd.f32 %v1857_v36, %v1856_v7  ;;  %v1925_v28 = vsel %vm1899_vm3, %v4858_v52, %v1924_v34  ;;  %v1973_v54 = vmul.f32 %v4858_v52, %v4858_v52 }
 0x3ad   :  { %v1974_v40 = vmul.f32 %v4862_v42, %v4862_v42  ;;  %v4872_v43 = vadd.f32 %v1845_v2, %v1844_v60  ;;  %v1852_v22 = vrot.slane %v1851_v45, 1  ;;  %v1926_v19 = vsel %vm1901_vm4, %v4862_v42, %v1925_v28  ;;  %v4906_v2 = vld [vmem:[%s5719_s30 + $0x8] sm:$0xff] }
 0x3ae   :  { %v1859_v21 = vrot.slane %v1858_v23, 1  ;;  %v2033_v63 = vsel %vm1899_vm3, %v1973_v54, %v2032_v44 }
 0x3af   :  { %v4877_v16 = vadd.f32 %v1852_v22, %v1851_v45  ;;  %v2034_v49 = vsel %vm1901_vm4, %v1974_v40, %v2033_v63  ;;  %v1927_v11 = vsel %vm1903_vm5, %v4872_v43, %v1926_v19  ;;  %v1975_v6 = vmul.f32 %v4872_v43, %v4872_v43 }
 0x3b0   :  { %v4880_v15 = vadd.f32 %v1859_v21, %v1858_v23  ;;  %v2357_v45 = vrot.slane %v4906_v2, 1  ;;  %v4920_v21 = vld [vmem:[%s5719_s30] sm:$0xff] }
 0x3b1   :  { %v1928_v20 = vsel %vm1905_vm6, %v4877_v16, %v1927_v11  ;;  %v1976_v59 = vmul.f32 %v4877_v16, %v4877_v16  ;;  %v2035_v17 = vsel %vm1903_vm5, %v1975_v6, %v2034_v49 }
 0x3b2   :  { %v1929_v32 = vsel %vm1907_vm7, %v4880_v15, %v1928_v20  ;;  %v1977_v14 = vmul.f32 %v4880_v15, %v4880_v15 }
 0x3b3   :  { %v1943_v4 = vsel %vm74_vm0, %v1929_v32, 0.0  ;;  %v2036_v30 = vsel %vm1905_vm6, %v1976_v59, %v2035_v17  ;;  %v4932_v17 = vld [vmem:[%s5719_s30 + $0x10] sm:$0xff] }
 0x3b4   :  { %1944 = vadd.xlane.f32.xlu1 %v1943_v4  ;;  %v2037_v12 = vsel %vm1907_vm7, %v1977_v14, %v2036_v30 }
 0x3b5   :  { %v2051_v46 = vsel %vm74_vm0, %v2037_v12, 0.0 }
 0x3b8   :  { %2052 = vadd.xlane.f32.xlu1 %v2051_v46 }
 0x3fd   :  { %v1939_v10 = vpop.xlane.xlu1 %1938 }
 0x3fe   :  { %v4899_v33 = vmul.f32 0.03125, %v1939_v10 }
 0x400   :  { %v2063_v60 = vmul.f32 %v4899_v33, %v4899_v33  ;;  %v2084_v12 = vrot.slane %v4899_v33, 4  ;;  %v2085_v4 = vrot.slane %v4899_v33, 5  ;;  %v2086_v14 = vrot.slane %v4899_v33, 6 }
 0x401   :  { %v2142_v46 = vsub.f32 %v4543_v62, %v4899_v33 }
 0x402   :  { %v2146_v62 = vsub.f32 %v4581_v61, %v2084_v12  ;;  %v2148_v19 = vsub.f32 %v4598_v8, %v2086_v14 }
 0x412   :  { %v1936_v7 = vpop.xlane.xlu0 %1935 }
 0x413   :  { %v4910_v23 = vmul.f32 0.03125, %v1936_v7  ;;  %v2081_v7 = vrot.slane %v4899_v33, 1 }
 0x415   :  { %v2062_v30 = vmul.f32 %v4910_v23, %v4910_v23  ;;  %v2074_v10 = vrot.slane %v4910_v23, 1  ;;  %v2076_v59 = vrot.slane %v4910_v23, 3  ;;  %v2077_v20 = vrot.slane %v4910_v23, 4 }
 0x416   :  { %v2047_v47 = vpop.xlane.xlu0 %2046  ;;  %v2078_v6 = vrot.slane %v4910_v23, 5  ;;  %v2143_v11 = vsub.f32 %v4547_v50, %v2081_v7  ;;  %v2080_v22 = vrot.slane %v4910_v23, 7 }
 0x417   :  { %v2059_v18 = vmul.f32 0.03125, %v2047_v47  ;;  %v2082_v47 = vrot.slane %v4899_v33, 2  ;;  %v4980_v50 = vsub.f32 %v4658_v31, %v2074_v10  ;;  %v4989_v8 = vsub.f32 %v4681_v38, %v2077_v20 }
 0x419   :  { %v2067_v34 = vsub.f32 %v2059_v18, %v2063_v60  ;;  %v4946_v18 = vld [vmem:[%s5719_s30 + $0x18] sm:$0xff]  ;;  %v2083_v60 = vrot.slane %v4899_v33, 3 }
 0x41a   :  { %v2044_v51 = vpop.xlane.xlu0 %2043 }
 0x41b   :  { %v2167_v36 = vadd.f32 1e-05, %v2067_v34  ;;  %v2058_v49 = vmul.f32 0.03125, %v2044_v51  ;;  %v2075_v51 = vrot.slane %v4910_v23, 2  ;;  %v2145_v63 = vsub.f32 %v4578_v9, %v2083_v60 }
 0x41c   :  { %v2079_v34 = vrot.slane %v4910_v23, 6 }
 0x41d   :  { %3795 = vrsqrt.f32 %v2167_v36  ;;  %v2066_v36 = vsub.f32 %v2058_v49, %v2062_v30  ;;  %v2087_v49 = vrot.slane %v4899_v33, 7  ;;  %v2144_v30 = vsub.f32 %v4562_v24, %v2082_v47  ;;  %v5006_v47 = vld [vmem:[%s5703_s6] ss:$0 sm:$0xff] }
 0x41e   :  { %v2147_v33 = vsub.f32 %v4595_v35, %v2085_v4  ;;  %v4983_v24 = vsub.f32 %v4664_v1, %v2075_v51  ;;  %v4986_v35 = vsub.f32 %v4677_v3, %v2076_v59  ;;  %v4999_v1 = vld [vmem:[%s5702_s5] ss:$0 sm:$0xff] }
 0x41f   :  { %v2166_v32 = vadd.f32 1e-05, %v2066_v36  ;;  %v2149_v36 = vsub.f32 %v4605_v53, %v2087_v49  ;;  %v4992_v53 = vsub.f32 %v4690_v37, %v2078_v6 }
 0x421   :  { %3797 = vrsqrt.f32 %v2166_v32 }
 0x42a   :  { %v3796_v9 = vpop.eup %3795  ;;  %v1942_v61 = vpop.xlane.xlu0 %1941 }
 0x42b   :  { %v4994_v14 = vmul.f32 0.03125, %v1942_v61  ;;  %v2185_v4 = vrot.slane %v3796_v9, 1  ;;  %v2186_v31 = vrot.slane %v3796_v9, 2  ;;  %v2187_v12 = vrot.slane %v3796_v9, 3 }
 0x42c   :  { %v2188_v32 = vrot.slane %v3796_v9, 4  ;;  %v2189_v10 = vrot.slane %v3796_v9, 5  ;;  %v2190_v3 = vrot.slane %v3796_v9, 6  ;;  %v2191_v59 = vrot.slane %v3796_v9, 7 }
 0x42d   :  { %v2064_v38 = vmul.f32 %v4994_v14, %v4994_v14  ;;  %v2246_v20 = vmul.f32 %v3796_v9, %v2142_v46  ;;  %v2247_v37 = vmul.f32 %v2185_v4, %v2143_v11  ;;  %v2248_v6 = vmul.f32 %v2186_v31, %v2144_v30 }
 0x42e   :  { %v2050_v7 = vpop.xlane.xlu0 %2049  ;;  %v2249_v60 = vmul.f32 %v2187_v12, %v2145_v63  ;;  %v2250_v51 = vmul.f32 %v2188_v32, %v2146_v62  ;;  %v2251_v49 = vmul.f32 %v2189_v10, %v2147_v33  ;;  %v2252_v61 = vmul.f32 %v2190_v3, %v2148_v19 }
 0x42f   :  { %v2060_v40 = vmul.f32 0.03125, %v2050_v7  ;;  %v2253_v54 = vmul.f32 %v2191_v59, %v2149_v36  ;;  %v2284_v28 = vmul.f32 %v4999_v1, %v2246_v20  ;;  %v2285_v44 = vmul.f32 %v4999_v1, %v2247_v37 }
 0x430   :  { %v2286_v46 = vmul.f32 %v4999_v1, %v2248_v6  ;;  %v2287_v11 = vmul.f32 %v4999_v1, %v2249_v60  ;;  %v2288_v30 = vmul.f32 %v4999_v1, %v2250_v51  ;;  %v2289_v9 = vmul.f32 %v4999_v1, %v2251_v49 }
 0x431   :  { %v2068_v4 = vsub.f32 %v2060_v40, %v2064_v38  ;;  %v2290_v63 = vmul.f32 %v4999_v1, %v2252_v61  ;;  %v2291_v62 = vmul.f32 %v4999_v1, %v2253_v54  ;;  %v2322_v19 = vadd.f32 %v5006_v47, %v2284_v28 }
 0x432   :  { %v2323_v33 = vadd.f32 %v5006_v47, %v2285_v44  ;;  %v2324_v36 = vadd.f32 %v5006_v47, %v2286_v46  ;;  %v2325_v31 = vadd.f32 %v5006_v47, %v2287_v11  ;;  %v2326_v12 = vadd.f32 %v5006_v47, %v2288_v30  ;;  %v3798_v30 = vpop.eup %3797 }
 0x433   :  { %v2327_v32 = vadd.f32 %v5006_v47, %v2289_v9  ;;  %v2328_v10 = vadd.f32 %v5006_v47, %v2290_v63  ;;  %v2329_v40 = vadd.f32 %v5006_v47, %v2291_v62  ;;  %v5025_v3 = vsub.f32 %v4694_v27, %v2079_v34 }
 0x434   :  { %v5028_v54 = vadd.f32 %v4906_v2, %v2322_v19  ;;  %v5032_v44 = vadd.f32 %v2357_v45, %v2323_v33  ;;  %v5720_v28 = vrot.slane %v4906_v2, 2  ;;  %v5721_v38 = vrot.slane %v4906_v2, 3 }
 0x435   :  { %v5722_v37 = vrot.slane %v4906_v2, 4  ;;  %v5724_v27 = vrot.slane %v4906_v2, 5  ;;  %v5726_v7 = vrot.slane %v4906_v2, 6  ;;  %v5055_v60 = vsub.f32 %v4714_v55, %v2080_v22 }
 0x436   :  { %v5036_v59 = vadd.f32 %v5720_v28, %v2324_v36  ;;  %v5040_v20 = vadd.f32 %v5721_v38, %v2325_v31  ;;  %v5057_v51 = vadd.f32 1e-05, %v2068_v4  ;;  %v5728_v49 = vrot.slane %v4906_v2, 7 }
 0x437   :  { %v5044_v6 = vadd.f32 %v5722_v37, %v2326_v12  ;;  %v5048_v34 = vadd.f32 %v5724_v27, %v2327_v32  ;;  %v5052_v45 = vadd.f32 %v5726_v7, %v2328_v10  ;;  %v2490_v46 = vrot.slane %v5032_v44, 7 }
 0x438   :  { %v5061_v61 = vadd.f32 %v5728_v49, %v2329_v40  ;;  %v2492_v11 = vrot.slane %v5036_v59, 6  ;;  %v2494_v9 = vrot.slane %v5040_v20, 5  ;;  %v2556_v2 = vmul.f32 %v5028_v54, %v5028_v54 }
 0x439   :  { %5723 = vst [vmem:[#allocation8_spill] sm:$0xff] %v5044_v6  ;;  %5725 = vst [vmem:[#allocation9_spill] sm:$0xff] %v5048_v34  ;;  %v2496_v63 = vrot.slane %v5044_v6, 4  ;;  %v2498_v62 = vrot.slane %v5048_v34, 3  ;;  %v2500_v55 = vrot.slane %v5052_v45, 2  ;;  %v2491_v22 = vsel %vm1895_vm1, %v2490_v46, %v5028_v54 }
 0x43a   :  { %5727 = vst [vmem:[#allocation10_spill] sm:$0xff] %v5052_v45  ;;  %v2557_v4 = vmul.f32 %v5032_v44, %v5032_v44  ;;  %v2558_v19 = vmul.f32 %v5036_v59, %v5036_v59  ;;  %v2493_v33 = vsel %vm1897_vm2, %v2492_v11, %v2491_v22  ;;  %v2559_v36 = vmul.f32 %v5040_v20, %v5040_v20 }
 0x43b   :  { %v2560_v31 = vmul.f32 %v5044_v6, %v5044_v6  ;;  %v2561_v12 = vmul.f32 %v5048_v34, %v5048_v34  ;;  %v2495_v32 = vsel %vm1899_vm3, %v2494_v9, %v2493_v33  ;;  %v2502_v10 = vrot.slane %v5061_v61, 1 }
 0x43c   :  { %v2562_v40 = vmul.f32 %v5052_v45, %v5052_v45  ;;  %v2626_v28 = vrot.slane %v2557_v4, 7  ;;  %v2497_v38 = vsel %vm1901_vm4, %v2496_v63, %v2495_v32  ;;  %v2563_v37 = vmul.f32 %v5061_v61, %v5061_v61 }
 0x43d   :  { %v2628_v27 = vrot.slane %v2558_v19, 6  ;;  %v2630_v7 = vrot.slane %v2559_v36, 5  ;;  %v2499_v49 = vsel %vm1903_vm5, %v2498_v62, %v2497_v38  ;;  %v2632_v11 = vrot.slane %v2560_v31, 4  ;;  %v1945_v9 = vpop.xlane.xlu1 %1944 }
 0x43e   :  { %v2627_v46 = vsel %vm1895_vm1, %v2626_v28, %v2556_v2  ;;  %v2634_v22 = vrot.slane %v2561_v12, 3  ;;  %v2501_v33 = vsel %vm1905_vm6, %v2500_v55, %v2499_v49  ;;  %v2636_v45 = vrot.slane %v2562_v40, 2 }
 0x43f   :  { %v2629_v34 = vsel %vm1897_vm2, %v2628_v27, %v2627_v46  ;;  %v2178_v4 = vrot.slane %v3798_v30, 1  ;;  %v5095_v6 = vmul.f32 0.03125, %v1945_v9  ;;  %v5098_v63 = vsel %vm1907_vm7, %v2502_v10, %v2501_v33 }
 0x440   :  { %v2631_v19 = vsel %vm1899_vm3, %v2630_v7, %v2629_v34  ;;  %v2179_v36 = vrot.slane %v3798_v30, 2  ;;  %v2539_v62 = vsel %vm74_vm0, %v5098_v63, 0.0  ;;  %v2638_v31 = vrot.slane %v2563_v37, 1 }
 0x441   :  { %v2633_v2 = vsel %vm1901_vm4, %v2632_v11, %v2631_v19  ;;  %v2180_v12 = vrot.slane %v3798_v30, 3  ;;  %v2065_v55 = vmul.f32 %v5095_v6, %v5095_v6  ;;  %2540 = vadd.xlane.f32.xlu1 %v2539_v62  ;;  %v2181_v40 = vrot.slane %v3798_v30, 4  ;;  %v2053_v10 = vpop.xlane.xlu1 %2052 }
 0x442   :  { %v2635_v32 = vsel %vm1903_vm5, %v2634_v22, %v2633_v2  ;;  %v2182_v28 = vrot.slane %v3798_v30, 5  ;;  %v2183_v34 = vrot.slane %v3798_v30, 6  ;;  %v2184_v27 = vrot.slane %v3798_v30, 7 }
 0x443   :  { %v2637_v38 = vsel %vm1905_vm6, %v2636_v45, %v2635_v32  ;;  %v5729_v7 = vsub.f32 %v4655_v25, %v4910_v23  ;;  %v2061_v46 = vmul.f32 0.03125, %v2053_v10  ;;  %v2239_v11 = vmul.f32 %v2178_v4, %v4980_v50 }
 0x444   :  { %v2639_v37 = vsel %vm1907_vm7, %v2638_v31, %v2637_v38  ;;  %v2240_v9 = vmul.f32 %v2179_v36, %v4983_v24  ;;  %v2241_v33 = vmul.f32 %v2180_v12, %v4986_v35  ;;  %v2242_v19 = vmul.f32 %v2181_v40, %v4989_v8 }
 0x445   :  { %v2238_v49 = vmul.f32 %v3798_v30, %v5729_v7  ;;  %v2675_v22 = vsel %vm74_vm0, %v2639_v37, 0.0  ;;  %v2243_v45 = vmul.f32 %v2182_v28, %v4992_v53  ;;  %v2069_v62 = vsub.f32 %v2061_v46, %v2065_v55 }
 0x446   :  { %2676 = vadd.xlane.f32.xlu1 %v2675_v22  ;;  %v2244_v25 = vmul.f32 %v2183_v34, %v5025_v3  ;;  %v2245_v23 = vmul.f32 %v2184_v27, %v5055_v60  ;;  %v2277_v50 = vmul.f32 %v4999_v1, %v2239_v11  ;;  %v2278_v24 = vmul.f32 %v4999_v1, %v2240_v9 }
 0x447   :  { %v2276_v30 = vmul.f32 %v4999_v1, %v2238_v49  ;;  %v2279_v4 = vmul.f32 %v4999_v1, %v2241_v33  ;;  %v2280_v35 = vmul.f32 %v4999_v1, %v2242_v19  ;;  %v2169_v36 = vadd.f32 1e-05, %v2069_v62 }
 0x448   :  { %v2281_v8 = vmul.f32 %v4999_v1, %v2243_v45  ;;  %v2282_v53 = vmul.f32 %v4999_v1, %v2244_v25  ;;  %v2283_v2 = vmul.f32 %v4999_v1, %v2245_v23  ;;  %v2315_v60 = vadd.f32 %v5006_v47, %v2277_v50 }
 0x449   :  { %v2314_v3 = vadd.f32 %v5006_v47, %v2276_v30  ;;  %v2316_v31 = vadd.f32 %v5006_v47, %v2278_v24  ;;  %v2317_v12 = vadd.f32 %v5006_v47, %v2279_v4  ;;  %3799 = vrsqrt.f32 %v5057_v51 }
 0x44a   :  { %v2318_v55 = vadd.f32 %v5006_v47, %v2280_v35  ;;  %v2319_v32 = vadd.f32 %v5006_v47, %v2281_v8  ;;  %v2320_v40 = vadd.f32 %v5006_v47, %v2282_v53  ;;  %v2321_v28 = vadd.f32 %v5006_v47, %v2283_v2 }
 0x44b   :  { %v5138_v10 = vadd.f32 %v4920_v21, %v2314_v3  ;;  %v5730_v38 = vrot.slane %v4920_v21, 1  ;;  %v5731_v27 = vrot.slane %v4920_v21, 2  ;;  %v5732_v51 = vrot.slane %v4920_v21, 3 }
 0x44c   :  { %v5733_v46 = vrot.slane %v4920_v21, 4  ;;  %v5734_v11 = vrot.slane %v4920_v21, 5  ;;  %v5735_v22 = vrot.slane %v4920_v21, 6  ;;  %3801 = vrsqrt.f32 %v2169_v36 }
 0x44d   :  { %v5142_v34 = vadd.f32 %v5730_v38, %v2315_v60  ;;  %v5146_v7 = vadd.f32 %v5731_v27, %v2316_v31  ;;  %v5150_v49 = vadd.f32 %v5732_v51, %v2317_v12  ;;  %v5736_v19 = vrot.slane %v4920_v21, 7 }
 0x44e   :  { %v5154_v37 = vadd.f32 %v5733_v46, %v2318_v55  ;;  %v5158_v9 = vadd.f32 %v5734_v11, %v2319_v32  ;;  %v5162_v33 = vadd.f32 %v5735_v22, %v2320_v40  ;;  %v2548_v24 = vmul.f32 %v5138_v10, %v5138_v10 }
 0x44f   :  { %v5166_v45 = vadd.f32 %v5736_v19, %v2321_v28  ;;  %v2476_v62 = vrot.slane %v5142_v34, 7  ;;  %v2478_v25 = vrot.slane %v5146_v7, 6  ;;  %v2480_v23 = vrot.slane %v5150_v49, 5 }
 0x450   :  { %v2482_v30 = vrot.slane %v5154_v37, 4  ;;  %v2484_v50 = vrot.slane %v5158_v9, 3  ;;  %v2486_v21 = vrot.slane %v5162_v33, 2  ;;  %v2549_v35 = vmul.f32 %v5142_v34, %v5142_v34 }
 0x451   :  { %v2477_v4 = vsel %vm1895_vm1, %v2476_v62, %v5138_v10  ;;  %v2550_v36 = vmul.f32 %v5146_v7, %v5146_v7  ;;  %v2551_v53 = vmul.f32 %v5150_v49, %v5150_v49  ;;  %v2552_v2 = vmul.f32 %v5154_v37, %v5154_v37 }
 0x452   :  { %v2479_v8 = vsel %vm1897_vm2, %v2478_v25, %v2477_v4  ;;  %v2553_v3 = vmul.f32 %v5158_v9, %v5158_v9  ;;  %v2488_v31 = vrot.slane %v5166_v45, 1  ;;  %v2554_v12 = vmul.f32 %v5162_v33, %v5162_v33 }
 0x453   :  { %v2481_v60 = vsel %vm1899_vm3, %v2480_v23, %v2479_v8  ;;  %v2612_v55 = vrot.slane %v2549_v35, 7  ;;  %v2555_v40 = vmul.f32 %v5166_v45, %v5166_v45  ;;  %v2614_v28 = vrot.slane %v2550_v36, 6 }
 0x454   :  { %v2483_v32 = vsel %vm1901_vm4, %v2482_v30, %v2481_v60  ;;  %v2616_v38 = vrot.slane %v2551_v53, 5  ;;  %v2618_v46 = vrot.slane %v2552_v2, 4  ;;  %v2620_v11 = vrot.slane %v2553_v3, 3 }
 0x455   :  { %v2485_v27 = vsel %vm1903_vm5, %v2484_v50, %v2483_v32  ;;  %v2613_v51 = vsel %vm1895_vm1, %v2612_v55, %v2548_v24  ;;  %v2622_v62 = vrot.slane %v2554_v12, 2  ;;  %v2088_v25 = vrot.slane %v4994_v14, 1 }
 0x456   :  { %v2487_v22 = vsel %vm1905_vm6, %v2486_v21, %v2485_v27  ;;  %v2615_v19 = vsel %vm1897_vm2, %v2614_v28, %v2613_v51  ;;  %v2089_v4 = vrot.slane %v4994_v14, 2  ;;  %v2090_v50 = vrot.slane %v4994_v14, 3  ;;  %v3800_v8 = vpop.eup %3799 }
 0x457   :  { %v5202_v23 = vsel %vm1907_vm7, %v2488_v31, %v2487_v22  ;;  %v2617_v30 = vsel %vm1899_vm3, %v2616_v38, %v2615_v19  ;;  %v2624_v21 = vrot.slane %v2555_v40, 1  ;;  %v2091_v36 = vrot.slane %v4994_v14, 4 }
 0x458   :  { %v2536_v24 = vsel %vm74_vm0, %v5202_v23, 0.0  ;;  %v2619_v35 = vsel %vm1901_vm4, %v2618_v46, %v2617_v30  ;;  %v2092_v2 = vrot.slane %v4994_v14, 5  ;;  %v2093_v3 = vrot.slane %v4994_v14, 6 }
 0x459   :  { %2537 = vadd.xlane.f32.xlu0 %v2536_v24  ;;  %v2621_v53 = vsel %vm1903_vm5, %v2620_v11, %v2619_v35  ;;  %v2094_v60 = vrot.slane %v4994_v14, 7  ;;  %v2150_v12 = vsub.f32 %v4764_v13, %v4994_v14  ;;  %v2151_v55 = vsub.f32 %v4768_v58, %v2088_v25  ;;  %v5224_v51 = vpop.eup %3801 }
 0x45a   :  { %v2623_v31 = vsel %vm1905_vm6, %v2622_v62, %v2621_v53  ;;  %v2152_v32 = vsub.f32 %v4772_v39, %v2089_v4  ;;  %v2153_v28 = vsub.f32 %v4783_v57, %v2090_v50  ;;  %v2154_v38 = vsub.f32 %v4786_v41, %v2091_v36 }
 0x45b   :  { %v2625_v40 = vsel %vm1907_vm7, %v2624_v21, %v2623_v31  ;;  %v2155_v27 = vsub.f32 %v4795_v5, %v2092_v2  ;;  %v2156_v11 = vsub.f32 %v4812_v56, %v2093_v3  ;;  %v2157_v13 = vsub.f32 %v4814_v48, %v2094_v60 }
 0x45c   :  { %v2672_v46 = vsel %vm74_vm0, %v2625_v40, 0.0  ;;  %v2192_v14 = vrot.slane %v3800_v8, 1  ;;  %v2193_v58 = vrot.slane %v3800_v8, 2  ;;  %v2194_v39 = vrot.slane %v3800_v8, 3 }
 0x45d   :  { %2673 = vadd.xlane.f32.xlu0 %v2672_v46  ;;  %v2195_v22 = vrot.slane %v3800_v8, 4  ;;  %v2196_v19 = vrot.slane %v3800_v8, 5  ;;  %v2197_v62 = vrot.slane %v3800_v8, 6  ;;  %v2198_v57 = vrot.slane %v3800_v8, 7 }
 0x45e   :  { %v2254_v25 = vmul.f32 %v3800_v8, %v2150_v12  ;;  %v2255_v41 = vmul.f32 %v2192_v14, %v2151_v55  ;;  %v2256_v30 = vmul.f32 %v2193_v58, %v2152_v32  ;;  %v2257_v5 = vmul.f32 %v2194_v39, %v2153_v28 }
 0x45f   :  { %v2258_v4 = vmul.f32 %v2195_v22, %v2154_v38  ;;  %v2259_v50 = vmul.f32 %v2196_v19, %v2155_v27  ;;  %v2260_v24 = vmul.f32 %v2197_v62, %v2156_v11  ;;  %v2261_v35 = vmul.f32 %v2198_v57, %v2157_v13 }
 0x460   :  { %v2292_v56 = vmul.f32 %v4999_v1, %v2254_v25  ;;  %v2293_v48 = vmul.f32 %v4999_v1, %v2255_v41  ;;  %v2294_v21 = vmul.f32 %v4999_v1, %v2256_v30  ;;  %v2295_v36 = vmul.f32 %v4999_v1, %v2257_v5 }
 0x461   :  { %v2296_v53 = vmul.f32 %v4999_v1, %v2258_v4  ;;  %v2297_v2 = vmul.f32 %v4999_v1, %v2259_v50  ;;  %v2298_v8 = vmul.f32 %v4999_v1, %v2260_v24  ;;  %v2299_v3 = vmul.f32 %v4999_v1, %v2261_v35 }
 0x462   :  { %v2330_v60 = vadd.f32 %v5006_v47, %v2292_v56  ;;  %v2331_v31 = vadd.f32 %v5006_v47, %v2293_v48  ;;  %v2332_v12 = vadd.f32 %v5006_v47, %v2294_v21  ;;  %v2333_v55 = vadd.f32 %v5006_v47, %v2295_v36 }
 0x463   :  { %v2334_v32 = vadd.f32 %v5006_v47, %v2296_v53  ;;  %v2335_v40 = vadd.f32 %v5006_v47, %v2297_v2  ;;  %v2336_v28 = vadd.f32 %v5006_v47, %v2298_v8  ;;  %v2337_v38 = vadd.f32 %v5006_v47, %v2299_v3 }
 0x464   :  { %v5246_v27 = vadd.f32 %v4932_v17, %v2330_v60  ;;  %v5737_v46 = vrot.slane %v4932_v17, 1  ;;  %v5738_v13 = vrot.slane %v4932_v17, 2  ;;  %v5739_v58 = vrot.slane %v4932_v17, 3 }
 0x465   :  { %v5740_v22 = vrot.slane %v4932_v17, 4  ;;  %v5741_v62 = vrot.slane %v4932_v17, 5  ;;  %v5742_v25 = vrot.slane %v4932_v17, 6  ;;  %v5743_v30 = vrot.slane %v4932_v17, 7 }
 0x466   :  { %v5250_v11 = vadd.f32 %v5737_v46, %v2331_v31  ;;  %v5254_v14 = vadd.f32 %v5738_v13, %v2332_v12  ;;  %v5258_v39 = vadd.f32 %v5739_v58, %v2333_v55  ;;  %v2377_v50 = vrot.slane %v4946_v18, 7 }
 0x467   :  { %v5262_v19 = vadd.f32 %v5740_v22, %v2334_v32  ;;  %v5266_v57 = vadd.f32 %v5741_v62, %v2335_v40  ;;  %v5270_v41 = vadd.f32 %v5742_v25, %v2336_v28  ;;  %v5274_v5 = vadd.f32 %v5743_v30, %v2337_v38 }
 0x468   :  { %v2504_v4 = vrot.slane %v5250_v11, 7  ;;  %v2506_v24 = vrot.slane %v5254_v14, 6  ;;  %v2508_v35 = vrot.slane %v5258_v39, 5  ;;  %v2564_v48 = vmul.f32 %v5246_v27, %v5246_v27 }
 0x469   :  { %v2510_v56 = vrot.slane %v5262_v19, 4  ;;  %v2512_v17 = vrot.slane %v5266_v57, 3  ;;  %v2514_v36 = vrot.slane %v5270_v41, 2  ;;  %v2565_v53 = vmul.f32 %v5250_v11, %v5250_v11 }
 0x46a   :  { %v2505_v21 = vsel %vm1895_vm1, %v2504_v4, %v5246_v27  ;;  %v2566_v8 = vmul.f32 %v5254_v14, %v5254_v14  ;;  %v2567_v3 = vmul.f32 %v5258_v39, %v5258_v39  ;;  %v2568_v60 = vmul.f32 %v5262_v19, %v5262_v19 }
 0x46b   :  { %v2507_v2 = vsel %vm1897_vm2, %v2506_v24, %v2505_v21  ;;  %v2516_v12 = vrot.slane %v5274_v5, 1  ;;  %v2569_v55 = vmul.f32 %v5266_v57, %v5266_v57  ;;  %v2570_v32 = vmul.f32 %v5270_v41, %v5270_v41 }
 0x46c   :  { %v2509_v31 = vsel %vm1899_vm3, %v2508_v35, %v2507_v2  ;;  %v2571_v28 = vmul.f32 %v5274_v5, %v5274_v5  ;;  %v2640_v38 = vrot.slane %v2565_v53, 7  ;;  %v2642_v46 = vrot.slane %v2566_v8, 6 }
 0x46d   :  { %v2511_v40 = vsel %vm1901_vm4, %v2510_v56, %v2509_v31  ;;  %v2644_v58 = vrot.slane %v2567_v3, 5  ;;  %v2646_v22 = vrot.slane %v2568_v60, 4  ;;  %v2648_v62 = vrot.slane %v2569_v55, 3 }
 0x46e   :  { %v2513_v13 = vsel %vm1903_vm5, %v2512_v17, %v2511_v40  ;;  %v2641_v30 = vsel %vm1895_vm1, %v2640_v38, %v2564_v48  ;;  %v2650_v4 = vrot.slane %v2570_v32, 2  ;;  %v2095_v24 = vrot.slane %v5095_v6, 1 }
 0x46f   :  { %v2515_v25 = vsel %vm1905_vm6, %v2514_v36, %v2513_v13  ;;  %v2643_v56 = vsel %vm1897_vm2, %v2642_v46, %v2641_v30  ;;  %v2096_v21 = vrot.slane %v5095_v6, 2  ;;  %v2097_v53 = vrot.slane %v5095_v6, 3 }
 0x470   :  { %v5310_v35 = vsel %vm1907_vm7, %v2516_v12, %v2515_v25  ;;  %v2645_v2 = vsel %vm1899_vm3, %v2644_v58, %v2643_v56  ;;  %v2652_v36 = vrot.slane %v2571_v28, 1  ;;  %v2098_v48 = vrot.slane %v5095_v6, 4 }
 0x471   :  { %v2542_v17 = vsel %vm74_vm0, %v5310_v35, 0.0  ;;  %v2647_v8 = vsel %vm1901_vm4, %v2646_v22, %v2645_v2  ;;  %v2099_v3 = vrot.slane %v5095_v6, 5  ;;  %v2100_v60 = vrot.slane %v5095_v6, 6 }
 0x472   :  { %2543 = vadd.xlane.f32.xlu0 %v2542_v17  ;;  %v2101_v31 = vrot.slane %v5095_v6, 7  ;;  %v2649_v12 = vsel %vm1903_vm5, %v2648_v62, %v2647_v8  ;;  %v2158_v55 = vsub.f32 %v4839_v0, %v5095_v6  ;;  %v2159_v32 = vsub.f32 %v4843_v26, %v2095_v24 }
 0x473   :  { %v2160_v40 = vsub.f32 %v4847_v29, %v2096_v21  ;;  %v2651_v28 = vsel %vm1905_vm6, %v2650_v4, %v2649_v12  ;;  %v2161_v38 = vsub.f32 %v4858_v52, %v2097_v53  ;;  %v2162_v46 = vsub.f32 %v4862_v42, %v2098_v48 }
 0x474   :  { %v2163_v13 = vsub.f32 %v4872_v43, %v2099_v3  ;;  %v2653_v58 = vsel %vm1907_vm7, %v2652_v36, %v2651_v28  ;;  %v2164_v22 = vsub.f32 %v4877_v16, %v2100_v60  ;;  %v2165_v62 = vsub.f32 %v4880_v15, %v2101_v31 }
 0x475   :  { %v2199_v0 = vrot.slane %v5224_v51, 1  ;;  %v2678_v26 = vsel %vm74_vm0, %v2653_v58, 0.0  ;;  %v2200_v29 = vrot.slane %v5224_v51, 2  ;;  %v2201_v6 = vrot.slane %v5224_v51, 3 }
 0x476   :  { %v2202_v52 = vrot.slane %v5224_v51, 4  ;;  %2679 = vadd.xlane.f32.xlu0 %v2678_v26  ;;  %v2203_v42 = vrot.slane %v5224_v51, 5  ;;  %v2204_v43 = vrot.slane %v5224_v51, 6  ;;  %v2205_v25 = vrot.slane %v5224_v51, 7 }
 0x477   :  { %v2262_v16 = vmul.f32 %v5224_v51, %v2158_v55  ;;  %v2263_v15 = vmul.f32 %v2199_v0, %v2159_v32  ;;  %v2264_v30 = vmul.f32 %v2200_v29, %v2160_v40  ;;  %v2265_v4 = vmul.f32 %v2201_v6, %v2161_v38 }
 0x478   :  { %v2266_v24 = vmul.f32 %v2202_v52, %v2162_v46  ;;  %v2267_v56 = vmul.f32 %v2203_v42, %v2163_v13  ;;  %v2268_v21 = vmul.f32 %v2204_v43, %v2164_v22  ;;  %v2269_v53 = vmul.f32 %v2205_v25, %v2165_v62 }
 0x479   :  { %v2300_v17 = vmul.f32 %v4999_v1, %v2262_v16  ;;  %v2301_v2 = vmul.f32 %v4999_v1, %v2263_v15  ;;  %v2302_v36 = vmul.f32 %v4999_v1, %v2264_v30  ;;  %v2303_v48 = vmul.f32 %v4999_v1, %v2265_v4 }
 0x47a   :  { %v2304_v8 = vmul.f32 %v4999_v1, %v2266_v24  ;;  %v2305_v3 = vmul.f32 %v4999_v1, %v2267_v56  ;;  %v2306_v51 = vmul.f32 %v4999_v1, %v2268_v21  ;;  %v2307_v60 = vmul.f32 %v4999_v1, %v2269_v53 }
 0x47b   :  { %v2338_v31 = vadd.f32 %v5006_v47, %v2300_v17  ;;  %v2339_v12 = vadd.f32 %v5006_v47, %v2301_v2  ;;  %v2340_v55 = vadd.f32 %v5006_v47, %v2302_v36  ;;  %v2341_v32 = vadd.f32 %v5006_v47, %v2303_v48 }
 0x47c   :  { %v2342_v40 = vadd.f32 %v5006_v47, %v2304_v8  ;;  %v2343_v28 = vadd.f32 %v5006_v47, %v2305_v3  ;;  %v2344_v38 = vadd.f32 %v5006_v47, %v2306_v51  ;;  %v2345_v46 = vadd.f32 %v5006_v47, %v2307_v60 }
 0x47d   :  { %v5361_v13 = vadd.f32 %v4946_v18, %v2338_v31  ;;  %v5744_v1 = vrot.slane %v4946_v18, 1  ;;  %v5745_v22 = vrot.slane %v4946_v18, 2  ;;  %v5746_v0 = vrot.slane %v4946_v18, 3 }
 0x47e   :  { %v5747_v29 = vrot.slane %v4946_v18, 4  ;;  %v5748_v47 = vrot.slane %v4946_v18, 5  ;;  %v5749_v25 = vrot.slane %v4946_v18, 6  ;;  %v5391_v15 = vadd.f32 %v2377_v50, %v2345_v46 }
 0x47f   :  { %v5365_v58 = vadd.f32 %v5744_v1, %v2339_v12  ;;  %v5369_v62 = vadd.f32 %v5745_v22, %v2340_v55  ;;  %v5373_v26 = vadd.f32 %v5746_v0, %v2341_v32  ;;  %v2572_v30 = vmul.f32 %v5361_v13, %v5361_v13 }
 0x480   :  { %v5377_v6 = vadd.f32 %v5747_v29, %v2342_v40  ;;  %v5381_v52 = vadd.f32 %v5748_v47, %v2343_v28  ;;  %v5387_v16 = vadd.f32 %v5749_v25, %v2344_v38  ;;  %v2530_v31 = vrot.slane %v5391_v15, 1 }
 0x481   :  { %v2518_v42 = vrot.slane %v5365_v58, 7  ;;  %v2520_v43 = vrot.slane %v5369_v62, 6  ;;  %v2573_v4 = vmul.f32 %v5365_v58, %v5365_v58  ;;  %v2522_v56 = vrot.slane %v5373_v26, 5 }
 0x482   :  { %v2574_v21 = vmul.f32 %v5369_v62, %v5369_v62  ;;  %v2575_v53 = vmul.f32 %v5373_v26, %v5373_v26  ;;  %v2524_v50 = vrot.slane %v5377_v6, 4  ;;  %v2526_v17 = vrot.slane %v5381_v52, 3 }
 0x483   :  { %v2519_v24 = vsel %vm1895_vm1, %v2518_v42, %v5361_v13  ;;  %v2576_v2 = vmul.f32 %v5377_v6, %v5377_v6  ;;  %v2577_v48 = vmul.f32 %v5381_v52, %v5381_v52  ;;  %v2654_v8 = vrot.slane %v2573_v4, 7 }
 0x484   :  { %v2521_v18 = vsel %vm1897_vm2, %v2520_v43, %v2519_v24  ;;  %v2656_v3 = vrot.slane %v2574_v21, 6  ;;  %v2528_v60 = vrot.slane %v5387_v16, 2  ;;  %v2578_v12 = vmul.f32 %v5387_v16, %v5387_v16  ;;  %v2979_v21 = vld [vmem:[#allocation2 + $0x18] sm:$0xff] }
 0x485   :  { %v2523_v36 = vsel %vm1899_vm3, %v2522_v56, %v2521_v18  ;;  %v2579_v32 = vmul.f32 %v5391_v15, %v5391_v15  ;;  %v2655_v40 = vsel %vm1895_vm1, %v2654_v8, %v2572_v30  ;;  %v2658_v28 = vrot.slane %v2575_v53, 5  ;;  %v2978_v53 = vld [vmem:[#allocation2 + $0x10] sm:$0xff]  ;;  %3608 = vmatprep.subr.mxu0 %v2979_v21  ;;  %v2977_v18 = vld [vmem:[#allocation2 + $0x8] sm:$0xff] }
 0x486   :  { %v2525_v51 = vsel %vm1901_vm4, %v2524_v50, %v2523_v36  ;;  %v2657_v46 = vsel %vm1897_vm2, %v2656_v3, %v2655_v40  ;;  %v2660_v1 = vrot.slane %v2576_v2, 4  ;;  %v2662_v29 = vrot.slane %v2577_v48, 3  ;;  %3609 = vmatpush3.msra.mxu0 %v2979_v21  ;;  %v2976_v50 = vld [vmem:[#allocation2] sm:$0xff] }
 0x487   :  { %v2527_v55 = vsel %vm1903_vm5, %v2526_v17, %v2525_v51  ;;  %v2659_v0 = vsel %vm1899_vm3, %v2658_v28, %v2657_v46  ;;  %v2664_v43 = vrot.slane %v2578_v12, 2  ;;  %v2666_v30 = vrot.slane %v2579_v32, 1  ;;  %3610 = vmatprep.subr.mxu0 %v2978_v53  ;;  %v5445_v21 = vld [vmem:[%s5704_s7] ss:$0 sm:$0xff] }
 0x488   :  { %v2529_v38 = vsel %vm1905_vm6, %v2528_v60, %v2527_v55  ;;  %v2661_v42 = vsel %vm1901_vm4, %v2660_v1, %v2659_v0  ;;  %3611 = vmatpush3.msra.mxu0 %v2978_v53 }
 0x489   :  { %v5424_v22 = vsel %vm1907_vm7, %v2530_v31, %v2529_v38  ;;  %v2663_v25 = vsel %vm1903_vm5, %v2662_v29, %v2661_v42  ;;  %3612 = vmatprep.subr.mxu0 %v2977_v18 }
 0x48a   :  { %v2545_v47 = vsel %vm74_vm0, %v5424_v22, 0.0  ;;  %v2665_v4 = vsel %vm1905_vm6, %v2664_v43, %v2663_v25  ;;  %3613 = vmatpush3.msra.mxu0 %v2977_v18 }
 0x48b   :  { %2546 = vadd.xlane.f32.xlu1 %v2545_v47  ;;  %v2667_v24 = vsel %vm1907_vm7, %v2666_v30, %v2665_v4  ;;  %3614 = vmatprep.subr.mxu0 %v2976_v50 }
 0x48c   :  { %v2681_v56 = vsel %vm74_vm0, %v2667_v24, 0.0  ;;  %3615 = vmatpush3.msra.mxu0 %v2976_v50  ;;  %v5750_v50 = vld [vmem:[#allocation8_spill] sm:$0xff] }
 0x48f   :  { %2682 = vadd.xlane.f32.xlu1 %v2681_v56 }
 0x4ca   :  { %v2541_v17 = vpop.xlane.xlu1 %2540 }
 0x4cb   :  { %v2685_v2 = vmul.f32 0.03125, %v2541_v17 }
 0x4cd   :  { %v2693_v48 = vmul.f32 %v2685_v2, %v2685_v2  ;;  %v2711_v12 = vrot.slane %v2685_v2, 1  ;;  %v2712_v40 = vrot.slane %v2685_v2, 2  ;;  %v2713_v28 = vrot.slane %v2685_v2, 3 }
 0x4ce   :  { %v2714_v1 = vrot.slane %v2685_v2, 4  ;;  %v2772_v0 = vsub.f32 %v5028_v54, %v2685_v2  ;;  %v2715_v54 = vrot.slane %v2685_v2, 5 }
 0x4cf   :  { %v2677_v36 = vpop.xlane.xlu1 %2676  ;;  %v2773_v47 = vsub.f32 %v5032_v44, %v2711_v12  ;;  %v2774_v25 = vsub.f32 %v5036_v59, %v2712_v40  ;;  %v2775_v30 = vsub.f32 %v5040_v20, %v2713_v28  ;;  %v2717_v59 = vrot.slane %v2685_v2, 7  ;;  %v5454_v12 = vld [vmem:[%s5705_s8] ss:$0 sm:$0xff] }
 0x4d0   :  { %v2689_v8 = vmul.f32 0.03125, %v2677_v36  ;;  %v2776_v17 = vsub.f32 %v5750_v50, %v2714_v1 }
 0x4d2   :  { %v2697_v3 = vsub.f32 %v2689_v8, %v2693_v48  ;;  %v2716_v48 = vrot.slane %v2685_v2, 6 }
 0x4d4   :  { %v2797_v51 = vadd.f32 1e-05, %v2697_v3 }
 0x4d6   :  { %3803 = vrsqrt.f32 %v2797_v51 }
 0x4e2   :  { %v2538_v60 = vpop.xlane.xlu0 %2537 }
 0x4e3   :  { %v5434_v31 = vmul.f32 0.03125, %v2538_v60  ;;  %v3804_v55 = vpop.eup %3803 }
 0x4e4   :  { %v2815_v42 = vrot.slane %v3804_v55, 1  ;;  %v2816_v43 = vrot.slane %v3804_v55, 2  ;;  %v2817_v4 = vrot.slane %v3804_v55, 3  ;;  %v2818_v24 = vrot.slane %v3804_v55, 4 }
 0x4e5   :  { %v2692_v38 = vmul.f32 %v5434_v31, %v5434_v31  ;;  %v2876_v53 = vmul.f32 %v3804_v55, %v2772_v0  ;;  %v2819_v8 = vrot.slane %v3804_v55, 5  ;;  %v2779_v0 = vsub.f32 %v5061_v61, %v2717_v59 }
 0x4e6   :  { %v2674_v32 = vpop.xlane.xlu0 %2673  ;;  %v2877_v18 = vmul.f32 %v2815_v42, %v2773_v47  ;;  %v2878_v44 = vmul.f32 %v2816_v43, %v2774_v25  ;;  %v2879_v36 = vmul.f32 %v2817_v4, %v2775_v30  ;;  %v2880_v20 = vmul.f32 %v2818_v24, %v2776_v17 }
 0x4e7   :  { %v2688_v46 = vmul.f32 0.03125, %v2674_v32  ;;  %v2914_v3 = vmul.f32 %v5445_v21, %v2876_v53  ;;  %v5751_v32 = vld [vmem:[#allocation9_spill] sm:$0xff]  ;;  %v2821_v47 = vrot.slane %v3804_v55, 7  ;;  %v2704_v4 = vrot.slane %v5434_v31, 1 }
 0x4e8   :  { %v2915_v51 = vmul.f32 %v5445_v21, %v2877_v18  ;;  %v2916_v60 = vmul.f32 %v5445_v21, %v2878_v44  ;;  %v2777_v40 = vsub.f32 %v5751_v32, %v2715_v54  ;;  %v2917_v28 = vmul.f32 %v5445_v21, %v2879_v36 }
 0x4e9   :  { %v2696_v29 = vsub.f32 %v2688_v46, %v2692_v38  ;;  %v5752_v46 = vld [vmem:[#allocation10_spill] sm:$0xff]  ;;  %v2918_v43 = vmul.f32 %v5445_v21, %v2880_v20  ;;  %v2952_v25 = vadd.f32 %v5454_v12, %v2914_v3  ;;  %v2705_v24 = vrot.slane %v5434_v31, 2 }
 0x4ea   :  { %v2953_v38 = vadd.f32 %v5454_v12, %v2915_v51  ;;  %v2954_v2 = vadd.f32 %v5454_v12, %v2916_v60  ;;  %v2778_v1 = vsub.f32 %v5752_v46, %v2716_v48  ;;  %v2881_v42 = vmul.f32 %v2819_v8, %v2777_v40 }
 0x4eb   :  { %v2796_v56 = vadd.f32 1e-05, %v2696_v29  ;;  %v2820_v29 = vrot.slane %v3804_v55, 6  ;;  %v2707_v18 = vrot.slane %v5434_v31, 4  ;;  %v2708_v54 = vrot.slane %v5434_v31, 5 }
 0x4ec   :  { %v3033_v30 = vrot.slane %v2953_v38, 7  ;;  %v3035_v53 = vrot.slane %v2954_v2, 6  ;;  %v2955_v61 = vadd.f32 %v5454_v12, %v2917_v28  ;;  %v2709_v50 = vrot.slane %v5434_v31, 6 }
 0x4ed   :  { %3805 = vrsqrt.f32 %v2796_v56  ;;  %v2706_v56 = vrot.slane %v5434_v31, 3  ;;  %v2710_v17 = vrot.slane %v5434_v31, 7  ;;  %v2882_v44 = vmul.f32 %v2820_v29, %v2778_v1 }
 0x4ee   :  { %v3034_v55 = vsel %vm1895_vm1, %v3033_v30, %v2952_v25  ;;  %v2883_v36 = vmul.f32 %v2821_v47, %v2779_v0  ;;  %v2919_v48 = vmul.f32 %v5445_v21, %v2881_v42  ;;  %v2956_v59 = vadd.f32 %v5454_v12, %v2918_v43 }
 0x4ef   :  { %v2764_v8 = vsub.f32 %v5138_v10, %v5434_v31  ;;  %v2765_v20 = vsub.f32 %v5142_v34, %v2704_v4  ;;  %v2766_v3 = vsub.f32 %v5146_v7, %v2705_v24  ;;  %v3036_v51 = vsel %vm1897_vm2, %v3035_v53, %v3034_v55 }
 0x4f0   :  { %v2767_v60 = vsub.f32 %v5150_v49, %v2706_v56  ;;  %v2768_v32 = vsub.f32 %v5154_v37, %v2707_v18  ;;  %v2769_v40 = vsub.f32 %v5158_v9, %v2708_v54  ;;  %v3037_v28 = vrot.slane %v2955_v61, 5 }
 0x4f1   :  { %v2770_v2 = vsub.f32 %v5162_v33, %v2709_v50  ;;  %v2771_v46 = vsub.f32 %v5166_v45, %v2710_v17  ;;  %v2920_v10 = vmul.f32 %v5445_v21, %v2882_v44  ;;  %v2921_v34 = vmul.f32 %v5445_v21, %v2883_v36 }
 0x4f2   :  { %v2957_v1 = vadd.f32 %v5454_v12, %v2919_v48  ;;  %v3038_v49 = vsel %vm1899_vm3, %v3037_v28, %v3036_v51  ;;  %v3039_v37 = vrot.slane %v2956_v59, 4 }
 0x4fa   :  { %v3806_v31 = vpop.eup %3805 }
 0x4fb   :  { %v2544_v38 = vpop.xlane.xlu0 %2543  ;;  %v2808_v0 = vrot.slane %v3806_v31, 1  ;;  %v2809_v9 = vrot.slane %v3806_v31, 2  ;;  %v2810_v29 = vrot.slane %v3806_v31, 3  ;;  %v2811_v47 = vrot.slane %v3806_v31, 4 }
 0x4fc   :  { %v5487_v7 = vmul.f32 0.03125, %v2544_v38  ;;  %v2812_v45 = vrot.slane %v3806_v31, 5  ;;  %v2813_v42 = vrot.slane %v3806_v31, 6  ;;  %v2814_v43 = vrot.slane %v3806_v31, 7 }
 0x4fd   :  { %v2868_v25 = vmul.f32 %v3806_v31, %v2764_v8  ;;  %v2869_v30 = vmul.f32 %v2808_v0, %v2765_v20  ;;  %v2870_v4 = vmul.f32 %v2809_v9, %v2766_v3  ;;  %v2871_v24 = vmul.f32 %v2810_v29, %v2767_v60 }
 0x4fe   :  { %v2694_v33 = vmul.f32 %v5487_v7, %v5487_v7  ;;  %v2872_v53 = vmul.f32 %v2811_v47, %v2768_v32  ;;  %v2873_v18 = vmul.f32 %v2812_v45, %v2769_v40  ;;  %v2874_v54 = vmul.f32 %v2813_v42, %v2770_v2 }
 0x4ff   :  { %v2680_v56 = vpop.xlane.xlu0 %2679  ;;  %v2875_v61 = vmul.f32 %v2814_v43, %v2771_v46  ;;  %v2906_v50 = vmul.f32 %v5445_v21, %v2868_v25  ;;  %v2907_v17 = vmul.f32 %v5445_v21, %v2869_v30  ;;  %v2908_v44 = vmul.f32 %v5445_v21, %v2870_v4 }
 0x500   :  { %v2690_v55 = vmul.f32 0.03125, %v2680_v56  ;;  %v2909_v36 = vmul.f32 %v5445_v21, %v2871_v24  ;;  %v2910_v48 = vmul.f32 %v5445_v21, %v2872_v53  ;;  %v2911_v59 = vmul.f32 %v5445_v21, %v2873_v18 }
 0x501   :  { %v2912_v8 = vmul.f32 %v5445_v21, %v2874_v54  ;;  %v2913_v3 = vmul.f32 %v5445_v21, %v2875_v61  ;;  %v2945_v51 = vadd.f32 %v5454_v12, %v2907_v17  ;;  %v2958_v60 = vadd.f32 %v5454_v12, %v2920_v10 }
 0x502   :  { %v2698_v20 = vsub.f32 %v2690_v55, %v2694_v33  ;;  %v2946_v32 = vadd.f32 %v5454_v12, %v2908_v44  ;;  %v2947_v40 = vadd.f32 %v5454_v12, %v2909_v36  ;;  %v2948_v28 = vadd.f32 %v5454_v12, %v2910_v48 }
 0x503   :  { %v3040_v38 = vsel %vm1901_vm4, %v3039_v37, %v3038_v49  ;;  %v2944_v46 = vadd.f32 %v5454_v12, %v2906_v50  ;;  %v2949_v31 = vadd.f32 %v5454_v12, %v2911_v59  ;;  %v3019_v0 = vrot.slane %v2945_v51, 7 }
 0x504   :  { %v2798_v2 = vadd.f32 1e-05, %v2698_v20  ;;  %v2950_v9 = vadd.f32 %v5454_v12, %v2912_v8  ;;  %v3021_v29 = vrot.slane %v2946_v32, 6  ;;  %v3041_v47 = vrot.slane %v2957_v1, 3 }
 0x505   :  { %v2951_v10 = vadd.f32 %v5454_v12, %v2913_v3  ;;  %v3020_v33 = vsel %vm1895_vm1, %v3019_v0, %v2944_v46  ;;  %v3023_v45 = vrot.slane %v2947_v40, 5  ;;  %v3025_v43 = vrot.slane %v2948_v28, 4 }
 0x506   :  { %3807 = vrsqrt.f32 %v2798_v2  ;;  %v3022_v42 = vsel %vm1897_vm2, %v3021_v29, %v3020_v33  ;;  %v2959_v49 = vadd.f32 %v5454_v12, %v2921_v34  ;;  %v3042_v37 = vsel %vm1903_vm5, %v3041_v47, %v3040_v38 }
 0x507   :  { %v3024_v25 = vsel %vm1899_vm3, %v3023_v45, %v3022_v42  ;;  %v3027_v30 = vrot.slane %v2949_v31, 3  ;;  %v3043_v4 = vrot.slane %v2958_v60, 2  ;;  %v3029_v1 = vrot.slane %v2950_v9, 2 }
 0x508   :  { %v3026_v24 = vsel %vm1901_vm4, %v3025_v43, %v3024_v25  ;;  %v3031_v53 = vrot.slane %v2951_v10, 1  ;;  %v3045_v61 = vrot.slane %v2959_v49, 1  ;;  %v2718_v50 = vrot.slane %v5487_v7, 1 }
 0x509   :  { %v3028_v56 = vsel %vm1903_vm5, %v3027_v30, %v3026_v24  ;;  %v3044_v18 = vsel %vm1905_vm6, %v3043_v4, %v3042_v37  ;;  %v2719_v17 = vrot.slane %v5487_v7, 2  ;;  %v2720_v44 = vrot.slane %v5487_v7, 3 }
 0x50a   :  { %v3030_v54 = vsel %vm1905_vm6, %v3029_v1, %v3028_v56  ;;  %v3046_v34 = vsel %vm1907_vm7, %v3045_v61, %v3044_v18  ;;  %v2721_v36 = vrot.slane %v5487_v7, 4  ;;  %v2722_v48 = vrot.slane %v5487_v7, 5 }
 0x50b   :  { %v3032_v55 = vsel %vm1907_vm7, %v3031_v53, %v3030_v54  ;;  %v2723_v59 = vrot.slane %v5487_v7, 6  ;;  %v2724_v8 = vrot.slane %v5487_v7, 7  ;;  %v2780_v20 = vsub.f32 %v5246_v27, %v5487_v7 }
 0x50c   :  { %3616 = vmatprep.mubr.msk.f32.mxu0 %vm74_vm0, %v3032_v55  ;;  %v2781_v51 = vsub.f32 %v5250_v11, %v2718_v50  ;;  %v2782_v60 = vsub.f32 %v5254_v14, %v2719_v17  ;;  %v2783_v32 = vsub.f32 %v5258_v39, %v2720_v44  ;;  %v2784_v40 = vsub.f32 %v5262_v19, %v2721_v36 }
 0x50d   :  { %3617 = vmatmul.mubr.msk.f32.vlgmr.msra.gmra.mxu0 %vm74_vm0, %v3046_v34  ;;  %v2785_v2 = vsub.f32 %v5266_v57, %v2722_v48  ;;  %v2786_v46 = vsub.f32 %v5270_v41, %v2723_v59  ;;  %v2787_v31 = vsub.f32 %v5274_v5, %v2724_v8 }
 0x513   :  { %v3808_v28 = vpop.eup %3807 }
 0x514   :  { %v2547_v3 = vpop.xlane.xlu1 %2546  ;;  %v2822_v0 = vrot.slane %v3808_v28, 1  ;;  %v2823_v27 = vrot.slane %v3808_v28, 2  ;;  %v2824_v7 = vrot.slane %v3808_v28, 3  ;;  %v2825_v9 = vrot.slane %v3808_v28, 4 }
 0x515   :  { %v5537_v38 = vmul.f32 0.03125, %v2547_v3  ;;  %v2826_v14 = vrot.slane %v3808_v28, 5  ;;  %v2827_v39 = vrot.slane %v3808_v28, 6  ;;  %v2828_v29 = vrot.slane %v3808_v28, 7 }
 0x516   :  { %v2884_v47 = vmul.f32 %v3808_v28, %v2780_v20  ;;  %v2885_v10 = vmul.f32 %v2822_v0, %v2781_v51  ;;  %v2886_v33 = vmul.f32 %v2823_v27, %v2782_v60  ;;  %v2887_v45 = vmul.f32 %v2824_v7, %v2783_v32 }
 0x517   :  { %v2695_v11 = vmul.f32 %v5537_v38, %v5537_v38  ;;  %v2888_v42 = vmul.f32 %v2825_v9, %v2784_v40  ;;  %v2889_v41 = vmul.f32 %v2826_v14, %v2785_v2  ;;  %v2890_v43 = vmul.f32 %v2827_v39, %v2786_v46 }
 0x518   :  { %v2683_v19 = vpop.xlane.xlu1 %2682  ;;  %v2891_v5 = vmul.f32 %v2828_v29, %v2787_v31  ;;  %v2922_v49 = vmul.f32 %v5445_v21, %v2884_v47  ;;  %v2923_v37 = vmul.f32 %v5445_v21, %v2885_v10  ;;  %v2924_v25 = vmul.f32 %v5445_v21, %v2886_v33 }
 0x519   :  { %v2691_v57 = vmul.f32 0.03125, %v2683_v19  ;;  %v2925_v4 = vmul.f32 %v5445_v21, %v2887_v45  ;;  %v2926_v24 = vmul.f32 %v5445_v21, %v2888_v42  ;;  %v2927_v1 = vmul.f32 %v5445_v21, %v2889_v41 }
 0x51a   :  { %v2928_v56 = vmul.f32 %v5445_v21, %v2890_v43  ;;  %v2929_v53 = vmul.f32 %v5445_v21, %v2891_v5  ;;  %v2961_v18 = vadd.f32 %v5454_v12, %v2923_v37  ;;  %v2962_v61 = vadd.f32 %v5454_v12, %v2924_v25 }
 0x51b   :  { %v2699_v30 = vsub.f32 %v2691_v57, %v2695_v11  ;;  %v2963_v55 = vadd.f32 %v5454_v12, %v2925_v4  ;;  %v2964_v34 = vadd.f32 %v5454_v12, %v2926_v24  ;;  %v2960_v50 = vadd.f32 %v5454_v12, %v2922_v49 }
 0x51c   :  { %v2965_v17 = vadd.f32 %v5454_v12, %v2927_v1  ;;  %v3047_v44 = vrot.slane %v2961_v18, 7  ;;  %v2966_v36 = vadd.f32 %v5454_v12, %v2928_v56  ;;  %v3049_v48 = vrot.slane %v2962_v61, 6 }
 0x51d   :  { %v2799_v54 = vadd.f32 1e-05, %v2699_v30  ;;  %v2967_v59 = vadd.f32 %v5454_v12, %v2929_v53  ;;  %v3051_v20 = vrot.slane %v2963_v55, 5  ;;  %v3053_v51 = vrot.slane %v2964_v34, 4 }
 0x51e   :  { %v3048_v8 = vsel %vm1895_vm1, %v3047_v44, %v2960_v50  ;;  %v3055_v32 = vrot.slane %v2965_v17, 3  ;;  %v3057_v28 = vrot.slane %v2966_v36, 2  ;;  %v2725_v27 = vrot.slane %v5537_v38, 1 }
 0x51f   :  { %3809 = vrsqrt.f32 %v2799_v54  ;;  %v3050_v3 = vsel %vm1897_vm2, %v3049_v48, %v3048_v8  ;;  %v3059_v46 = vrot.slane %v2967_v59, 1  ;;  %v2726_v7 = vrot.slane %v5537_v38, 2 }
 0x520   :  { %v3052_v60 = vsel %vm1899_vm3, %v3051_v20, %v3050_v3  ;;  %v2727_v9 = vrot.slane %v5537_v38, 3  ;;  %v2728_v11 = vrot.slane %v5537_v38, 4  ;;  %v2729_v14 = vrot.slane %v5537_v38, 5 }
 0x521   :  { %v3054_v40 = vsel %vm1901_vm4, %v3053_v51, %v3052_v60  ;;  %v2730_v39 = vrot.slane %v5537_v38, 6  ;;  %v2731_v29 = vrot.slane %v5537_v38, 7  ;;  %v2788_v19 = vsub.f32 %v5361_v13, %v5537_v38 }
 0x522   :  { %v3056_v2 = vsel %vm1903_vm5, %v3055_v32, %v3054_v40  ;;  %v2789_v47 = vsub.f32 %v5365_v58, %v2725_v27  ;;  %v2790_v10 = vsub.f32 %v5369_v62, %v2726_v7  ;;  %v2791_v33 = vsub.f32 %v5373_v26, %v2727_v9 }
 0x523   :  { %v3058_v31 = vsel %vm1905_vm6, %v3057_v28, %v3056_v2  ;;  %v2792_v57 = vsub.f32 %v5377_v6, %v2728_v11  ;;  %v2793_v42 = vsub.f32 %v5381_v52, %v2729_v14  ;;  %v2794_v41 = vsub.f32 %v5387_v16, %v2730_v39 }
 0x524   :  { %v3060_v0 = vsel %vm1907_vm7, %v3059_v46, %v3058_v31  ;;  %v2795_v43 = vsub.f32 %v5391_v15, %v2731_v29 }
 0x525   :  { %3619 = vmatprep.mubr.msk.f32.mxu0 %vm74_vm0, %v3060_v0 }
 0x52c   :  { %v3810_v45 = vpop.eup %3809 }
 0x52d   :  { %v2829_v5 = vrot.slane %v3810_v45, 1  ;;  %v2830_v49 = vrot.slane %v3810_v45, 2  ;;  %v2831_v37 = vrot.slane %v3810_v45, 3  ;;  %v2832_v25 = vrot.slane %v3810_v45, 4 }
 0x52e   :  { %v2833_v13 = vrot.slane %v3810_v45, 5  ;;  %v2834_v38 = vrot.slane %v3810_v45, 6  ;;  %v2835_v58 = vrot.slane %v3810_v45, 7  ;;  %v2892_v30 = vmul.f32 %v3810_v45, %v2788_v19 }
 0x52f   :  { %v2893_v62 = vmul.f32 %v2829_v5, %v2789_v47  ;;  %v2894_v4 = vmul.f32 %v2830_v49, %v2790_v10  ;;  %v2895_v26 = vmul.f32 %v2831_v37, %v2791_v33  ;;  %v2896_v24 = vmul.f32 %v2832_v25, %v2792_v57 }
 0x530   :  { %v2897_v1 = vmul.f32 %v2833_v13, %v2793_v42  ;;  %v2898_v6 = vmul.f32 %v2834_v38, %v2794_v41  ;;  %v2899_v56 = vmul.f32 %v2835_v58, %v2795_v43  ;;  %v2930_v52 = vmul.f32 %v5445_v21, %v2892_v30 }
 0x531   :  { %v2931_v16 = vmul.f32 %v5445_v21, %v2893_v62  ;;  %v2932_v15 = vmul.f32 %v5445_v21, %v2894_v4  ;;  %v2933_v53 = vmul.f32 %v5445_v21, %v2895_v26  ;;  %v2934_v18 = vmul.f32 %v5445_v21, %v2896_v24 }
 0x532   :  { %v2935_v54 = vmul.f32 %v5445_v21, %v2897_v1  ;;  %v2936_v61 = vmul.f32 %v5445_v21, %v2898_v6  ;;  %v2937_v55 = vmul.f32 %v5445_v21, %v2899_v56  ;;  %v2968_v36 = vadd.f32 %v5454_v12, %v2930_v52 }
 0x533   :  { %v2969_v34 = vadd.f32 %v5454_v12, %v2931_v16  ;;  %v2970_v50 = vadd.f32 %v5454_v12, %v2932_v15  ;;  %v2971_v17 = vadd.f32 %v5454_v12, %v2933_v53  ;;  %v2972_v44 = vadd.f32 %v5454_v12, %v2934_v18 }
 0x534   :  { %v2973_v48 = vadd.f32 %v5454_v12, %v2935_v54  ;;  %v2974_v20 = vadd.f32 %v5454_v12, %v2936_v61  ;;  %v2975_v3 = vadd.f32 %v5454_v12, %v2937_v55  ;;  %v3461_v12 = vld [vmem:[%s5707_s10] ss:$0 sm:$0xff] }
 0x535   :  { %v3061_v59 = vrot.slane %v2969_v34, 7  ;;  %v3063_v8 = vrot.slane %v2970_v50, 6  ;;  %v3065_v51 = vrot.slane %v2971_v17, 5  ;;  %v3067_v32 = vrot.slane %v2972_v44, 4  ;;  %v3278_v44 = vld [vmem:[%s5710_s13 + $0x38] sm:$0xff] }
 0x536   :  { %v3069_v28 = vrot.slane %v2973_v48, 3  ;;  %v3071_v46 = vrot.slane %v2974_v20, 2  ;;  %v3073_v0 = vrot.slane %v2975_v3, 1  ;;  %3622 = vmatprep.subr.mxu0 %v3278_v44  ;;  %v3276_v48 = vld [vmem:[%s5710_s13 + $0x28] sm:$0xff]  ;;  %v3273_v20 = vld [vmem:[%s5710_s13 + $0x10] sm:$0xff] }
 0x537   :  { %v3062_v21 = vsel %vm1895_vm1, %v3061_v59, %v2968_v36  ;;  %3623 = vmatpush3.msra.mxu0 %v3278_v44  ;;  %v3277_v36 = vld [vmem:[%s5710_s13 + $0x30] sm:$0xff]  ;;  %v3275_v59 = vld [vmem:[%s5710_s13 + $0x20] sm:$0xff]  ;;  %v3272_v3 = vld [vmem:[%s5710_s13 + $0x8] sm:$0xff] }
 0x538   :  { %v3064_v60 = vsel %vm1897_vm2, %v3063_v8, %v3062_v21  ;;  %3624 = vmatprep.subr.mxu0 %v3277_v36  ;;  %v3274_v8 = vld [vmem:[%s5710_s13 + $0x18] sm:$0xff]  ;;  %v3271_v21 = vld [vmem:[%s5710_s13] sm:$0xff] }
 0x539   :  { %v3066_v40 = vsel %vm1899_vm3, %v3065_v51, %v3064_v60  ;;  %3625 = vmatpush3.msra.mxu0 %v3277_v36  ;;  %v3473_v44 = vld [vmem:[%s5712_s15] ss:$0 sm:$0xff] }
 0x53a   :  { %v3068_v2 = vsel %vm1901_vm4, %v3067_v32, %v3066_v40  ;;  %3626 = vmatprep.subr.mxu0 %v3276_v48  ;;  %v3391_v36 = vmul.f32 %v3473_v44, %v5098_v63  ;;  %v3392_v63 = vmul.f32 %v3473_v44, %v5310_v35 }
 0x53b   :  { %v3070_v31 = vsel %vm1903_vm5, %v3069_v28, %v3068_v2  ;;  %3627 = vmatpush3.msra.mxu0 %v3276_v48 }
 0x53c   :  { %v3072_v27 = vsel %vm1905_vm6, %v3071_v46, %v3070_v31  ;;  %3628 = vmatprep.subr.mxu0 %v3275_v59 }
 0x53d   :  { %v3074_v7 = vsel %vm1907_vm7, %v3073_v0, %v3072_v27  ;;  %3629 = vmatpush3.msra.mxu0 %v3275_v59 }
 0x53e   :  { %3620 = vmatmul.mubr.msk.f32.gmra.mxu0 %vm74_vm0, %v3074_v7  ;;  %3630 = vmatprep.subr.mxu0 %v3274_v8 }
 0x53f   :  { %3631 = vmatpush3.msra.mxu0 %v3274_v8  ;;  %v3390_v8 = vmul.f32 %v3473_v44, %v5202_v23 }
 0x540   :  { %3632 = vmatprep.subr.mxu0 %v3273_v20 }
 0x541   :  { %3633 = vmatpush3.msra.mxu0 %v3273_v20 }
 0x542   :  { %3634 = vmatprep.subr.mxu0 %v3272_v3 }
 0x543   :  { %3635 = vmatpush3.msra.mxu0 %v3272_v3 }
 0x544   :  { %3636 = vmatprep.subr.mxu0 %v3271_v21 }
 0x545   :  { %3637 = vmatpush3.msra.mxu0 %v3271_v21 }
 0x5cd   :  { %v3618_v9 = vpop.f32.mrf.mxu0 }
 0x5ce   :  { %v3155_v11 = vadd.f32 %v3618_v9, %v3461_v12 }
 0x5cf   :  { %v3149_v14 = vpop.f32.mrf.mxu0 }
 0x5d0   :  { %v3173_v39 = vmul.f32 0.70710677, %v3155_v11  ;;  %v3150_v29 = vadd.f32 %v3461_v12, %v3149_v14  ;;  %v3169_v10 = vmul.f32 0.5, %v3155_v11 }
 0x5d2   :  { %3811 = verf.f32 %v3173_v39  ;;  %v3172_v19 = vmul.f32 0.70710677, %v3150_v29  ;;  %v3168_v42 = vmul.f32 0.5, %v3150_v29 }
 0x5d4   :  { %3813 = verf.f32 %v3172_v19 }
 0x5df   :  { %v3812_v47 = vpop.eup %3811 }
 0x5e0   :  { %v3181_v33 = vadd.f32 1.0, %v3812_v47  ;;  %v3466_v47 = vld [vmem:[%s5708_s11] ss:$0 sm:$0xff] }
 0x5e1   :  { %v3814_v45 = vpop.eup %3813 }
 0x5e2   :  { %v5611_v57 = vmul.f32 %v3181_v33, %v3169_v10  ;;  %v3180_v41 = vadd.f32 1.0, %v3814_v45 }
 0x5e4   :  { %v5613_v43 = vmul.f32 %v3180_v41, %v3168_v42  ;;  %v3194_v5 = vsel %vm3190_vm8, %v5611_v57, 0.0  ;;  %v3204_v49 = vmul.f32 %v5611_v57, %v5611_v57  ;;  %v3467_v42 = vld [vmem:[%s5709_s12] ss:$0 sm:$0xff] }
 0x5e5   :  { %3195 = vadd.xlane.f32.xlu1 %v3194_v5 }
 0x5e6   :  { %v3191_v37 = vsel %vm3190_vm8, %v5613_v43, 0.0  ;;  %v3203_v25 = vmul.f32 %v5613_v43, %v5613_v43  ;;  %v3210_v13 = vsel %vm3190_vm8, %v3204_v49, 0.0 }
 0x5e7   :  { %3192 = vadd.xlane.f32.xlu0 %v3191_v37 }
 0x5e8   :  { %v3207_v38 = vsel %vm3190_vm8, %v3203_v25, 0.0 }
 0x5e9   :  { %3211 = vadd.xlane.f32.xlu1 %v3210_v13 }
 0x5eb   :  { %3208 = vadd.xlane.f32.xlu0 %v3207_v38 }
 0x5fe   :  { %v3621_v58 = vpop.f32.mrf.mxu0 }
 0x5ff   :  { %v3165_v30 = vadd.f32 %v3621_v58, %v3461_v12 }
 0x600   :  { %v3159_v62 = vpop.f32.mrf.mxu0 }
 0x601   :  { %v3175_v4 = vmul.f32 0.70710677, %v3165_v30  ;;  %v3160_v26 = vadd.f32 %v3461_v12, %v3159_v62  ;;  %v3171_v6 = vmul.f32 0.5, %v3165_v30 }
 0x603   :  { %3815 = verf.f32 %v3175_v4  ;;  %v3174_v24 = vmul.f32 0.70710677, %v3160_v26  ;;  %v3170_v15 = vmul.f32 0.5, %v3160_v26 }
 0x605   :  { %3817 = verf.f32 %v3174_v24 }
 0x610   :  { %v3816_v1 = vpop.eup %3815 }
 0x611   :  { %v3183_v56 = vadd.f32 1.0, %v3816_v1 }
 0x612   :  { %v3818_v52 = vpop.eup %3817 }
 0x613   :  { %v5625_v16 = vmul.f32 %v3183_v56, %v3171_v6  ;;  %v3182_v53 = vadd.f32 1.0, %v3818_v52 }
 0x615   :  { %v5627_v18 = vmul.f32 %v3182_v53, %v3170_v15  ;;  %v3200_v54 = vsel %vm3190_vm8, %v5625_v16, 0.0  ;;  %v3206_v61 = vmul.f32 %v5625_v16, %v5625_v16 }
 0x616   :  { %3201 = vadd.xlane.f32.xlu1 %v3200_v54 }
 0x617   :  { %v3197_v55 = vsel %vm3190_vm8, %v5627_v18, 0.0  ;;  %v3205_v34 = vmul.f32 %v5627_v18, %v5627_v18  ;;  %v3216_v50 = vsel %vm3190_vm8, %v3206_v61, 0.0 }
 0x618   :  { %3198 = vadd.xlane.f32.xlu0 %v3197_v55 }
 0x619   :  { %v3213_v17 = vsel %vm3190_vm8, %v3205_v34, 0.0 }
 0x61a   :  { %3217 = vadd.xlane.f32.xlu1 %v3216_v50 }
 0x61c   :  { %3214 = vadd.xlane.f32.xlu0 %v3213_v17 }
 0x66e   :  { %v3196_v51 = vpop.xlane.xlu1 %3195 }
 0x66f   :  { %v3220_v60 = vmul.f32 0.015625, %v3196_v51 }
 0x670   :  { %v3193_v32 = vpop.xlane.xlu0 %3192 }
 0x671   :  { %v3219_v40 = vmul.f32 0.015625, %v3193_v32  ;;  %v3228_v2 = vmul.f32 %v3220_v60, %v3220_v60  ;;  %v3236_v14 = vsub.f32 %v5611_v57, %v3220_v60  ;;  %v3393_v60 = vmul.f32 %v3473_v44, %v5424_v22 }
 0x672   :  { %v3212_v28 = vpop.xlane.xlu1 %3211 }
 0x673   :  { %v3224_v46 = vmul.f32 0.015625, %v3212_v28  ;;  %v3227_v0 = vmul.f32 %v3219_v40, %v3219_v40  ;;  %v3235_v29 = vsub.f32 %v5613_v43, %v3219_v40 }
 0x674   :  { %v3209_v31 = vpop.xlane.xlu0 %3208 }
 0x675   :  { %v3232_v27 = vsub.f32 %v3224_v46, %v3228_v2  ;;  %v3223_v7 = vmul.f32 0.015625, %v3209_v31 }
 0x677   :  { %v3240_v12 = vadd.f32 1e-05, %v3232_v27  ;;  %v3231_v9 = vsub.f32 %v3223_v7, %v3227_v0 }
 0x679   :  { %3819 = vrsqrt.f32 %v3240_v12  ;;  %v3239_v11 = vadd.f32 1e-05, %v3231_v9 }
 0x67b   :  { %3821 = vrsqrt.f32 %v3239_v11 }
 0x686   :  { %v3820_v39 = vpop.eup %3819 }
 0x687   :  { %v3248_v19 = vmul.f32 %v3820_v39, %v3236_v14 }
 0x688   :  { %v3822_v10 = vpop.eup %3821 }
 0x689   :  { %v3247_v33 = vmul.f32 %v3822_v10, %v3235_v29  ;;  %v3258_v45 = vmul.f32 %v3466_v47, %v3248_v19 }
 0x68b   :  { %v3257_v41 = vmul.f32 %v3466_v47, %v3247_v33  ;;  %v3268_v49 = vadd.f32 %v3467_v42, %v3258_v45 }
 0x68d   :  { %v3267_v5 = vadd.f32 %v3467_v42, %v3257_v41 }
 0x68f   :  { %3638 = vmatprep.mubr.msk.f32.mxu0 %vm3190_vm8, %v3267_v5 }
 0x690   :  { %3639 = vmatmul.mubr.msk.f32.vlgmr.msra.gmra.mxu0 %vm3190_vm8, %v3268_v49 }
 0x69f   :  { %v3202_v57 = vpop.xlane.xlu1 %3201 }
 0x6a0   :  { %v3222_v43 = vmul.f32 0.015625, %v3202_v57 }
 0x6a1   :  { %v3199_v37 = vpop.xlane.xlu0 %3198 }
 0x6a2   :  { %v3221_v25 = vmul.f32 0.015625, %v3199_v37  ;;  %v3230_v38 = vmul.f32 %v3222_v43, %v3222_v43  ;;  %v3238_v56 = vsub.f32 %v5625_v16, %v3222_v43  ;;  %v3468_v16 = vld [vmem:[%s5711_s14] ss:$0 sm:$0xff]  ;;  %s3881_s14 = smov [#allocation5]  }
 0x6a3   :  { %v3218_v13 = vpop.xlane.xlu1 %3217  ;;  %s3407_s15 = sshll.u32 %s3881_s14, 4  ;;  %s3408_s15 = int_to_ptr.vmem [resolvable:$true] %s3407_s15 }
 0x6a4   :  { %v3226_v58 = vmul.f32 0.015625, %v3218_v13  ;;  %v3229_v62 = vmul.f32 %v3221_v25, %v3221_v25  ;;  %v3237_v15 = vsub.f32 %v5627_v18, %v3221_v25  ;;  %s3851_s8 = scalar_lea.vmem %s3408_s15, 512  ;;  %p3856_p6 = scmp.lt.s32.totalorder %s3408_s15, %s3408_s15 }
 0x6a5   :  { %v3215_v30 = vpop.xlane.xlu0 %3214  ;;  %p3852_p5 = scmp.ne.s32.totalorder %s3408_s15, %s3851_s8  ;;  %p3857_p7 = scmp.lt.s32.totalorder %s3851_s8, %s3851_s8 }
 0x6a6   :  { %v3234_v4 = vsub.f32 %v3226_v58, %v3230_v38  ;;  %v3225_v26 = vmul.f32 0.015625, %v3215_v30 }
 0x6a7   :  { %p3858_p8 = por %p3857_p7, %p3856_p6 }
 0x6a8   :  { %v3242_v24 = vadd.f32 1e-05, %v3234_v4  ;;  %v3233_v1 = vsub.f32 %v3225_v26, %v3229_v62 }
 0x6a9   :  { %p3859_p9 = pnand %p3858_p8, %p3852_p5 }
 0x6aa   :  { %3823 = vrsqrt.f32 %v3242_v24  ;;  %v3241_v6 = vadd.f32 1e-05, %v3233_v1 }
 0x6ac   :  { %3825 = vrsqrt.f32 %v3241_v6 }
 0x6b7   :  { %v3824_v52 = vpop.eup %3823 }
 0x6b8   :  { %v3250_v53 = vmul.f32 %v3824_v52, %v3238_v56 }
 0x6b9   :  { %v3826_v54 = vpop.eup %3825 }
 0x6ba   :  { %v3249_v61 = vmul.f32 %v3826_v54, %v3237_v15  ;;  %v3260_v55 = vmul.f32 %v3466_v47, %v3250_v53 }
 0x6bc   :  { %v3259_v34 = vmul.f32 %v3466_v47, %v3249_v61  ;;  %v3270_v17 = vadd.f32 %v3467_v42, %v3260_v55 }
 0x6be   :  { %v3269_v50 = vadd.f32 %v3467_v42, %v3259_v34 }
 0x6c0   :  { %3641 = vmatprep.mubr.msk.f32.mxu0 %vm3190_vm8, %v3269_v50 }
 0x6c1   :  { %3642 = vmatmul.mubr.msk.f32.gmra.mxu0 %vm3190_vm8, %v3270_v17 }
 0x750   :  { %v3640_v18 = vpop.f32.mrf.mxu0 }
 0x751   :  { %v3370_v48 = vadd.f32 %v3640_v18, %v3468_v16 }
 0x752   :  { %v3364_v59 = vpop.f32.mrf.mxu0 }
 0x753   :  { %v3395_v20 = vadd.f32 %v3391_v36, %v3370_v48  ;;  %v3365_v3 = vadd.f32 %v3468_v16, %v3364_v59 }
 0x755   :  { %3399 = vst.msk [vmem:[#allocation5 + $0x8] sm:$0xff] %vm74_vm0, %v3395_v20  ;;  %v3394_v21 = vadd.f32 %v3390_v8, %v3365_v3 }
 0x757   :  { %3398 = vst.msk [vmem:[#allocation5] sm:$0xff] %vm74_vm0, %v3394_v21 }
 0x781   :  { %v3643_v51 = vpop.f32.mrf.mxu0 }
 0x782   :  { %v3380_v32 = vadd.f32 %v3643_v51, %v3468_v16 }
 0x783   :  { %v3374_v40 = vpop.f32.mrf.mxu0 }
 0x784   :  { %v3397_v28 = vadd.f32 %v3393_v60, %v3380_v32  ;;  %v3375_v2 = vadd.f32 %v3468_v16, %v3374_v40 }
 0x786   :  { %3401 = vst.msk [vmem:[#allocation5 + $0x18] sm:$0xff] %vm74_vm0, %v3397_v28  ;;  %v3396_v23 = vadd.f32 %v3392_v63, %v3375_v2 }
 0x788   :  { %3400 = vst.msk [vmem:[#allocation5 + $0x10] sm:$0xff] %vm74_vm0, %v3396_v23 }
 0x789   :  { %3862 = shalt.err (!%p3859_p9)
}
 0x78a   :  { %3413 = dma.vmem_to_hbm [thread:$0]  %s3408_s15, 512, %s5713_s16, [#allocation4], %s3876_s24, %s3876_s24, %s3877_s25  }
 0x78b   :  { %3873 = dma.done.wait [#allocation4], 512  }
 0x78c   :  { %3874 = vsyncadd [#allocation4], 4294966784 }
 0x78d   :  { %3417 = vsyncpa [#allocation3], 1 }
 0x78e   :  { %3418 = vsyncpa [#allocation4], 1 }

</bundles_post_ra>
